<compile_context>
chip_gen: v7x
topology: tpu7x:2x2x1
jax: 0.10.0
libtpu: 0.0.40
codegen_flags: <defaults>
</compile_context>

<pallas_src>
import functools

import jax
import jax.numpy as jnp
from jax import lax
from jax.experimental import pallas as pl
from jax.experimental.pallas import tpu as pltpu


def _round_up(x, m):
    return (x + m - 1) // m * m


def _sigmoid_via_tanh(x):
    # sigmoid(x) == 0.5 * tanh(0.5 * x) + 0.5 : one EUP push per gate instead
    # of exp + divide; the EUP is the saturated unit at tiny batch sizes.
    return 0.5 * jnp.tanh(0.5 * x) + 0.5


def _lstm_block_kernel(x_ref, wih_ref, whh_ref, o_ref, h_scr, c_scr, pre_scr,
                       *, tt, bb, hp, matmul_dtype, unroll):
    """One grid step == Tt LSTM time steps.  h/c carried in VMEM scratch."""
    tb = pl.program_id(1)            # time-block index (innermost grid axis)

    @pl.when(tb == 0)
    def _():
        h_scr[...] = jnp.zeros_like(h_scr)
        c_scr[...] = jnp.zeros_like(c_scr)

    # Whole-block input projection (+ bias via the augmented ones column of X)
    # as a single MXU matmul: (Tt*Bb, Ip) @ (Ip, 4*Hp) -> VMEM scratch.
    ip = x_ref.shape[-1]
    x2d = x_ref[...].reshape(tt * bb, ip)
    pre_scr[...] = jnp.dot(
        x2d, wih_ref[...], preferred_element_type=jnp.float32
    ).reshape(tt, bb, 4 * hp)

    whh = whh_ref[...]               # (Hp, 4*Hp), resident across the grid

    def step(s, carry):
        h, c = carry                                        # (Bb, Hp) f32
        # gates: (Bb, 4*Hp) = preact[s] + h_prev @ Whh^T   (f32 accumulation)
        gates = pre_scr[s] + jnp.dot(h.astype(matmul_dtype), whh,
                                     preferred_element_type=jnp.float32)
        # Each gate slab starts at a multiple of Hp (>= 128): lane-aligned.
        i_g = _sigmoid_via_tanh(gates[:, 0 * hp:1 * hp])
        f_g = _sigmoid_via_tanh(gates[:, 1 * hp:2 * hp])
        g_g = jnp.tanh(gates[:, 2 * hp:3 * hp])
        o_g = _sigmoid_via_tanh(gates[:, 3 * hp:4 * hp])
        c_new = f_g * c + i_g * g_g
        h_new = o_g * jnp.tanh(c_new)
        o_ref[s] = h_new.astype(o_ref.dtype)
        return h_new, c_new

    h_fin, c_fin = lax.fori_loop(0, tt, step, (h_scr[...], c_scr[...]),
                                 unroll=unroll)
    h_scr[...] = h_fin
    c_scr[...] = c_fin
    # TODO(synk): for Hp <= 256, stage Whh^T once per block via
    # pltpu.matmul_push_rhs / matmul_acc_lhs / matmul_pop to avoid re-pushing
    # weights every step (verify staging capacity in a bundle dump first).


def lstm_with_one_output(x_btd, w_ih, w_hh, b_ih, b_hh, *,
                         time_block=32,
                         matmul_dtype=jnp.float32,
                         out_dtype=jnp.float32):
    """
    Equivalent of cLSTMWithOneOutput(nn.LSTM(I, H, batch_first=True))(X).

    x_btd : (B, T, I) float32
    w_ih  : (4H, I), w_hh : (4H, H), b_ih/b_hh : (4H,)   (PyTorch layout,
            gate order i, f, g, o)
    returns (B, T, H) in out_dtype
    """
    B, T, I = x_btd.shape
    H = w_ih.shape[0] // 4
    f32 = jnp.float32

    # ---- padded geometry ----------------------------------------------------
    Hp = _round_up(H, 128)            # lane-dense hidden dim, 128-aligned gates
    Ip = _round_up(I + 1, 8)          # +1 "ones" column carries the fused bias
    Bp = _round_up(B, 8)
    if Bp >= 16:                      # split batch so the "parallel" axis does
        Bp = _round_up(B, 16)         # real work on v7x megacore (2 TCs)
        Bb = Bp // 2
    else:
        Bb = Bp
    nb_b = Bp // Bb

    # ---- generation-aware VMEM budget + time blocking ------------------------
    try:
        vmem_cap = int(pltpu.get_tpu_info().vmem_capacity_bytes)
    except Exception:
        vmem_cap = 64 << 20           # v7x per-core capacity as safe fallback
    cap_limit = int(0.85 * vmem_cap)

    out_b = jnp.dtype(out_dtype).itemsize
    w_b = jnp.dtype(matmul_dtype).itemsize

    def budget(tt, weight_bufs):
        return int(2 * tt * Bb * Ip * 4              # x blocks (double-buffered)
                   + 2 * tt * Bb * Hp * out_b        # out blocks (double-buffered)
                   + weight_bufs * Ip * 4 * Hp * 4   # resident Wih^T (+bias row)
                   + weight_bufs * Hp * 4 * Hp * w_b # resident Whh^T
                   + tt * Bb * 4 * Hp * 4            # per-block preact scratch
                   + 2 * Bb * Hp * 4                 # h/c carry
                   + (2 << 20))                      # headroom

    Tt = max(1, min(time_block, T))
    while Tt > 8 and budget(Tt, 2) > cap_limit:      # conservative (2 buffers)
        Tt = max(8, Tt // 2)
    Tp = _round_up(T, Tt)
    nb_t = Tp // Tt
    # TODO(synk): if even budget(8, 1) > cap_limit (very large H), tile the
    # 4*Hp gate dimension instead of only shrinking Tt.

    # Guard vreg pressure: full unroll only for small blocks.
    unroll = True if (Tt <= 16 and Hp < 512) else min(Tt, 8)

    # ---- weight / bias prep (plain JAX glue) ---------------------------------
    # Gate-padded Wih^T with the fused bias appended as an extra input row:
    # (I, 4, H) -> pad hidden to Hp -> stack bias row -> (Ip, 4*Hp).
    wih_t = jnp.transpose(w_ih).astype(f32).reshape(I, 4, H)
    wih_t = jnp.pad(wih_t, ((0, 0), (0, 0), (0, Hp - H)))            # (I,4,Hp)
    bias = (b_ih + b_hh).astype(f32).reshape(1, 4, H)
    bias = jnp.pad(bias, ((0, 0), (0, 0), (0, Hp - H)))              # (1,4,Hp)
    wih_aug = jnp.concatenate([wih_t, bias], axis=0)                 # (I+1,4,Hp)
    wih_aug = jnp.pad(wih_aug, ((0, Ip - (I + 1)), (0, 0), (0, 0)))
    wih_aug = wih_aug.reshape(Ip, 4 * Hp)

    # Gate-padded Whh^T: (H, 4, H) -> (Hp, 4*Hp); padded rows/cols are zero so
    # padded h columns stay exactly 0 through the recurrence.
    whh_t = jnp.transpose(w_hh).astype(f32).reshape(H, 4, H)
    whh_t = jnp.pad(whh_t, ((0, Hp - H), (0, 0), (0, Hp - H))).reshape(Hp, 4 * Hp)
    whh_k = whh_t.astype(matmul_dtype)   # bf16 on v6e/v7x if requested

    # ---- raw X blocks (NO HBM preact materialization) ------------------------
    x_tbd = jnp.transpose(x_btd, (1, 0, 2)).astype(f32)              # (T, B, I)
    x_tbd = jnp.pad(x_tbd, ((0, Tp - T), (0, Bp - B), (0, Ip - I)))  # (Tp,Bp,Ip)
    x_aug = x_tbd.at[:, :, I].set(1.0)   # ones column -> fused bias in Wih row

    kernel = functools.partial(_lstm_block_kernel, tt=Tt, bb=Bb, hp=Hp,
                               matmul_dtype=matmul_dtype, unroll=unroll)

    def run(single_buffer_weights):
        if single_buffer_weights:
            # Constant index_map -> block never changes; one VMEM buffer is
            # enough.  Halves the dominant VMEM consumer (Whh^T) on v7x.
            w_kw = dict(pipeline_mode=pl.Buffered(1))
            weight_bufs = 1
        else:
            w_kw = {}
            weight_bufs = 2
        vmem_bytes = min(max(budget(Tt, weight_bufs), 8 << 20), cap_limit)
        return pl.pallas_call(
            kernel,
            out_shape=jax.ShapeDtypeStruct((Tp, Bp, Hp), out_dtype),
            grid_spec=pltpu.PrefetchScalarGridSpec(
                num_scalar_prefetch=0,
                grid=(nb_b, nb_t),
                in_specs=[
                    pl.BlockSpec((Tt, Bb, Ip), lambda b, t: (t, b, 0)),   # X
                    pl.BlockSpec((Ip, 4 * Hp), lambda b, t: (0, 0), **w_kw),  # Wih^T+bias
                    pl.BlockSpec((Hp, 4 * Hp), lambda b, t: (0, 0), **w_kw),  # Whh^T
                ],
                out_specs=pl.BlockSpec((Tt, Bb, Hp), lambda b, t: (t, b, 0)),
                scratch_shapes=[
                    pltpu.VMEM((Bb, Hp), f32),            # h carry
                    pltpu.VMEM((Bb, Hp), f32),            # c carry
                    pltpu.VMEM((Tt, Bb, 4 * Hp), f32),    # block preactivations
                ],
            ),
            compiler_params=pltpu.CompilerParams(
                # batch axis is parallel (v7x megacore); the time axis carries
                # the recurrence through scratch and MUST stay "arbitrary".
                dimension_semantics=("parallel", "arbitrary"),
                vmem_limit_bytes=int(vmem_bytes),
            ),
        )(x_aug, wih_aug, whh_k)

    try:
        out_tbh = run(True)
    except Exception:
        # pipeline_mode / pl.Buffered(1) unavailable or rejected on this jax
        # version: fall back to default (double-buffered) weight blocks.
        out_tbh = run(False)

    out = out_tbh[:T, :B, :H]                    # strip time/batch/hidden pad
    return jnp.transpose(out, (1, 0, 2))         # back to (B, T, H)


def _lstm_reference(x_btd, w_ih, w_hh, b_ih, b_hh):
    """Pure-JAX reference (lax.scan) matching torch.nn.LSTM semantics."""
    B, T, I = x_btd.shape
    H = w_hh.shape[1]
    wih_t = w_ih.T
    whh_t = w_hh.T
    bias = b_ih + b_hh

    def step(carry, x_t):
        h, c = carry
        gates = x_t @ wih_t + h @ whh_t + bias
        i_g = jax.nn.sigmoid(gates[:, 0 * H:1 * H])
        f_g = jax.nn.sigmoid(gates[:, 1 * H:2 * H])
        g_g = jnp.tanh(gates[:, 2 * H:3 * H])
        o_g = jax.nn.sigmoid(gates[:, 3 * H:4 * H])
        c_new = f_g * c + i_g * g_g
        h_new = o_g * jnp.tanh(c_new)
        return (h_new, c_new), h_new

    h0 = jnp.zeros((B, H), jnp.float32)
    c0 = jnp.zeros((B, H), jnp.float32)
    _, ys = lax.scan(step, (h0, c0), jnp.transpose(x_btd, (1, 0, 2)))
    return jnp.transpose(ys, (1, 0, 2))


if __name__ == "__main__":
    # Small shapes consistent with pyaf's usage: batch=2, seq=8, input=4, hidden=32.
    B, T, I, H = 2, 8, 4, 32

    key = jax.random.PRNGKey(0)
    kx, k1, k2, k3, k4 = jax.random.split(key, 5)

    x = jax.random.normal(kx, (B, T, I), dtype=jnp.float32)

    # Deterministic PyTorch-style init: U(-1/sqrt(H), 1/sqrt(H)).
    bound = 1.0 / float(jnp.sqrt(jnp.float32(H)))
    w_ih = jax.random.uniform(k1, (4 * H, I), jnp.float32, -bound, bound)
    w_hh = jax.random.uniform(k2, (4 * H, H), jnp.float32, -bound, bound)
    b_ih = jax.random.uniform(k3, (4 * H,), jnp.float32, -bound, bound)
    b_hh = jax.random.uniform(k4, (4 * H,), jnp.float32, -bound, bound)

    ref = _lstm_reference(x, w_ih, w_hh, b_ih, b_hh)

    # f32 recurrent matmul: tight check against the reference.
    out = lstm_with_one_output(x, w_ih, w_hh, b_ih, b_hh)
    out = jax.block_until_ready(out)
    assert out.shape == (B, T, H), out.shape
    assert jnp.allclose(out, ref, atol=1e-4, rtol=1e-4), "f32 mismatch vs reference"

    # bf16 recurrent matmul (v6e/v7x MXU-native path): loose check — the
    # h -> bf16 cast error compounds through the recurrence, by design.
    out_bf16 = lstm_with_one_output(x, w_ih, w_hh, b_ih, b_hh,
                                    matmul_dtype=jnp.bfloat16)
    out_bf16 = jax.block_until_ready(out_bf16)
    assert float(jnp.max(jnp.abs(out_bf16 - ref))) < 0.1, "bf16 path diverged"

    print("KERNEL_OK")
</pallas_src>

<mosaic_0001>
module attributes {stable_mosaic.version = 11 : i64} {
  func.func @_lstm_block_kernel(%arg0: i32, %arg1: i32, %arg2: memref<8x8x8xf32, #tpu.memory_space<vmem>>, %arg3: memref<8x512xf32, #tpu.memory_space<vmem>>, %arg4: memref<128x512xf32, #tpu.memory_space<vmem>>, %arg5: memref<8x8x128xf32, #tpu.memory_space<vmem>>, %arg6: memref<8x128xf32, #tpu.memory_space<vmem>>, %arg7: memref<8x128xf32, #tpu.memory_space<vmem>>, %arg8: memref<8x8x512xf32, #tpu.memory_space<vmem>>) attributes {dimension_semantics = [#tpu.dimension_semantics<parallel>, #tpu.dimension_semantics<arbitrary>], iteration_bounds = array<i64: 1, 1>, scalar_prefetch = 0 : i64, scratch_operands = 3 : i64, tpu.core_type = #tpu.core_type<tc>, window_params = [{transform_indices = @transform_0, window_bounds = array<i64: 8, 8, 8>}, {pipeline_mode = #tpu.pipeline_mode<synchronous>, transform_indices = @transform_1, window_bounds = array<i64: 8, 512>}, {pipeline_mode = #tpu.pipeline_mode<synchronous>, transform_indices = @transform_2, window_bounds = array<i64: 128, 512>}, {transform_indices = @transform_3, window_bounds = array<i64: 8, 8, 128>}]} {
    %c0_i32 = arith.constant 0 : i32
    %0 = arith.cmpi eq, %arg1, %c0_i32 : i32
    %1 = arith.extui %0 : i1 to i32
    %c0_i32_0 = arith.constant 0 : i32
    %2 = arith.cmpi ne, %1, %c0_i32_0 : i32
    scf.if %2 {
      %cst_131 = arith.constant 0.000000e+00 : f32
      %334 = vector.broadcast %cst_131 : f32 to vector<8x128xf32>
      %c0_132 = arith.constant 0 : index
      %c0_133 = arith.constant 0 : index
      %335 = vector.load %arg6[%c0_132, %c0_133] : memref<8x128xf32, #tpu.memory_space<vmem>>, vector<8x128xf32>
      tpu.vector_store %arg6[%c0_132, %c0_133], %334 {strides = array<i32>} : memref<8x128xf32, #tpu.memory_space<vmem>>, vector<8x128xf32>,
      %cst_134 = arith.constant 0.000000e+00 : f32
      %336 = vector.broadcast %cst_134 : f32 to vector<8x128xf32>
      %c0_135 = arith.constant 0 : index
      %c0_136 = arith.constant 0 : index
      %337 = vector.load %arg7[%c0_135, %c0_136] : memref<8x128xf32, #tpu.memory_space<vmem>>, vector<8x128xf32>
      tpu.vector_store %arg7[%c0_135, %c0_136], %336 {strides = array<i32>} : memref<8x128xf32, #tpu.memory_space<vmem>>, vector<8x128xf32>,
    } else {
    }
    %c0 = arith.constant 0 : index
    %c0_1 = arith.constant 0 : index
    %c0_2 = arith.constant 0 : index
    %3 = vector.load %arg2[%c0, %c0_1, %c0_2] : memref<8x8x8xf32, #tpu.memory_space<vmem>>, vector<8x8x8xf32>
    %4 = vector.shape_cast %3 : vector<8x8x8xf32> to vector<64x8xf32>
    %c0_3 = arith.constant 0 : index
    %c0_4 = arith.constant 0 : index
    %5 = vector.load %arg3[%c0_3, %c0_4] : memref<8x512xf32, #tpu.memory_space<vmem>>, vector<8x512xf32>
    %cst = arith.constant dense<0.000000e+00> : vector<64x512xf32>
    %6 = tpu.matmul %4, %5, %cst {dimension_numbers = #tpu.dot_dimension_numbers<[1], [0], [0], [1], [0, 0, 1, 1], [], []>} : vector<64x8xf32>, vector<8x512xf32>, vector<64x512xf32> -> vector<64x512xf32>
    %7 = vector.shape_cast %6 : vector<64x512xf32> to vector<8x8x512xf32>
    %c0_5 = arith.constant 0 : index
    %c0_6 = arith.constant 0 : index
    %c0_7 = arith.constant 0 : index
    %8 = vector.load %arg8[%c0_5, %c0_6, %c0_7] : memref<8x8x512xf32, #tpu.memory_space<vmem>>, vector<8x8x512xf32>
    tpu.vector_store %arg8[%c0_5, %c0_6, %c0_7], %7 {strides = array<i32>} : memref<8x8x512xf32, #tpu.memory_space<vmem>>, vector<8x8x512xf32>,
    %c0_8 = arith.constant 0 : index
    %c0_9 = arith.constant 0 : index
    %9 = vector.load %arg4[%c0_8, %c0_9] : memref<128x512xf32, #tpu.memory_space<vmem>>, vector<128x512xf32>
    %c0_10 = arith.constant 0 : index
    %c0_11 = arith.constant 0 : index
    %10 = vector.load %arg6[%c0_10, %c0_11] : memref<8x128xf32, #tpu.memory_space<vmem>>, vector<8x128xf32>
    %c0_12 = arith.constant 0 : index
    %c0_13 = arith.constant 0 : index
    %11 = vector.load %arg7[%c0_12, %c0_13] : memref<8x128xf32, #tpu.memory_space<vmem>>, vector<8x128xf32>
    %c0_i32_14 = arith.constant 0 : i32
    %12 = arith.index_cast %c0_i32_14 : i32 to index
    %c0_15 = arith.constant 0 : index
    %c0_16 = arith.constant 0 : index
    %13 = vector.load %arg8[%12, %c0_15, %c0_16] : memref<8x8x512xf32, #tpu.memory_space<vmem>>, vector<1x8x512xf32>
    %14 = vector.shape_cast %13 : vector<1x8x512xf32> to vector<8x512xf32>
    %cst_17 = arith.constant dense<0.000000e+00> : vector<8x512xf32>
    %15 = tpu.matmul %10, %9, %cst_17 {dimension_numbers = #tpu.dot_dimension_numbers<[1], [0], [0], [1], [0, 0, 1, 1], [], []>} : vector<8x128xf32>, vector<128x512xf32>, vector<8x512xf32> -> vector<8x512xf32>
    %16 = arith.addf %14, %15 : vector<8x512xf32>
    %17 = vector.extract_strided_slice %16 {offsets = [0, 0], sizes = [8, 128], strides = [1, 1]} : vector<8x512xf32> to vector<8x128xf32>
    %cst_18 = arith.constant 5.000000e-01 : f32
    %18 = vector.broadcast %cst_18 : f32 to vector<8x128xf32>
    %19 = arith.mulf %18, %17 : vector<8x128xf32>
    %20 = math.tanh %19 : vector<8x128xf32>
    %cst_19 = arith.constant 5.000000e-01 : f32
    %21 = vector.broadcast %cst_19 : f32 to vector<8x128xf32>
    %22 = arith.mulf %21, %20 : vector<8x128xf32>
    %cst_20 = arith.constant 5.000000e-01 : f32
    %23 = vector.broadcast %cst_20 : f32 to vector<8x128xf32>
    %24 = arith.addf %22, %23 : vector<8x128xf32>
    %25 = vector.extract_strided_slice %16 {offsets = [0, 128], sizes = [8, 128], strides = [1, 1]} : vector<8x512xf32> to vector<8x128xf32>
    %cst_21 = arith.constant 5.000000e-01 : f32
    %26 = vector.broadcast %cst_21 : f32 to vector<8x128xf32>
    %27 = arith.mulf %26, %25 : vector<8x128xf32>
    %28 = math.tanh %27 : vector<8x128xf32>
    %cst_22 = arith.constant 5.000000e-01 : f32
    %29 = vector.broadcast %cst_22 : f32 to vector<8x128xf32>
    %30 = arith.mulf %29, %28 : vector<8x128xf32>
    %cst_23 = arith.constant 5.000000e-01 : f32
    %31 = vector.broadcast %cst_23 : f32 to vector<8x128xf32>
    %32 = arith.addf %30, %31 : vector<8x128xf32>
    %33 = vector.extract_strided_slice %16 {offsets = [0, 256], sizes = [8, 128], strides = [1, 1]} : vector<8x512xf32> to vector<8x128xf32>
    %34 = math.tanh %33 : vector<8x128xf32>
    %35 = vector.extract_strided_slice %16 {offsets = [0, 384], sizes = [8, 128], strides = [1, 1]} : vector<8x512xf32> to vector<8x128xf32>
    %cst_24 = arith.constant 5.000000e-01 : f32
    %36 = vector.broadcast %cst_24 : f32 to vector<8x128xf32>
    %37 = arith.mulf %36, %35 : vector<8x128xf32>
    %38 = math.tanh %37 : vector<8x128xf32>
    %cst_25 = arith.constant 5.000000e-01 : f32
    %39 = vector.broadcast %cst_25 : f32 to vector<8x128xf32>
    %40 = arith.mulf %39, %38 : vector<8x128xf32>
    %cst_26 = arith.constant 5.000000e-01 : f32
    %41 = vector.broadcast %cst_26 : f32 to vector<8x128xf32>
    %42 = arith.addf %40, %41 : vector<8x128xf32>
    %43 = arith.mulf %32, %11 : vector<8x128xf32>
    %44 = arith.mulf %24, %34 : vector<8x128xf32>
    %45 = arith.addf %43, %44 : vector<8x128xf32>
    %46 = math.tanh %45 : vector<8x128xf32>
    %47 = arith.mulf %42, %46 : vector<8x128xf32>
    %48 = arith.index_cast %c0_i32_14 : i32 to index
    %c0_27 = arith.constant 0 : index
    %c0_28 = arith.constant 0 : index
    %49 = vector.load %arg5[%48, %c0_27, %c0_28] : memref<8x8x128xf32, #tpu.memory_space<vmem>>, vector<1x8x128xf32>
    %50 = vector.shape_cast %49 : vector<1x8x128xf32> to vector<8x128xf32>
    %51 = vector.shape_cast %47 : vector<8x128xf32> to vector<1x8x128xf32>
    tpu.vector_store %arg5[%48, %c0_27, %c0_28], %51 {strides = array<i32>} : memref<8x8x128xf32, #tpu.memory_space<vmem>>, vector<1x8x128xf32>,
    %c1_i32 = arith.constant 1 : i32
    %52 = arith.index_cast %c1_i32 : i32 to index
    %c0_29 = arith.constant 0 : index
    %c0_30 = arith.constant 0 : index
    %53 = vector.load %arg8[%52, %c0_29, %c0_30] : memref<8x8x512xf32, #tpu.memory_space<vmem>>, vector<1x8x512xf32>
    %54 = vector.shape_cast %53 : vector<1x8x512xf32> to vector<8x512xf32>
    %cst_31 = arith.constant dense<0.000000e+00> : vector<8x512xf32>
    %55 = tpu.matmul %47, %9, %cst_31 {dimension_numbers = #tpu.dot_dimension_numbers<[1], [0], [0], [1], [0, 0, 1, 1], [], []>} : vector<8x128xf32>, vector<128x512xf32>, vector<8x512xf32> -> vector<8x512xf32>
    %56 = arith.addf %54, %55 : vector<8x512xf32>
    %57 = vector.extract_strided_slice %56 {offsets = [0, 0], sizes = [8, 128], strides = [1, 1]} : vector<8x512xf32> to vector<8x128xf32>
    %cst_32 = arith.constant 5.000000e-01 : f32
    %58 = vector.broadcast %cst_32 : f32 to vector<8x128xf32>
    %59 = arith.mulf %58, %57 : vector<8x128xf32>
    %60 = math.tanh %59 : vector<8x128xf32>
    %cst_33 = arith.constant 5.000000e-01 : f32
    %61 = vector.broadcast %cst_33 : f32 to vector<8x128xf32>
    %62 = arith.mulf %61, %60 : vector<8x128xf32>
    %cst_34 = arith.constant 5.000000e-01 : f32
    %63 = vector.broadcast %cst_34 : f32 to vector<8x128xf32>
    %64 = arith.addf %62, %63 : vector<8x128xf32>
    %65 = vector.extract_strided_slice %56 {offsets = [0, 128], sizes = [8, 128], strides = [1, 1]} : vector<8x512xf32> to vector<8x128xf32>
    %cst_35 = arith.constant 5.000000e-01 : f32
    %66 = vector.broadcast %cst_35 : f32 to vector<8x128xf32>
    %67 = arith.mulf %66, %65 : vector<8x128xf32>
    %68 = math.tanh %67 : vector<8x128xf32>
    %cst_36 = arith.constant 5.000000e-01 : f32
    %69 = vector.broadcast %cst_36 : f32 to vector<8x128xf32>
    %70 = arith.mulf %69, %68 : vector<8x128xf32>
    %cst_37 = arith.constant 5.000000e-01 : f32
    %71 = vector.broadcast %cst_37 : f32 to vector<8x128xf32>
    %72 = arith.addf %70, %71 : vector<8x128xf32>
    %73 = vector.extract_strided_slice %56 {offsets = [0, 256], sizes = [8, 128], strides = [1, 1]} : vector<8x512xf32> to vector<8x128xf32>
    %74 = math.tanh %73 : vector<8x128xf32>
    %75 = vector.extract_strided_slice %56 {offsets = [0, 384], sizes = [8, 128], strides = [1, 1]} : vector<8x512xf32> to vector<8x128xf32>
    %cst_38 = arith.constant 5.000000e-01 : f32
    %76 = vector.broadcast %cst_38 : f32 to vector<8x128xf32>
    %77 = arith.mulf %76, %75 : vector<8x128xf32>
    %78 = math.tanh %77 : vector<8x128xf32>
    %cst_39 = arith.constant 5.000000e-01 : f32
    %79 = vector.broadcast %cst_39 : f32 to vector<8x128xf32>
    %80 = arith.mulf %79, %78 : vector<8x128xf32>
    %cst_40 = arith.constant 5.000000e-01 : f32
    %81 = vector.broadcast %cst_40 : f32 to vector<8x128xf32>
    %82 = arith.addf %80, %81 : vector<8x128xf32>
    %83 = arith.mulf %72, %45 : vector<8x128xf32>
    %84 = arith.mulf %64, %74 : vector<8x128xf32>
    %85 = arith.addf %83, %84 : vector<8x128xf32>
    %86 = math.tanh %85 : vector<8x128xf32>
    %87 = arith.mulf %82, %86 : vector<8x128xf32>
    %88 = arith.index_cast %c1_i32 : i32 to index
    %c0_41 = arith.constant 0 : index
    %c0_42 = arith.constant 0 : index
    %89 = vector.load %arg5[%88, %c0_41, %c0_42] : memref<8x8x128xf32, #tpu.memory_space<vmem>>, vector<1x8x128xf32>
    %90 = vector.shape_cast %89 : vector<1x8x128xf32> to vector<8x128xf32>
    %91 = vector.shape_cast %87 : vector<8x128xf32> to vector<1x8x128xf32>
    tpu.vector_store %arg5[%88, %c0_41, %c0_42], %91 {strides = array<i32>} : memref<8x8x128xf32, #tpu.memory_space<vmem>>, vector<1x8x128xf32>,
    %c2_i32 = arith.constant 2 : i32
    %92 = arith.index_cast %c2_i32 : i32 to index
    %c0_43 = arith.constant 0 : index
    %c0_44 = arith.constant 0 : index
    %93 = vector.load %arg8[%92, %c0_43, %c0_44] : memref<8x8x512xf32, #tpu.memory_space<vmem>>, vector<1x8x512xf32>
    %94 = vector.shape_cast %93 : vector<1x8x512xf32> to vector<8x512xf32>
    %cst_45 = arith.constant dense<0.000000e+00> : vector<8x512xf32>
    %95 = tpu.matmul %87, %9, %cst_45 {dimension_numbers = #tpu.dot_dimension_numbers<[1], [0], [0], [1], [0, 0, 1, 1], [], []>} : vector<8x128xf32>, vector<128x512xf32>, vector<8x512xf32> -> vector<8x512xf32>
    %96 = arith.addf %94, %95 : vector<8x512xf32>
    %97 = vector.extract_strided_slice %96 {offsets = [0, 0], sizes = [8, 128], strides = [1, 1]} : vector<8x512xf32> to vector<8x128xf32>
    %cst_46 = arith.constant 5.000000e-01 : f32
    %98 = vector.broadcast %cst_46 : f32 to vector<8x128xf32>
    %99 = arith.mulf %98, %97 : vector<8x128xf32>
    %100 = math.tanh %99 : vector<8x128xf32>
    %cst_47 = arith.constant 5.000000e-01 : f32
    %101 = vector.broadcast %cst_47 : f32 to vector<8x128xf32>
    %102 = arith.mulf %101, %100 : vector<8x128xf32>
    %cst_48 = arith.constant 5.000000e-01 : f32
    %103 = vector.broadcast %cst_48 : f32 to vector<8x128xf32>
    %104 = arith.addf %102, %103 : vector<8x128xf32>
    %105 = vector.extract_strided_slice %96 {offsets = [0, 128], sizes = [8, 128], strides = [1, 1]} : vector<8x512xf32> to vector<8x128xf32>
    %cst_49 = arith.constant 5.000000e-01 : f32
    %106 = vector.broadcast %cst_49 : f32 to vector<8x128xf32>
    %107 = arith.mulf %106, %105 : vector<8x128xf32>
    %108 = math.tanh %107 : vector<8x128xf32>
    %cst_50 = arith.constant 5.000000e-01 : f32
    %109 = vector.broadcast %cst_50 : f32 to vector<8x128xf32>
    %110 = arith.mulf %109, %108 : vector<8x128xf32>
    %cst_51 = arith.constant 5.000000e-01 : f32
    %111 = vector.broadcast %cst_51 : f32 to vector<8x128xf32>
    %112 = arith.addf %110, %111 : vector<8x128xf32>
    %113 = vector.extract_strided_slice %96 {offsets = [0, 256], sizes = [8, 128], strides = [1, 1]} : vector<8x512xf32> to vector<8x128xf32>
    %114 = math.tanh %113 : vector<8x128xf32>
    %115 = vector.extract_strided_slice %96 {offsets = [0, 384], sizes = [8, 128], strides = [1, 1]} : vector<8x512xf32> to vector<8x128xf32>
    %cst_52 = arith.constant 5.000000e-01 : f32
    %116 = vector.broadcast %cst_52 : f32 to vector<8x128xf32>
    %117 = arith.mulf %116, %115 : vector<8x128xf32>
    %118 = math.tanh %117 : vector<8x128xf32>
    %cst_53 = arith.constant 5.000000e-01 : f32
    %119 = vector.broadcast %cst_53 : f32 to vector<8x128xf32>
    %120 = arith.mulf %119, %118 : vector<8x128xf32>
    %cst_54 = arith.constant 5.000000e-01 : f32
    %121 = vector.broadcast %cst_54 : f32 to vector<8x128xf32>
    %122 = arith.addf %120, %121 : vector<8x128xf32>
    %123 = arith.mulf %112, %85 : vector<8x128xf32>
    %124 = arith.mulf %104, %114 : vector<8x128xf32>
    %125 = arith.addf %123, %124 : vector<8x128xf32>
    %126 = math.tanh %125 : vector<8x128xf32>
    %127 = arith.mulf %122, %126 : vector<8x128xf32>
    %128 = arith.index_cast %c2_i32 : i32 to index
    %c0_55 = arith.constant 0 : index
    %c0_56 = arith.constant 0 : index
    %129 = vector.load %arg5[%128, %c0_55, %c0_56] : memref<8x8x128xf32, #tpu.memory_space<vmem>>, vector<1x8x128xf32>
    %130 = vector.shape_cast %129 : vector<1x8x128xf32> to vector<8x128xf32>
    %131 = vector.shape_cast %127 : vector<8x128xf32> to vector<1x8x128xf32>
    tpu.vector_store %arg5[%128, %c0_55, %c0_56], %131 {strides = array<i32>} : memref<8x8x128xf32, #tpu.memory_space<vmem>>, vector<1x8x128xf32>,
    %c3_i32 = arith.constant 3 : i32
    %132 = arith.index_cast %c3_i32 : i32 to index
    %c0_57 = arith.constant 0 : index
    %c0_58 = arith.constant 0 : index
    %133 = vector.load %arg8[%132, %c0_57, %c0_58] : memref<8x8x512xf32, #tpu.memory_space<vmem>>, vector<1x8x512xf32>
    %134 = vector.shape_cast %133 : vector<1x8x512xf32> to vector<8x512xf32>
    %cst_59 = arith.constant dense<0.000000e+00> : vector<8x512xf32>
    %135 = tpu.matmul %127, %9, %cst_59 {dimension_numbers = #tpu.dot_dimension_numbers<[1], [0], [0], [1], [0, 0, 1, 1], [], []>} : vector<8x128xf32>, vector<128x512xf32>, vector<8x512xf32> -> vector<8x512xf32>
    %136 = arith.addf %134, %135 : vector<8x512xf32>
    %137 = vector.extract_strided_slice %136 {offsets = [0, 0], sizes = [8, 128], strides = [1, 1]} : vector<8x512xf32> to vector<8x128xf32>
    %cst_60 = arith.constant 5.000000e-01 : f32
    %138 = vector.broadcast %cst_60 : f32 to vector<8x128xf32>
    %139 = arith.mulf %138, %137 : vector<8x128xf32>
    %140 = math.tanh %139 : vector<8x128xf32>
    %cst_61 = arith.constant 5.000000e-01 : f32
    %141 = vector.broadcast %cst_61 : f32 to vector<8x128xf32>
    %142 = arith.mulf %141, %140 : vector<8x128xf32>
    %cst_62 = arith.constant 5.000000e-01 : f32
    %143 = vector.broadcast %cst_62 : f32 to vector<8x128xf32>
    %144 = arith.addf %142, %143 : vector<8x128xf32>
    %145 = vector.extract_strided_slice %136 {offsets = [0, 128], sizes = [8, 128], strides = [1, 1]} : vector<8x512xf32> to vector<8x128xf32>
    %cst_63 = arith.constant 5.000000e-01 : f32
    %146 = vector.broadcast %cst_63 : f32 to vector<8x128xf32>
    %147 = arith.mulf %146, %145 : vector<8x128xf32>
    %148 = math.tanh %147 : vector<8x128xf32>
    %cst_64 = arith.constant 5.000000e-01 : f32
    %149 = vector.broadcast %cst_64 : f32 to vector<8x128xf32>
    %150 = arith.mulf %149, %148 : vector<8x128xf32>
    %cst_65 = arith.constant 5.000000e-01 : f32
    %151 = vector.broadcast %cst_65 : f32 to vector<8x128xf32>
    %152 = arith.addf %150, %151 : vector<8x128xf32>
    %153 = vector.extract_strided_slice %136 {offsets = [0, 256], sizes = [8, 128], strides = [1, 1]} : vector<8x512xf32> to vector<8x128xf32>
    %154 = math.tanh %153 : vector<8x128xf32>
    %155 = vector.extract_strided_slice %136 {offsets = [0, 384], sizes = [8, 128], strides = [1, 1]} : vector<8x512xf32> to vector<8x128xf32>
    %cst_66 = arith.constant 5.000000e-01 : f32
    %156 = vector.broadcast %cst_66 : f32 to vector<8x128xf32>
    %157 = arith.mulf %156, %155 : vector<8x128xf32>
    %158 = math.tanh %157 : vector<8x128xf32>
    %cst_67 = arith.constant 5.000000e-01 : f32
    %159 = vector.broadcast %cst_67 : f32 to vector<8x128xf32>
    %160 = arith.mulf %159, %158 : vector<8x128xf32>
    %cst_68 = arith.constant 5.000000e-01 : f32
    %161 = vector.broadcast %cst_68 : f32 to vector<8x128xf32>
    %162 = arith.addf %160, %161 : vector<8x128xf32>
    %163 = arith.mulf %152, %125 : vector<8x128xf32>
    %164 = arith.mulf %144, %154 : vector<8x128xf32>
    %165 = arith.addf %163, %164 : vector<8x128xf32>
    %166 = math.tanh %165 : vector<8x128xf32>
    %167 = arith.mulf %162, %166 : vector<8x128xf32>
    %168 = arith.index_cast %c3_i32 : i32 to index
    %c0_69 = arith.constant 0 : index
    %c0_70 = arith.constant 0 : index
    %169 = vector.load %arg5[%168, %c0_69, %c0_70] : memref<8x8x128xf32, #tpu.memory_space<vmem>>, vector<1x8x128xf32>
    %170 = vector.shape_cast %169 : vector<1x8x128xf32> to vector<8x128xf32>
    %171 = vector.shape_cast %167 : vector<8x128xf32> to vector<1x8x128xf32>
    tpu.vector_store %arg5[%168, %c0_69, %c0_70], %171 {strides = array<i32>} : memref<8x8x128xf32, #tpu.memory_space<vmem>>, vector<1x8x128xf32>,
    %c4_i32 = arith.constant 4 : i32
    %172 = arith.index_cast %c4_i32 : i32 to index
    %c0_71 = arith.constant 0 : index
    %c0_72 = arith.constant 0 : index
    %173 = vector.load %arg8[%172, %c0_71, %c0_72] : memref<8x8x512xf32, #tpu.memory_space<vmem>>, vector<1x8x512xf32>
    %174 = vector.shape_cast %173 : vector<1x8x512xf32> to vector<8x512xf32>
    %cst_73 = arith.constant dense<0.000000e+00> : vector<8x512xf32>
    %175 = tpu.matmul %167, %9, %cst_73 {dimension_numbers = #tpu.dot_dimension_numbers<[1], [0], [0], [1], [0, 0, 1, 1], [], []>} : vector<8x128xf32>, vector<128x512xf32>, vector<8x512xf32> -> vector<8x512xf32>
    %176 = arith.addf %174, %175 : vector<8x512xf32>
    %177 = vector.extract_strided_slice %176 {offsets = [0, 0], sizes = [8, 128], strides = [1, 1]} : vector<8x512xf32> to vector<8x128xf32>
    %cst_74 = arith.constant 5.000000e-01 : f32
    %178 = vector.broadcast %cst_74 : f32 to vector<8x128xf32>
    %179 = arith.mulf %178, %177 : vector<8x128xf32>
    %180 = math.tanh %179 : vector<8x128xf32>
    %cst_75 = arith.constant 5.000000e-01 : f32
    %181 = vector.broadcast %cst_75 : f32 to vector<8x128xf32>
    %182 = arith.mulf %181, %180 : vector<8x128xf32>
    %cst_76 = arith.constant 5.000000e-01 : f32
    %183 = vector.broadcast %cst_76 : f32 to vector<8x128xf32>
    %184 = arith.addf %182, %183 : vector<8x128xf32>
    %185 = vector.extract_strided_slice %176 {offsets = [0, 128], sizes = [8, 128], strides = [1, 1]} : vector<8x512xf32> to vector<8x128xf32>
    %cst_77 = arith.constant 5.000000e-01 : f32
    %186 = vector.broadcast %cst_77 : f32 to vector<8x128xf32>
    %187 = arith.mulf %186, %185 : vector<8x128xf32>
    %188 = math.tanh %187 : vector<8x128xf32>
    %cst_78 = arith.constant 5.000000e-01 : f32
    %189 = vector.broadcast %cst_78 : f32 to vector<8x128xf32>
    %190 = arith.mulf %189, %188 : vector<8x128xf32>
    %cst_79 = arith.constant 5.000000e-01 : f32
    %191 = vector.broadcast %cst_79 : f32 to vector<8x128xf32>
    %192 = arith.addf %190, %191 : vector<8x128xf32>
    %193 = vector.extract_strided_slice %176 {offsets = [0, 256], sizes = [8, 128], strides = [1, 1]} : vector<8x512xf32> to vector<8x128xf32>
    %194 = math.tanh %193 : vector<8x128xf32>
    %195 = vector.extract_strided_slice %176 {offsets = [0, 384], sizes = [8, 128], strides = [1, 1]} : vector<8x512xf32> to vector<8x128xf32>
    %cst_80 = arith.constant 5.000000e-01 : f32
    %196 = vector.broadcast %cst_80 : f32 to vector<8x128xf32>
    %197 = arith.mulf %196, %195 : vector<8x128xf32>
    %198 = math.tanh %197 : vector<8x128xf32>
    %cst_81 = arith.constant 5.000000e-01 : f32
    %199 = vector.broadcast %cst_81 : f32 to vector<8x128xf32>
    %200 = arith.mulf %199, %198 : vector<8x128xf32>
    %cst_82 = arith.constant 5.000000e-01 : f32
    %201 = vector.broadcast %cst_82 : f32 to vector<8x128xf32>
    %202 = arith.addf %200, %201 : vector<8x128xf32>
    %203 = arith.mulf %192, %165 : vector<8x128xf32>
    %204 = arith.mulf %184, %194 : vector<8x128xf32>
    %205 = arith.addf %203, %204 : vector<8x128xf32>
    %206 = math.tanh %205 : vector<8x128xf32>
    %207 = arith.mulf %202, %206 : vector<8x128xf32>
    %208 = arith.index_cast %c4_i32 : i32 to index
    %c0_83 = arith.constant 0 : index
    %c0_84 = arith.constant 0 : index
    %209 = vector.load %arg5[%208, %c0_83, %c0_84] : memref<8x8x128xf32, #tpu.memory_space<vmem>>, vector<1x8x128xf32>
    %210 = vector.shape_cast %209 : vector<1x8x128xf32> to vector<8x128xf32>
    %211 = vector.shape_cast %207 : vector<8x128xf32> to vector<1x8x128xf32>
    tpu.vector_store %arg5[%208, %c0_83, %c0_84], %211 {strides = array<i32>} : memref<8x8x128xf32, #tpu.memory_space<vmem>>, vector<1x8x128xf32>,
    %c5_i32 = arith.constant 5 : i32
    %212 = arith.index_cast %c5_i32 : i32 to index
    %c0_85 = arith.constant 0 : index
    %c0_86 = arith.constant 0 : index
    %213 = vector.load %arg8[%212, %c0_85, %c0_86] : memref<8x8x512xf32, #tpu.memory_space<vmem>>, vector<1x8x512xf32>
    %214 = vector.shape_cast %213 : vector<1x8x512xf32> to vector<8x512xf32>
    %cst_87 = arith.constant dense<0.000000e+00> : vector<8x512xf32>
    %215 = tpu.matmul %207, %9, %cst_87 {dimension_numbers = #tpu.dot_dimension_numbers<[1], [0], [0], [1], [0, 0, 1, 1], [], []>} : vector<8x128xf32>, vector<128x512xf32>, vector<8x512xf32> -> vector<8x512xf32>
    %216 = arith.addf %214, %215 : vector<8x512xf32>
    %217 = vector.extract_strided_slice %216 {offsets = [0, 0], sizes = [8, 128], strides = [1, 1]} : vector<8x512xf32> to vector<8x128xf32>
    %cst_88 = arith.constant 5.000000e-01 : f32
    %218 = vector.broadcast %cst_88 : f32 to vector<8x128xf32>
    %219 = arith.mulf %218, %217 : vector<8x128xf32>
    %220 = math.tanh %219 : vector<8x128xf32>
    %cst_89 = arith.constant 5.000000e-01 : f32
    %221 = vector.broadcast %cst_89 : f32 to vector<8x128xf32>
    %222 = arith.mulf %221, %220 : vector<8x128xf32>
    %cst_90 = arith.constant 5.000000e-01 : f32
    %223 = vector.broadcast %cst_90 : f32 to vector<8x128xf32>
    %224 = arith.addf %222, %223 : vector<8x128xf32>
    %225 = vector.extract_strided_slice %216 {offsets = [0, 128], sizes = [8, 128], strides = [1, 1]} : vector<8x512xf32> to vector<8x128xf32>
    %cst_91 = arith.constant 5.000000e-01 : f32
    %226 = vector.broadcast %cst_91 : f32 to vector<8x128xf32>
    %227 = arith.mulf %226, %225 : vector<8x128xf32>
    %228 = math.tanh %227 : vector<8x128xf32>
    %cst_92 = arith.constant 5.000000e-01 : f32
    %229 = vector.broadcast %cst_92 : f32 to vector<8x128xf32>
    %230 = arith.mulf %229, %228 : vector<8x128xf32>
    %cst_93 = arith.constant 5.000000e-01 : f32
    %231 = vector.broadcast %cst_93 : f32 to vector<8x128xf32>
    %232 = arith.addf %230, %231 : vector<8x128xf32>
    %233 = vector.extract_strided_slice %216 {offsets = [0, 256], sizes = [8, 128], strides = [1, 1]} : vector<8x512xf32> to vector<8x128xf32>
    %234 = math.tanh %233 : vector<8x128xf32>
    %235 = vector.extract_strided_slice %216 {offsets = [0, 384], sizes = [8, 128], strides = [1, 1]} : vector<8x512xf32> to vector<8x128xf32>
    %cst_94 = arith.constant 5.000000e-01 : f32
    %236 = vector.broadcast %cst_94 : f32 to vector<8x128xf32>
    %237 = arith.mulf %236, %235 : vector<8x128xf32>
    %238 = math.tanh %237 : vector<8x128xf32>
    %cst_95 = arith.constant 5.000000e-01 : f32
    %239 = vector.broadcast %cst_95 : f32 to vector<8x128xf32>
    %240 = arith.mulf %239, %238 : vector<8x128xf32>
    %cst_96 = arith.constant 5.000000e-01 : f32
    %241 = vector.broadcast %cst_96 : f32 to vector<8x128xf32>
    %242 = arith.addf %240, %241 : vector<8x128xf32>
    %243 = arith.mulf %232, %205 : vector<8x128xf32>
    %244 = arith.mulf %224, %234 : vector<8x128xf32>
    %245 = arith.addf %243, %244 : vector<8x128xf32>
    %246 = math.tanh %245 : vector<8x128xf32>
    %247 = arith.mulf %242, %246 : vector<8x128xf32>
    %248 = arith.index_cast %c5_i32 : i32 to index
    %c0_97 = arith.constant 0 : index
    %c0_98 = arith.constant 0 : index
    %249 = vector.load %arg5[%248, %c0_97, %c0_98] : memref<8x8x128xf32, #tpu.memory_space<vmem>>, vector<1x8x128xf32>
    %250 = vector.shape_cast %249 : vector<1x8x128xf32> to vector<8x128xf32>
    %251 = vector.shape_cast %247 : vector<8x128xf32> to vector<1x8x128xf32>
    tpu.vector_store %arg5[%248, %c0_97, %c0_98], %251 {strides = array<i32>} : memref<8x8x128xf32, #tpu.memory_space<vmem>>, vector<1x8x128xf32>,
    %c6_i32 = arith.constant 6 : i32
    %252 = arith.index_cast %c6_i32 : i32 to index
    %c0_99 = arith.constant 0 : index
    %c0_100 = arith.constant 0 : index
    %253 = vector.load %arg8[%252, %c0_99, %c0_100] : memref<8x8x512xf32, #tpu.memory_space<vmem>>, vector<1x8x512xf32>
    %254 = vector.shape_cast %253 : vector<1x8x512xf32> to vector<8x512xf32>
    %cst_101 = arith.constant dense<0.000000e+00> : vector<8x512xf32>
    %255 = tpu.matmul %247, %9, %cst_101 {dimension_numbers = #tpu.dot_dimension_numbers<[1], [0], [0], [1], [0, 0, 1, 1], [], []>} : vector<8x128xf32>, vector<128x512xf32>, vector<8x512xf32> -> vector<8x512xf32>
    %256 = arith.addf %254, %255 : vector<8x512xf32>
    %257 = vector.extract_strided_slice %256 {offsets = [0, 0], sizes = [8, 128], strides = [1, 1]} : vector<8x512xf32> to vector<8x128xf32>
    %cst_102 = arith.constant 5.000000e-01 : f32
    %258 = vector.broadcast %cst_102 : f32 to vector<8x128xf32>
    %259 = arith.mulf %258, %257 : vector<8x128xf32>
    %260 = math.tanh %259 : vector<8x128xf32>
    %cst_103 = arith.constant 5.000000e-01 : f32
    %261 = vector.broadcast %cst_103 : f32 to vector<8x128xf32>
    %262 = arith.mulf %261, %260 : vector<8x128xf32>
    %cst_104 = arith.constant 5.000000e-01 : f32
    %263 = vector.broadcast %cst_104 : f32 to vector<8x128xf32>
    %264 = arith.addf %262, %263 : vector<8x128xf32>
    %265 = vector.extract_strided_slice %256 {offsets = [0, 128], sizes = [8, 128], strides = [1, 1]} : vector<8x512xf32> to vector<8x128xf32>
    %cst_105 = arith.constant 5.000000e-01 : f32
    %266 = vector.broadcast %cst_105 : f32 to vector<8x128xf32>
    %267 = arith.mulf %266, %265 : vector<8x128xf32>
    %268 = math.tanh %267 : vector<8x128xf32>
    %cst_106 = arith.constant 5.000000e-01 : f32
    %269 = vector.broadcast %cst_106 : f32 to vector<8x128xf32>
    %270 = arith.mulf %269, %268 : vector<8x128xf32>
    %cst_107 = arith.constant 5.000000e-01 : f32
    %271 = vector.broadcast %cst_107 : f32 to vector<8x128xf32>
    %272 = arith.addf %270, %271 : vector<8x128xf32>
    %273 = vector.extract_strided_slice %256 {offsets = [0, 256], sizes = [8, 128], strides = [1, 1]} : vector<8x512xf32> to vector<8x128xf32>
    %274 = math.tanh %273 : vector<8x128xf32>
    %275 = vector.extract_strided_slice %256 {offsets = [0, 384], sizes = [8, 128], strides = [1, 1]} : vector<8x512xf32> to vector<8x128xf32>
    %cst_108 = arith.constant 5.000000e-01 : f32
    %276 = vector.broadcast %cst_108 : f32 to vector<8x128xf32>
    %277 = arith.mulf %276, %275 : vector<8x128xf32>
    %278 = math.tanh %277 : vector<8x128xf32>
    %cst_109 = arith.constant 5.000000e-01 : f32
    %279 = vector.broadcast %cst_109 : f32 to vector<8x128xf32>
    %280 = arith.mulf %279, %278 : vector<8x128xf32>
    %cst_110 = arith.constant 5.000000e-01 : f32
    %281 = vector.broadcast %cst_110 : f32 to vector<8x128xf32>
    %282 = arith.addf %280, %281 : vector<8x128xf32>
    %283 = arith.mulf %272, %245 : vector<8x128xf32>
    %284 = arith.mulf %264, %274 : vector<8x128xf32>
    %285 = arith.addf %283, %284 : vector<8x128xf32>
    %286 = math.tanh %285 : vector<8x128xf32>
    %287 = arith.mulf %282, %286 : vector<8x128xf32>
    %288 = arith.index_cast %c6_i32 : i32 to index
    %c0_111 = arith.constant 0 : index
    %c0_112 = arith.constant 0 : index
    %289 = vector.load %arg5[%288, %c0_111, %c0_112] : memref<8x8x128xf32, #tpu.memory_space<vmem>>, vector<1x8x128xf32>
    %290 = vector.shape_cast %289 : vector<1x8x128xf32> to vector<8x128xf32>
    %291 = vector.shape_cast %287 : vector<8x128xf32> to vector<1x8x128xf32>
    tpu.vector_store %arg5[%288, %c0_111, %c0_112], %291 {strides = array<i32>} : memref<8x8x128xf32, #tpu.memory_space<vmem>>, vector<1x8x128xf32>,
    %c7_i32 = arith.constant 7 : i32
    %292 = arith.index_cast %c7_i32 : i32 to index
    %c0_113 = arith.constant 0 : index
    %c0_114 = arith.constant 0 : index
    %293 = vector.load %arg8[%292, %c0_113, %c0_114] : memref<8x8x512xf32, #tpu.memory_space<vmem>>, vector<1x8x512xf32>
    %294 = vector.shape_cast %293 : vector<1x8x512xf32> to vector<8x512xf32>
    %cst_115 = arith.constant dense<0.000000e+00> : vector<8x512xf32>
    %295 = tpu.matmul %287, %9, %cst_115 {dimension_numbers = #tpu.dot_dimension_numbers<[1], [0], [0], [1], [0, 0, 1, 1], [], []>} : vector<8x128xf32>, vector<128x512xf32>, vector<8x512xf32> -> vector<8x512xf32>
    %296 = arith.addf %294, %295 : vector<8x512xf32>
    %297 = vector.extract_strided_slice %296 {offsets = [0, 0], sizes = [8, 128], strides = [1, 1]} : vector<8x512xf32> to vector<8x128xf32>
    %cst_116 = arith.constant 5.000000e-01 : f32
    %298 = vector.broadcast %cst_116 : f32 to vector<8x128xf32>
    %299 = arith.mulf %298, %297 : vector<8x128xf32>
    %300 = math.tanh %299 : vector<8x128xf32>
    %cst_117 = arith.constant 5.000000e-01 : f32
    %301 = vector.broadcast %cst_117 : f32 to vector<8x128xf32>
    %302 = arith.mulf %301, %300 : vector<8x128xf32>
    %cst_118 = arith.constant 5.000000e-01 : f32
    %303 = vector.broadcast %cst_118 : f32 to vector<8x128xf32>
    %304 = arith.addf %302, %303 : vector<8x128xf32>
    %305 = vector.extract_strided_slice %296 {offsets = [0, 128], sizes = [8, 128], strides = [1, 1]} : vector<8x512xf32> to vector<8x128xf32>
    %cst_119 = arith.constant 5.000000e-01 : f32
    %306 = vector.broadcast %cst_119 : f32 to vector<8x128xf32>
    %307 = arith.mulf %306, %305 : vector<8x128xf32>
    %308 = math.tanh %307 : vector<8x128xf32>
    %cst_120 = arith.constant 5.000000e-01 : f32
    %309 = vector.broadcast %cst_120 : f32 to vector<8x128xf32>
    %310 = arith.mulf %309, %308 : vector<8x128xf32>
    %cst_121 = arith.constant 5.000000e-01 : f32
    %311 = vector.broadcast %cst_121 : f32 to vector<8x128xf32>
    %312 = arith.addf %310, %311 : vector<8x128xf32>
    %313 = vector.extract_strided_slice %296 {offsets = [0, 256], sizes = [8, 128], strides = [1, 1]} : vector<8x512xf32> to vector<8x128xf32>
    %314 = math.tanh %313 : vector<8x128xf32>
    %315 = vector.extract_strided_slice %296 {offsets = [0, 384], sizes = [8, 128], strides = [1, 1]} : vector<8x512xf32> to vector<8x128xf32>
    %cst_122 = arith.constant 5.000000e-01 : f32
    %316 = vector.broadcast %cst_122 : f32 to vector<8x128xf32>
    %317 = arith.mulf %316, %315 : vector<8x128xf32>
    %318 = math.tanh %317 : vector<8x128xf32>
    %cst_123 = arith.constant 5.000000e-01 : f32
    %319 = vector.broadcast %cst_123 : f32 to vector<8x128xf32>
    %320 = arith.mulf %319, %318 : vector<8x128xf32>
    %cst_124 = arith.constant 5.000000e-01 : f32
    %321 = vector.broadcast %cst_124 : f32 to vector<8x128xf32>
    %322 = arith.addf %320, %321 : vector<8x128xf32>
    %323 = arith.mulf %312, %285 : vector<8x128xf32>
    %324 = arith.mulf %304, %314 : vector<8x128xf32>
    %325 = arith.addf %323, %324 : vector<8x128xf32>
    %326 = math.tanh %325 : vector<8x128xf32>
    %327 = arith.mulf %322, %326 : vector<8x128xf32>
    %328 = arith.index_cast %c7_i32 : i32 to index
    %c0_125 = arith.constant 0 : index
    %c0_126 = arith.constant 0 : index
    %329 = vector.load %arg5[%328, %c0_125, %c0_126] : memref<8x8x128xf32, #tpu.memory_space<vmem>>, vector<1x8x128xf32>
    %330 = vector.shape_cast %329 : vector<1x8x128xf32> to vector<8x128xf32>
    %331 = vector.shape_cast %327 : vector<8x128xf32> to vector<1x8x128xf32>
    tpu.vector_store %arg5[%328, %c0_125, %c0_126], %331 {strides = array<i32>} : memref<8x8x128xf32, #tpu.memory_space<vmem>>, vector<1x8x128xf32>,
    %c8_i32 = arith.constant 8 : i32
    %c0_127 = arith.constant 0 : index
    %c0_128 = arith.constant 0 : index
    %332 = vector.load %arg6[%c0_127, %c0_128] : memref<8x128xf32, #tpu.memory_space<vmem>>, vector<8x128xf32>
    tpu.vector_store %arg6[%c0_127, %c0_128], %327 {strides = array<i32>} : memref<8x128xf32, #tpu.memory_space<vmem>>, vector<8x128xf32>,
    %c0_129 = arith.constant 0 : index
    %c0_130 = arith.constant 0 : index
    %333 = vector.load %arg7[%c0_129, %c0_130] : memref<8x128xf32, #tpu.memory_space<vmem>>, vector<8x128xf32>
    tpu.vector_store %arg7[%c0_129, %c0_130], %325 {strides = array<i32>} : memref<8x128xf32, #tpu.memory_space<vmem>>, vector<8x128xf32>,
    return
  }
  func.func @transform_0(%arg0: i32, %arg1: i32) -> (i32, i32, i32) {
    %c0_i32 = arith.constant 0 : i32
    %c0_i32_0 = arith.constant 0 : i32
    return %arg1, %arg0, %c0_i32 : i32, i32, i32
  }
  func.func @transform_1(%arg0: i32, %arg1: i32) -> (i32, i32) {
    %c0_i32 = arith.constant 0 : i32
    %c0_i32_0 = arith.constant 0 : i32
    %c0_i32_1 = arith.constant 0 : i32
    return %c0_i32, %c0_i32_0 : i32, i32
  }
  func.func @transform_2(%arg0: i32, %arg1: i32) -> (i32, i32) {
    %c0_i32 = arith.constant 0 : i32
    %c0_i32_0 = arith.constant 0 : i32
    %c0_i32_1 = arith.constant 0 : i32
    return %c0_i32, %c0_i32_0 : i32, i32
  }
  func.func @transform_3(%arg0: i32, %arg1: i32) -> (i32, i32, i32) {
    %c0_i32 = arith.constant 0 : i32
    %c0_i32_0 = arith.constant 0 : i32
    return %arg1, %arg0, %c0_i32 : i32, i32, i32
  }
}

module attributes {stable_mosaic.version = 11 : i64} {
  func.func @_lstm_block_kernel(%arg0: i32, %arg1: i32, %arg2: memref<8x8x8xf32, #tpu.memory_space<vmem>>, %arg3: memref<8x512xf32, #tpu.memory_space<vmem>>, %arg4: memref<128x512xf32, #tpu.memory_space<vmem>>, %arg5: memref<8x8x128xf32, #tpu.memory_space<vmem>>, %arg6: memref<8x128xf32, #tpu.memory_space<vmem>>, %arg7: memref<8x128xf32, #tpu.memory_space<vmem>>, %arg8: memref<8x8x512xf32, #tpu.memory_space<vmem>>) attributes {dimension_semantics = [#tpu.dimension_semantics<parallel>, #tpu.dimension_semantics<arbitrary>], iteration_bounds = array<i64: 1, 1>, scalar_prefetch = 0 : i64, scratch_operands = 3 : i64, tpu.core_type = #tpu.core_type<tc>, window_params = [{transform_indices = @transform_0, window_bounds = array<i64: 8, 8, 8>}, {pipeline_mode = #tpu.pipeline_mode<synchronous>, transform_indices = @transform_1, window_bounds = array<i64: 8, 512>}, {pipeline_mode = #tpu.pipeline_mode<synchronous>, transform_indices = @transform_2, window_bounds = array<i64: 128, 512>}, {transform_indices = @transform_3, window_bounds = array<i64: 8, 8, 128>}]} {
    %c0_i32 = arith.constant 0 : i32
    %0 = arith.cmpi eq, %arg1, %c0_i32 : i32
    %1 = arith.extui %0 : i1 to i32
    %c0_i32_0 = arith.constant 0 : i32
    %2 = arith.cmpi ne, %1, %c0_i32_0 : i32
    scf.if %2 {
      %cst_131 = arith.constant 0.000000e+00 : f32
      %334 = vector.broadcast %cst_131 : f32 to vector<8x128xf32>
      %c0_132 = arith.constant 0 : index
      %c0_133 = arith.constant 0 : index
      %335 = vector.load %arg6[%c0_132, %c0_133] : memref<8x128xf32, #tpu.memory_space<vmem>>, vector<8x128xf32>
      tpu.vector_store %arg6[%c0_132, %c0_133], %334 {strides = array<i32>} : memref<8x128xf32, #tpu.memory_space<vmem>>, vector<8x128xf32>,
      %cst_134 = arith.constant 0.000000e+00 : f32
      %336 = vector.broadcast %cst_134 : f32 to vector<8x128xf32>
      %c0_135 = arith.constant 0 : index
      %c0_136 = arith.constant 0 : index
      %337 = vector.load %arg7[%c0_135, %c0_136] : memref<8x128xf32, #tpu.memory_space<vmem>>, vector<8x128xf32>
      tpu.vector_store %arg7[%c0_135, %c0_136], %336 {strides = array<i32>} : memref<8x128xf32, #tpu.memory_space<vmem>>, vector<8x128xf32>,
    } else {
    }
    %c0 = arith.constant 0 : index
    %c0_1 = arith.constant 0 : index
    %c0_2 = arith.constant 0 : index
    %3 = vector.load %arg2[%c0, %c0_1, %c0_2] : memref<8x8x8xf32, #tpu.memory_space<vmem>>, vector<8x8x8xf32>
    %4 = vector.shape_cast %3 : vector<8x8x8xf32> to vector<64x8xf32>
    %c0_3 = arith.constant 0 : index
    %c0_4 = arith.constant 0 : index
    %5 = vector.load %arg3[%c0_3, %c0_4] : memref<8x512xf32, #tpu.memory_space<vmem>>, vector<8x512xf32>
    %cst = arith.constant dense<0.000000e+00> : vector<64x512xf32>
    %6 = tpu.matmul %4, %5, %cst {dimension_numbers = #tpu.dot_dimension_numbers<[1], [0], [0], [1], [0, 0, 1, 1], [], []>} : vector<64x8xf32>, vector<8x512xf32>, vector<64x512xf32> -> vector<64x512xf32>
    %7 = vector.shape_cast %6 : vector<64x512xf32> to vector<8x8x512xf32>
    %c0_5 = arith.constant 0 : index
    %c0_6 = arith.constant 0 : index
    %c0_7 = arith.constant 0 : index
    %8 = vector.load %arg8[%c0_5, %c0_6, %c0_7] : memref<8x8x512xf32, #tpu.memory_space<vmem>>, vector<8x8x512xf32>
    tpu.vector_store %arg8[%c0_5, %c0_6, %c0_7], %7 {strides = array<i32>} : memref<8x8x512xf32, #tpu.memory_space<vmem>>, vector<8x8x512xf32>,
    %c0_8 = arith.constant 0 : index
    %c0_9 = arith.constant 0 : index
    %9 = vector.load %arg4[%c0_8, %c0_9] : memref<128x512xf32, #tpu.memory_space<vmem>>, vector<128x512xf32>
    %c0_10 = arith.constant 0 : index
    %c0_11 = arith.constant 0 : index
    %10 = vector.load %arg6[%c0_10, %c0_11] : memref<8x128xf32, #tpu.memory_space<vmem>>, vector<8x128xf32>
    %c0_12 = arith.constant 0 : index
    %c0_13 = arith.constant 0 : index
    %11 = vector.load %arg7[%c0_12, %c0_13] : memref<8x128xf32, #tpu.memory_space<vmem>>, vector<8x128xf32>
    %c0_i32_14 = arith.constant 0 : i32
    %12 = arith.index_cast %c0_i32_14 : i32 to index
    %c0_15 = arith.constant 0 : index
    %c0_16 = arith.constant 0 : index
    %13 = vector.load %arg8[%12, %c0_15, %c0_16] : memref<8x8x512xf32, #tpu.memory_space<vmem>>, vector<1x8x512xf32>
    %14 = vector.shape_cast %13 : vector<1x8x512xf32> to vector<8x512xf32>
    %cst_17 = arith.constant dense<0.000000e+00> : vector<8x512xf32>
    %15 = tpu.matmul %10, %9, %cst_17 {dimension_numbers = #tpu.dot_dimension_numbers<[1], [0], [0], [1], [0, 0, 1, 1], [], []>} : vector<8x128xf32>, vector<128x512xf32>, vector<8x512xf32> -> vector<8x512xf32>
    %16 = arith.addf %14, %15 : vector<8x512xf32>
    %17 = vector.extract_strided_slice %16 {offsets = [0, 0], sizes = [8, 128], strides = [1, 1]} : vector<8x512xf32> to vector<8x128xf32>
    %cst_18 = arith.constant 5.000000e-01 : f32
    %18 = vector.broadcast %cst_18 : f32 to vector<8x128xf32>
    %19 = arith.mulf %18, %17 : vector<8x128xf32>
    %20 = math.tanh %19 : vector<8x128xf32>
    %cst_19 = arith.constant 5.000000e-01 : f32
    %21 = vector.broadcast %cst_19 : f32 to vector<8x128xf32>
    %22 = arith.mulf %21, %20 : vector<8x128xf32>
    %cst_20 = arith.constant 5.000000e-01 : f32
    %23 = vector.broadcast %cst_20 : f32 to vector<8x128xf32>
    %24 = arith.addf %22, %23 : vector<8x128xf32>
    %25 = vector.extract_strided_slice %16 {offsets = [0, 128], sizes = [8, 128], strides = [1, 1]} : vector<8x512xf32> to vector<8x128xf32>
    %cst_21 = arith.constant 5.000000e-01 : f32
    %26 = vector.broadcast %cst_21 : f32 to vector<8x128xf32>
    %27 = arith.mulf %26, %25 : vector<8x128xf32>
    %28 = math.tanh %27 : vector<8x128xf32>
    %cst_22 = arith.constant 5.000000e-01 : f32
    %29 = vector.broadcast %cst_22 : f32 to vector<8x128xf32>
    %30 = arith.mulf %29, %28 : vector<8x128xf32>
    %cst_23 = arith.constant 5.000000e-01 : f32
    %31 = vector.broadcast %cst_23 : f32 to vector<8x128xf32>
    %32 = arith.addf %30, %31 : vector<8x128xf32>
    %33 = vector.extract_strided_slice %16 {offsets = [0, 256], sizes = [8, 128], strides = [1, 1]} : vector<8x512xf32> to vector<8x128xf32>
    %34 = math.tanh %33 : vector<8x128xf32>
    %35 = vector.extract_strided_slice %16 {offsets = [0, 384], sizes = [8, 128], strides = [1, 1]} : vector<8x512xf32> to vector<8x128xf32>
    %cst_24 = arith.constant 5.000000e-01 : f32
    %36 = vector.broadcast %cst_24 : f32 to vector<8x128xf32>
    %37 = arith.mulf %36, %35 : vector<8x128xf32>
    %38 = math.tanh %37 : vector<8x128xf32>
    %cst_25 = arith.constant 5.000000e-01 : f32
    %39 = vector.broadcast %cst_25 : f32 to vector<8x128xf32>
    %40 = arith.mulf %39, %38 : vector<8x128xf32>
    %cst_26 = arith.constant 5.000000e-01 : f32
    %41 = vector.broadcast %cst_26 : f32 to vector<8x128xf32>
    %42 = arith.addf %40, %41 : vector<8x128xf32>
    %43 = arith.mulf %32, %11 : vector<8x128xf32>
    %44 = arith.mulf %24, %34 : vector<8x128xf32>
    %45 = arith.addf %43, %44 : vector<8x128xf32>
    %46 = math.tanh %45 : vector<8x128xf32>
    %47 = arith.mulf %42, %46 : vector<8x128xf32>
    %48 = arith.index_cast %c0_i32_14 : i32 to index
    %c0_27 = arith.constant 0 : index
    %c0_28 = arith.constant 0 : index
    %49 = vector.load %arg5[%48, %c0_27, %c0_28] : memref<8x8x128xf32, #tpu.memory_space<vmem>>, vector<1x8x128xf32>
    %50 = vector.shape_cast %49 : vector<1x8x128xf32> to vector<8x128xf32>
    %51 = vector.shape_cast %47 : vector<8x128xf32> to vector<1x8x128xf32>
    tpu.vector_store %arg5[%48, %c0_27, %c0_28], %51 {strides = array<i32>} : memref<8x8x128xf32, #tpu.memory_space<vmem>>, vector<1x8x128xf32>,
    %c1_i32 = arith.constant 1 : i32
    %52 = arith.index_cast %c1_i32 : i32 to index
    %c0_29 = arith.constant 0 : index
    %c0_30 = arith.constant 0 : index
    %53 = vector.load %arg8[%52, %c0_29, %c0_30] : memref<8x8x512xf32, #tpu.memory_space<vmem>>, vector<1x8x512xf32>
    %54 = vector.shape_cast %53 : vector<1x8x512xf32> to vector<8x512xf32>
    %cst_31 = arith.constant dense<0.000000e+00> : vector<8x512xf32>
    %55 = tpu.matmul %47, %9, %cst_31 {dimension_numbers = #tpu.dot_dimension_numbers<[1], [0], [0], [1], [0, 0, 1, 1], [], []>} : vector<8x128xf32>, vector<128x512xf32>, vector<8x512xf32> -> vector<8x512xf32>
    %56 = arith.addf %54, %55 : vector<8x512xf32>
    %57 = vector.extract_strided_slice %56 {offsets = [0, 0], sizes = [8, 128], strides = [1, 1]} : vector<8x512xf32> to vector<8x128xf32>
    %cst_32 = arith.constant 5.000000e-01 : f32
    %58 = vector.broadcast %cst_32 : f32 to vector<8x128xf32>
    %59 = arith.mulf %58, %57 : vector<8x128xf32>
    %60 = math.tanh %59 : vector<8x128xf32>
    %cst_33 = arith.constant 5.000000e-01 : f32
    %61 = vector.broadcast %cst_33 : f32 to vector<8x128xf32>
    %62 = arith.mulf %61, %60 : vector<8x128xf32>
    %cst_34 = arith.constant 5.000000e-01 : f32
    %63 = vector.broadcast %cst_34 : f32 to vector<8x128xf32>
    %64 = arith.addf %62, %63 : vector<8x128xf32>
    %65 = vector.extract_strided_slice %56 {offsets = [0, 128], sizes = [8, 128], strides = [1, 1]} : vector<8x512xf32> to vector<8x128xf32>
    %cst_35 = arith.constant 5.000000e-01 : f32
    %66 = vector.broadcast %cst_35 : f32 to vector<8x128xf32>
    %67 = arith.mulf %66, %65 : vector<8x128xf32>
    %68 = math.tanh %67 : vector<8x128xf32>
    %cst_36 = arith.constant 5.000000e-01 : f32
    %69 = vector.broadcast %cst_36 : f32 to vector<8x128xf32>
    %70 = arith.mulf %69, %68 : vector<8x128xf32>
    %cst_37 = arith.constant 5.000000e-01 : f32
    %71 = vector.broadcast %cst_37 : f32 to vector<8x128xf32>
    %72 = arith.addf %70, %71 : vector<8x128xf32>
    %73 = vector.extract_strided_slice %56 {offsets = [0, 256], sizes = [8, 128], strides = [1, 1]} : vector<8x512xf32> to vector<8x128xf32>
    %74 = math.tanh %73 : vector<8x128xf32>
    %75 = vector.extract_strided_slice %56 {offsets = [0, 384], sizes = [8, 128], strides = [1, 1]} : vector<8x512xf32> to vector<8x128xf32>
    %cst_38 = arith.constant 5.000000e-01 : f32
    %76 = vector.broadcast %cst_38 : f32 to vector<8x128xf32>
    %77 = arith.mulf %76, %75 : vector<8x128xf32>
    %78 = math.tanh %77 : vector<8x128xf32>
    %cst_39 = arith.constant 5.000000e-01 : f32
    %79 = vector.broadcast %cst_39 : f32 to vector<8x128xf32>
    %80 = arith.mulf %79, %78 : vector<8x128xf32>
    %cst_40 = arith.constant 5.000000e-01 : f32
    %81 = vector.broadcast %cst_40 : f32 to vector<8x128xf32>
    %82 = arith.addf %80, %81 : vector<8x128xf32>
    %83 = arith.mulf %72, %45 : vector<8x128xf32>
    %84 = arith.mulf %64, %74 : vector<8x128xf32>
    %85 = arith.addf %83, %84 : vector<8x128xf32>
    %86 = math.tanh %85 : vector<8x128xf32>
    %87 = arith.mulf %82, %86 : vector<8x128xf32>
    %88 = arith.index_cast %c1_i32 : i32 to index
    %c0_41 = arith.constant 0 : index
    %c0_42 = arith.constant 0 : index
    %89 = vector.load %arg5[%88, %c0_41, %c0_42] : memref<8x8x128xf32, #tpu.memory_space<vmem>>, vector<1x8x128xf32>
    %90 = vector.shape_cast %89 : vector<1x8x128xf32> to vector<8x128xf32>
    %91 = vector.shape_cast %87 : vector<8x128xf32> to vector<1x8x128xf32>
    tpu.vector_store %arg5[%88, %c0_41, %c0_42], %91 {strides = array<i32>} : memref<8x8x128xf32, #tpu.memory_space<vmem>>, vector<1x8x128xf32>,
    %c2_i32 = arith.constant 2 : i32
    %92 = arith.index_cast %c2_i32 : i32 to index
    %c0_43 = arith.constant 0 : index
    %c0_44 = arith.constant 0 : index
    %93 = vector.load %arg8[%92, %c0_43, %c0_44] : memref<8x8x512xf32, #tpu.memory_space<vmem>>, vector<1x8x512xf32>
    %94 = vector.shape_cast %93 : vector<1x8x512xf32> to vector<8x512xf32>
    %cst_45 = arith.constant dense<0.000000e+00> : vector<8x512xf32>
    %95 = tpu.matmul %87, %9, %cst_45 {dimension_numbers = #tpu.dot_dimension_numbers<[1], [0], [0], [1], [0, 0, 1, 1], [], []>} : vector<8x128xf32>, vector<128x512xf32>, vector<8x512xf32> -> vector<8x512xf32>
    %96 = arith.addf %94, %95 : vector<8x512xf32>
    %97 = vector.extract_strided_slice %96 {offsets = [0, 0], sizes = [8, 128], strides = [1, 1]} : vector<8x512xf32> to vector<8x128xf32>
    %cst_46 = arith.constant 5.000000e-01 : f32
    %98 = vector.broadcast %cst_46 : f32 to vector<8x128xf32>
    %99 = arith.mulf %98, %97 : vector<8x128xf32>
    %100 = math.tanh %99 : vector<8x128xf32>
    %cst_47 = arith.constant 5.000000e-01 : f32
    %101 = vector.broadcast %cst_47 : f32 to vector<8x128xf32>
    %102 = arith.mulf %101, %100 : vector<8x128xf32>
    %cst_48 = arith.constant 5.000000e-01 : f32
    %103 = vector.broadcast %cst_48 : f32 to vector<8x128xf32>
    %104 = arith.addf %102, %103 : vector<8x128xf32>
    %105 = vector.extract_strided_slice %96 {offsets = [0, 128], sizes = [8, 128], strides = [1, 1]} : vector<8x512xf32> to vector<8x128xf32>
    %cst_49 = arith.constant 5.000000e-01 : f32
    %106 = vector.broadcast %cst_49 : f32 to vector<8x128xf32>
    %107 = arith.mulf %106, %105 : vector<8x128xf32>
    %108 = math.tanh %107 : vector<8x128xf32>
    %cst_50 = arith.constant 5.000000e-01 : f32
    %109 = vector.broadcast %cst_50 : f32 to vector<8x128xf32>
    %110 = arith.mulf %109, %108 : vector<8x128xf32>
    %cst_51 = arith.constant 5.000000e-01 : f32
    %111 = vector.broadcast %cst_51 : f32 to vector<8x128xf32>
    %112 = arith.addf %110, %111 : vector<8x128xf32>
    %113 = vector.extract_strided_slice %96 {offsets = [0, 256], sizes = [8, 128], strides = [1, 1]} : vector<8x512xf32> to vector<8x128xf32>
    %114 = math.tanh %113 : vector<8x128xf32>
    %115 = vector.extract_strided_slice %96 {offsets = [0, 384], sizes = [8, 128], strides = [1, 1]} : vector<8x512xf32> to vector<8x128xf32>
    %cst_52 = arith.constant 5.000000e-01 : f32
    %116 = vector.broadcast %cst_52 : f32 to vector<8x128xf32>
    %117 = arith.mulf %116, %115 : vector<8x128xf32>
    %118 = math.tanh %117 : vector<8x128xf32>
    %cst_53 = arith.constant 5.000000e-01 : f32
    %119 = vector.broadcast %cst_53 : f32 to vector<8x128xf32>
    %120 = arith.mulf %119, %118 : vector<8x128xf32>
    %cst_54 = arith.constant 5.000000e-01 : f32
    %121 = vector.broadcast %cst_54 : f32 to vector<8x128xf32>
    %122 = arith.addf %120, %121 : vector<8x128xf32>
    %123 = arith.mulf %112, %85 : vector<8x128xf32>
    %124 = arith.mulf %104, %114 : vector<8x128xf32>
    %125 = arith.addf %123, %124 : vector<8x128xf32>
    %126 = math.tanh %125 : vector<8x128xf32>
    %127 = arith.mulf %122, %126 : vector<8x128xf32>
    %128 = arith.index_cast %c2_i32 : i32 to index
    %c0_55 = arith.constant 0 : index
    %c0_56 = arith.constant 0 : index
    %129 = vector.load %arg5[%128, %c0_55, %c0_56] : memref<8x8x128xf32, #tpu.memory_space<vmem>>, vector<1x8x128xf32>
    %130 = vector.shape_cast %129 : vector<1x8x128xf32> to vector<8x128xf32>
    %131 = vector.shape_cast %127 : vector<8x128xf32> to vector<1x8x128xf32>
    tpu.vector_store %arg5[%128, %c0_55, %c0_56], %131 {strides = array<i32>} : memref<8x8x128xf32, #tpu.memory_space<vmem>>, vector<1x8x128xf32>,
    %c3_i32 = arith.constant 3 : i32
    %132 = arith.index_cast %c3_i32 : i32 to index
    %c0_57 = arith.constant 0 : index
    %c0_58 = arith.constant 0 : index
    %133 = vector.load %arg8[%132, %c0_57, %c0_58] : memref<8x8x512xf32, #tpu.memory_space<vmem>>, vector<1x8x512xf32>
    %134 = vector.shape_cast %133 : vector<1x8x512xf32> to vector<8x512xf32>
    %cst_59 = arith.constant dense<0.000000e+00> : vector<8x512xf32>
    %135 = tpu.matmul %127, %9, %cst_59 {dimension_numbers = #tpu.dot_dimension_numbers<[1], [0], [0], [1], [0, 0, 1, 1], [], []>} : vector<8x128xf32>, vector<128x512xf32>, vector<8x512xf32> -> vector<8x512xf32>
    %136 = arith.addf %134, %135 : vector<8x512xf32>
    %137 = vector.extract_strided_slice %136 {offsets = [0, 0], sizes = [8, 128], strides = [1, 1]} : vector<8x512xf32> to vector<8x128xf32>
    %cst_60 = arith.constant 5.000000e-01 : f32
    %138 = vector.broadcast %cst_60 : f32 to vector<8x128xf32>
    %139 = arith.mulf %138, %137 : vector<8x128xf32>
    %140 = math.tanh %139 : vector<8x128xf32>
    %cst_61 = arith.constant 5.000000e-01 : f32
    %141 = vector.broadcast %cst_61 : f32 to vector<8x128xf32>
    %142 = arith.mulf %141, %140 : vector<8x128xf32>
    %cst_62 = arith.constant 5.000000e-01 : f32
    %143 = vector.broadcast %cst_62 : f32 to vector<8x128xf32>
    %144 = arith.addf %142, %143 : vector<8x128xf32>
    %145 = vector.extract_strided_slice %136 {offsets = [0, 128], sizes = [8, 128], strides = [1, 1]} : vector<8x512xf32> to vector<8x128xf32>
    %cst_63 = arith.constant 5.000000e-01 : f32
    %146 = vector.broadcast %cst_63 : f32 to vector<8x128xf32>
    %147 = arith.mulf %146, %145 : vector<8x128xf32>
    %148 = math.tanh %147 : vector<8x128xf32>
    %cst_64 = arith.constant 5.000000e-01 : f32
    %149 = vector.broadcast %cst_64 : f32 to vector<8x128xf32>
    %150 = arith.mulf %149, %148 : vector<8x128xf32>
    %cst_65 = arith.constant 5.000000e-01 : f32
    %151 = vector.broadcast %cst_65 : f32 to vector<8x128xf32>
    %152 = arith.addf %150, %151 : vector<8x128xf32>
    %153 = vector.extract_strided_slice %136 {offsets = [0, 256], sizes = [8, 128], strides = [1, 1]} : vector<8x512xf32> to vector<8x128xf32>
    %154 = math.tanh %153 : vector<8x128xf32>
    %155 = vector.extract_strided_slice %136 {offsets = [0, 384], sizes = [8, 128], strides = [1, 1]} : vector<8x512xf32> to vector<8x128xf32>
    %cst_66 = arith.constant 5.000000e-01 : f32
    %156 = vector.broadcast %cst_66 : f32 to vector<8x128xf32>
    %157 = arith.mulf %156, %155 : vector<8x128xf32>
    %158 = math.tanh %157 : vector<8x128xf32>
    %cst_67 = arith.constant 5.000000e-01 : f32
    %159 = vector.broadcast %cst_67 : f32 to vector<8x128xf32>
    %160 = arith.mulf %159, %158 : vector<8x128xf32>
    %cst_68 = arith.constant 5.000000e-01 : f32
    %161 = vector.broadcast %cst_68 : f32 to vector<8x128xf32>
    %162 = arith.addf %160, %161 : vector<8x128xf32>
    %163 = arith.mulf %152, %125 : vector<8x128xf32>
    %164 = arith.mulf %144, %154 : vector<8x128xf32>
    %165 = arith.addf %163, %164 : vector<8x128xf32>
    %166 = math.tanh %165 : vector<8x128xf32>
    %167 = arith.mulf %162, %166 : vector<8x128xf32>
    %168 = arith.index_cast %c3_i32 : i32 to index
    %c0_69 = arith.constant 0 : index
    %c0_70 = arith.constant 0 : index
    %169 = vector.load %arg5[%168, %c0_69, %c0_70] : memref<8x8x128xf32, #tpu.memory_space<vmem>>, vector<1x8x128xf32>
    %170 = vector.shape_cast %169 : vector<1x8x128xf32> to vector<8x128xf32>
    %171 = vector.shape_cast %167 : vector<8x128xf32> to vector<1x8x128xf32>
    tpu.vector_store %arg5[%168, %c0_69, %c0_70], %171 {strides = array<i32>} : memref<8x8x128xf32, #tpu.memory_space<vmem>>, vector<1x8x128xf32>,
    %c4_i32 = arith.constant 4 : i32
    %172 = arith.index_cast %c4_i32 : i32 to index
    %c0_71 = arith.constant 0 : index
    %c0_72 = arith.constant 0 : index
    %173 = vector.load %arg8[%172, %c0_71, %c0_72] : memref<8x8x512xf32, #tpu.memory_space<vmem>>, vector<1x8x512xf32>
    %174 = vector.shape_cast %173 : vector<1x8x512xf32> to vector<8x512xf32>
    %cst_73 = arith.constant dense<0.000000e+00> : vector<8x512xf32>
    %175 = tpu.matmul %167, %9, %cst_73 {dimension_numbers = #tpu.dot_dimension_numbers<[1], [0], [0], [1], [0, 0, 1, 1], [], []>} : vector<8x128xf32>, vector<128x512xf32>, vector<8x512xf32> -> vector<8x512xf32>
    %176 = arith.addf %174, %175 : vector<8x512xf32>
    %177 = vector.extract_strided_slice %176 {offsets = [0, 0], sizes = [8, 128], strides = [1, 1]} : vector<8x512xf32> to vector<8x128xf32>
    %cst_74 = arith.constant 5.000000e-01 : f32
    %178 = vector.broadcast %cst_74 : f32 to vector<8x128xf32>
    %179 = arith.mulf %178, %177 : vector<8x128xf32>
    %180 = math.tanh %179 : vector<8x128xf32>
    %cst_75 = arith.constant 5.000000e-01 : f32
    %181 = vector.broadcast %cst_75 : f32 to vector<8x128xf32>
    %182 = arith.mulf %181, %180 : vector<8x128xf32>
    %cst_76 = arith.constant 5.000000e-01 : f32
    %183 = vector.broadcast %cst_76 : f32 to vector<8x128xf32>
    %184 = arith.addf %182, %183 : vector<8x128xf32>
    %185 = vector.extract_strided_slice %176 {offsets = [0, 128], sizes = [8, 128], strides = [1, 1]} : vector<8x512xf32> to vector<8x128xf32>
    %cst_77 = arith.constant 5.000000e-01 : f32
    %186 = vector.broadcast %cst_77 : f32 to vector<8x128xf32>
    %187 = arith.mulf %186, %185 : vector<8x128xf32>
    %188 = math.tanh %187 : vector<8x128xf32>
    %cst_78 = arith.constant 5.000000e-01 : f32
    %189 = vector.broadcast %cst_78 : f32 to vector<8x128xf32>
    %190 = arith.mulf %189, %188 : vector<8x128xf32>
    %cst_79 = arith.constant 5.000000e-01 : f32
    %191 = vector.broadcast %cst_79 : f32 to vector<8x128xf32>
    %192 = arith.addf %190, %191 : vector<8x128xf32>
    %193 = vector.extract_strided_slice %176 {offsets = [0, 256], sizes = [8, 128], strides = [1, 1]} : vector<8x512xf32> to vector<8x128xf32>
    %194 = math.tanh %193 : vector<8x128xf32>
    %195 = vector.extract_strided_slice %176 {offsets = [0, 384], sizes = [8, 128], strides = [1, 1]} : vector<8x512xf32> to vector<8x128xf32>
    %cst_80 = arith.constant 5.000000e-01 : f32
    %196 = vector.broadcast %cst_80 : f32 to vector<8x128xf32>
    %197 = arith.mulf %196, %195 : vector<8x128xf32>
    %198 = math.tanh %197 : vector<8x128xf32>
    %cst_81 = arith.constant 5.000000e-01 : f32
    %199 = vector.broadcast %cst_81 : f32 to vector<8x128xf32>
    %200 = arith.mulf %199, %198 : vector<8x128xf32>
    %cst_82 = arith.constant 5.000000e-01 : f32
    %201 = vector.broadcast %cst_82 : f32 to vector<8x128xf32>
    %202 = arith.addf %200, %201 : vector<8x128xf32>
    %203 = arith.mulf %192, %165 : vector<8x128xf32>
    %204 = arith.mulf %184, %194 : vector<8x128xf32>
    %205 = arith.addf %203, %204 : vector<8x128xf32>
    %206 = math.tanh %205 : vector<8x128xf32>
    %207 = arith.mulf %202, %206 : vector<8x128xf32>
    %208 = arith.index_cast %c4_i32 : i32 to index
    %c0_83 = arith.constant 0 : index
    %c0_84 = arith.constant 0 : index
    %209 = vector.load %arg5[%208, %c0_83, %c0_84] : memref<8x8x128xf32, #tpu.memory_space<vmem>>, vector<1x8x128xf32>
    %210 = vector.shape_cast %209 : vector<1x8x128xf32> to vector<8x128xf32>
    %211 = vector.shape_cast %207 : vector<8x128xf32> to vector<1x8x128xf32>
    tpu.vector_store %arg5[%208, %c0_83, %c0_84], %211 {strides = array<i32>} : memref<8x8x128xf32, #tpu.memory_space<vmem>>, vector<1x8x128xf32>,
    %c5_i32 = arith.constant 5 : i32
    %212 = arith.index_cast %c5_i32 : i32 to index
    %c0_85 = arith.constant 0 : index
    %c0_86 = arith.constant 0 : index
    %213 = vector.load %arg8[%212, %c0_85, %c0_86] : memref<8x8x512xf32, #tpu.memory_space<vmem>>, vector<1x8x512xf32>
    %214 = vector.shape_cast %213 : vector<1x8x512xf32> to vector<8x512xf32>
    %cst_87 = arith.constant dense<0.000000e+00> : vector<8x512xf32>
    %215 = tpu.matmul %207, %9, %cst_87 {dimension_numbers = #tpu.dot_dimension_numbers<[1], [0], [0], [1], [0, 0, 1, 1], [], []>} : vector<8x128xf32>, vector<128x512xf32>, vector<8x512xf32> -> vector<8x512xf32>
    %216 = arith.addf %214, %215 : vector<8x512xf32>
    %217 = vector.extract_strided_slice %216 {offsets = [0, 0], sizes = [8, 128], strides = [1, 1]} : vector<8x512xf32> to vector<8x128xf32>
    %cst_88 = arith.constant 5.000000e-01 : f32
    %218 = vector.broadcast %cst_88 : f32 to vector<8x128xf32>
    %219 = arith.mulf %218, %217 : vector<8x128xf32>
    %220 = math.tanh %219 : vector<8x128xf32>
    %cst_89 = arith.constant 5.000000e-01 : f32
    %221 = vector.broadcast %cst_89 : f32 to vector<8x128xf32>
    %222 = arith.mulf %221, %220 : vector<8x128xf32>
    %cst_90 = arith.constant 5.000000e-01 : f32
    %223 = vector.broadcast %cst_90 : f32 to vector<8x128xf32>
    %224 = arith.addf %222, %223 : vector<8x128xf32>
    %225 = vector.extract_strided_slice %216 {offsets = [0, 128], sizes = [8, 128], strides = [1, 1]} : vector<8x512xf32> to vector<8x128xf32>
    %cst_91 = arith.constant 5.000000e-01 : f32
    %226 = vector.broadcast %cst_91 : f32 to vector<8x128xf32>
    %227 = arith.mulf %226, %225 : vector<8x128xf32>
    %228 = math.tanh %227 : vector<8x128xf32>
    %cst_92 = arith.constant 5.000000e-01 : f32
    %229 = vector.broadcast %cst_92 : f32 to vector<8x128xf32>
    %230 = arith.mulf %229, %228 : vector<8x128xf32>
    %cst_93 = arith.constant 5.000000e-01 : f32
    %231 = vector.broadcast %cst_93 : f32 to vector<8x128xf32>
    %232 = arith.addf %230, %231 : vector<8x128xf32>
    %233 = vector.extract_strided_slice %216 {offsets = [0, 256], sizes = [8, 128], strides = [1, 1]} : vector<8x512xf32> to vector<8x128xf32>
    %234 = math.tanh %233 : vector<8x128xf32>
    %235 = vector.extract_strided_slice %216 {offsets = [0, 384], sizes = [8, 128], strides = [1, 1]} : vector<8x512xf32> to vector<8x128xf32>
    %cst_94 = arith.constant 5.000000e-01 : f32
    %236 = vector.broadcast %cst_94 : f32 to vector<8x128xf32>
    %237 = arith.mulf %236, %235 : vector<8x128xf32>
    %238 = math.tanh %237 : vector<8x128xf32>
    %cst_95 = arith.constant 5.000000e-01 : f32
    %239 = vector.broadcast %cst_95 : f32 to vector<8x128xf32>
    %240 = arith.mulf %239, %238 : vector<8x128xf32>
    %cst_96 = arith.constant 5.000000e-01 : f32
    %241 = vector.broadcast %cst_96 : f32 to vector<8x128xf32>
    %242 = arith.addf %240, %241 : vector<8x128xf32>
    %243 = arith.mulf %232, %205 : vector<8x128xf32>
    %244 = arith.mulf %224, %234 : vector<8x128xf32>
    %245 = arith.addf %243, %244 : vector<8x128xf32>
    %246 = math.tanh %245 : vector<8x128xf32>
    %247 = arith.mulf %242, %246 : vector<8x128xf32>
    %248 = arith.index_cast %c5_i32 : i32 to index
    %c0_97 = arith.constant 0 : index
    %c0_98 = arith.constant 0 : index
    %249 = vector.load %arg5[%248, %c0_97, %c0_98] : memref<8x8x128xf32, #tpu.memory_space<vmem>>, vector<1x8x128xf32>
    %250 = vector.shape_cast %249 : vector<1x8x128xf32> to vector<8x128xf32>
    %251 = vector.shape_cast %247 : vector<8x128xf32> to vector<1x8x128xf32>
    tpu.vector_store %arg5[%248, %c0_97, %c0_98], %251 {strides = array<i32>} : memref<8x8x128xf32, #tpu.memory_space<vmem>>, vector<1x8x128xf32>,
    %c6_i32 = arith.constant 6 : i32
    %252 = arith.index_cast %c6_i32 : i32 to index
    %c0_99 = arith.constant 0 : index
    %c0_100 = arith.constant 0 : index
    %253 = vector.load %arg8[%252, %c0_99, %c0_100] : memref<8x8x512xf32, #tpu.memory_space<vmem>>, vector<1x8x512xf32>
    %254 = vector.shape_cast %253 : vector<1x8x512xf32> to vector<8x512xf32>
    %cst_101 = arith.constant dense<0.000000e+00> : vector<8x512xf32>
    %255 = tpu.matmul %247, %9, %cst_101 {dimension_numbers = #tpu.dot_dimension_numbers<[1], [0], [0], [1], [0, 0, 1, 1], [], []>} : vector<8x128xf32>, vector<128x512xf32>, vector<8x512xf32> -> vector<8x512xf32>
    %256 = arith.addf %254, %255 : vector<8x512xf32>
    %257 = vector.extract_strided_slice %256 {offsets = [0, 0], sizes = [8, 128], strides = [1, 1]} : vector<8x512xf32> to vector<8x128xf32>
    %cst_102 = arith.constant 5.000000e-01 : f32
    %258 = vector.broadcast %cst_102 : f32 to vector<8x128xf32>
    %259 = arith.mulf %258, %257 : vector<8x128xf32>
    %260 = math.tanh %259 : vector<8x128xf32>
    %cst_103 = arith.constant 5.000000e-01 : f32
    %261 = vector.broadcast %cst_103 : f32 to vector<8x128xf32>
    %262 = arith.mulf %261, %260 : vector<8x128xf32>
    %cst_104 = arith.constant 5.000000e-01 : f32
    %263 = vector.broadcast %cst_104 : f32 to vector<8x128xf32>
    %264 = arith.addf %262, %263 : vector<8x128xf32>
    %265 = vector.extract_strided_slice %256 {offsets = [0, 128], sizes = [8, 128], strides = [1, 1]} : vector<8x512xf32> to vector<8x128xf32>
    %cst_105 = arith.constant 5.000000e-01 : f32
    %266 = vector.broadcast %cst_105 : f32 to vector<8x128xf32>
    %267 = arith.mulf %266, %265 : vector<8x128xf32>
    %268 = math.tanh %267 : vector<8x128xf32>
    %cst_106 = arith.constant 5.000000e-01 : f32
    %269 = vector.broadcast %cst_106 : f32 to vector<8x128xf32>
    %270 = arith.mulf %269, %268 : vector<8x128xf32>
    %cst_107 = arith.constant 5.000000e-01 : f32
    %271 = vector.broadcast %cst_107 : f32 to vector<8x128xf32>
    %272 = arith.addf %270, %271 : vector<8x128xf32>
    %273 = vector.extract_strided_slice %256 {offsets = [0, 256], sizes = [8, 128], strides = [1, 1]} : vector<8x512xf32> to vector<8x128xf32>
    %274 = math.tanh %273 : vector<8x128xf32>
    %275 = vector.extract_strided_slice %256 {offsets = [0, 384], sizes = [8, 128], strides = [1, 1]} : vector<8x512xf32> to vector<8x128xf32>
    %cst_108 = arith.constant 5.000000e-01 : f32
    %276 = vector.broadcast %cst_108 : f32 to vector<8x128xf32>
    %277 = arith.mulf %276, %275 : vector<8x128xf32>
    %278 = math.tanh %277 : vector<8x128xf32>
    %cst_109 = arith.constant 5.000000e-01 : f32
    %279 = vector.broadcast %cst_109 : f32 to vector<8x128xf32>
    %280 = arith.mulf %279, %278 : vector<8x128xf32>
    %cst_110 = arith.constant 5.000000e-01 : f32
    %281 = vector.broadcast %cst_110 : f32 to vector<8x128xf32>
    %282 = arith.addf %280, %281 : vector<8x128xf32>
    %283 = arith.mulf %272, %245 : vector<8x128xf32>
    %284 = arith.mulf %264, %274 : vector<8x128xf32>
    %285 = arith.addf %283, %284 : vector<8x128xf32>
    %286 = math.tanh %285 : vector<8x128xf32>
    %287 = arith.mulf %282, %286 : vector<8x128xf32>
    %288 = arith.index_cast %c6_i32 : i32 to index
    %c0_111 = arith.constant 0 : index
    %c0_112 = arith.constant 0 : index
    %289 = vector.load %arg5[%288, %c0_111, %c0_112] : memref<8x8x128xf32, #tpu.memory_space<vmem>>, vector<1x8x128xf32>
    %290 = vector.shape_cast %289 : vector<1x8x128xf32> to vector<8x128xf32>
    %291 = vector.shape_cast %287 : vector<8x128xf32> to vector<1x8x128xf32>
    tpu.vector_store %arg5[%288, %c0_111, %c0_112], %291 {strides = array<i32>} : memref<8x8x128xf32, #tpu.memory_space<vmem>>, vector<1x8x128xf32>,
    %c7_i32 = arith.constant 7 : i32
    %292 = arith.index_cast %c7_i32 : i32 to index
    %c0_113 = arith.constant 0 : index
    %c0_114 = arith.constant 0 : index
    %293 = vector.load %arg8[%292, %c0_113, %c0_114] : memref<8x8x512xf32, #tpu.memory_space<vmem>>, vector<1x8x512xf32>
    %294 = vector.shape_cast %293 : vector<1x8x512xf32> to vector<8x512xf32>
    %cst_115 = arith.constant dense<0.000000e+00> : vector<8x512xf32>
    %295 = tpu.matmul %287, %9, %cst_115 {dimension_numbers = #tpu.dot_dimension_numbers<[1], [0], [0], [1], [0, 0, 1, 1], [], []>} : vector<8x128xf32>, vector<128x512xf32>, vector<8x512xf32> -> vector<8x512xf32>
    %296 = arith.addf %294, %295 : vector<8x512xf32>
    %297 = vector.extract_strided_slice %296 {offsets = [0, 0], sizes = [8, 128], strides = [1, 1]} : vector<8x512xf32> to vector<8x128xf32>
    %cst_116 = arith.constant 5.000000e-01 : f32
    %298 = vector.broadcast %cst_116 : f32 to vector<8x128xf32>
    %299 = arith.mulf %298, %297 : vector<8x128xf32>
    %300 = math.tanh %299 : vector<8x128xf32>
    %cst_117 = arith.constant 5.000000e-01 : f32
    %301 = vector.broadcast %cst_117 : f32 to vector<8x128xf32>
    %302 = arith.mulf %301, %300 : vector<8x128xf32>
    %cst_118 = arith.constant 5.000000e-01 : f32
    %303 = vector.broadcast %cst_118 : f32 to vector<8x128xf32>
    %304 = arith.addf %302, %303 : vector<8x128xf32>
    %305 = vector.extract_strided_slice %296 {offsets = [0, 128], sizes = [8, 128], strides = [1, 1]} : vector<8x512xf32> to vector<8x128xf32>
    %cst_119 = arith.constant 5.000000e-01 : f32
    %306 = vector.broadcast %cst_119 : f32 to vector<8x128xf32>
    %307 = arith.mulf %306, %305 : vector<8x128xf32>
    %308 = math.tanh %307 : vector<8x128xf32>
    %cst_120 = arith.constant 5.000000e-01 : f32
    %309 = vector.broadcast %cst_120 : f32 to vector<8x128xf32>
    %310 = arith.mulf %309, %308 : vector<8x128xf32>
    %cst_121 = arith.constant 5.000000e-01 : f32
    %311 = vector.broadcast %cst_121 : f32 to vector<8x128xf32>
    %312 = arith.addf %310, %311 : vector<8x128xf32>
    %313 = vector.extract_strided_slice %296 {offsets = [0, 256], sizes = [8, 128], strides = [1, 1]} : vector<8x512xf32> to vector<8x128xf32>
    %314 = math.tanh %313 : vector<8x128xf32>
    %315 = vector.extract_strided_slice %296 {offsets = [0, 384], sizes = [8, 128], strides = [1, 1]} : vector<8x512xf32> to vector<8x128xf32>
    %cst_122 = arith.constant 5.000000e-01 : f32
    %316 = vector.broadcast %cst_122 : f32 to vector<8x128xf32>
    %317 = arith.mulf %316, %315 : vector<8x128xf32>
    %318 = math.tanh %317 : vector<8x128xf32>
    %cst_123 = arith.constant 5.000000e-01 : f32
    %319 = vector.broadcast %cst_123 : f32 to vector<8x128xf32>
    %320 = arith.mulf %319, %318 : vector<8x128xf32>
    %cst_124 = arith.constant 5.000000e-01 : f32
    %321 = vector.broadcast %cst_124 : f32 to vector<8x128xf32>
    %322 = arith.addf %320, %321 : vector<8x128xf32>
    %323 = arith.mulf %312, %285 : vector<8x128xf32>
    %324 = arith.mulf %304, %314 : vector<8x128xf32>
    %325 = arith.addf %323, %324 : vector<8x128xf32>
    %326 = math.tanh %325 : vector<8x128xf32>
    %327 = arith.mulf %322, %326 : vector<8x128xf32>
    %328 = arith.index_cast %c7_i32 : i32 to index
    %c0_125 = arith.constant 0 : index
    %c0_126 = arith.constant 0 : index
    %329 = vector.load %arg5[%328, %c0_125, %c0_126] : memref<8x8x128xf32, #tpu.memory_space<vmem>>, vector<1x8x128xf32>
    %330 = vector.shape_cast %329 : vector<1x8x128xf32> to vector<8x128xf32>
    %331 = vector.shape_cast %327 : vector<8x128xf32> to vector<1x8x128xf32>
    tpu.vector_store %arg5[%328, %c0_125, %c0_126], %331 {strides = array<i32>} : memref<8x8x128xf32, #tpu.memory_space<vmem>>, vector<1x8x128xf32>,
    %c8_i32 = arith.constant 8 : i32
    %c0_127 = arith.constant 0 : index
    %c0_128 = arith.constant 0 : index
    %332 = vector.load %arg6[%c0_127, %c0_128] : memref<8x128xf32, #tpu.memory_space<vmem>>, vector<8x128xf32>
    tpu.vector_store %arg6[%c0_127, %c0_128], %327 {strides = array<i32>} : memref<8x128xf32, #tpu.memory_space<vmem>>, vector<8x128xf32>,
    %c0_129 = arith.constant 0 : index
    %c0_130 = arith.constant 0 : index
    %333 = vector.load %arg7[%c0_129, %c0_130] : memref<8x128xf32, #tpu.memory_space<vmem>>, vector<8x128xf32>
    tpu.vector_store %arg7[%c0_129, %c0_130], %325 {strides = array<i32>} : memref<8x128xf32, #tpu.memory_space<vmem>>, vector<8x128xf32>,
    return
  }
  func.func @transform_0(%arg0: i32, %arg1: i32) -> (i32, i32, i32) {
    %c0_i32 = arith.constant 0 : i32
    %c0_i32_0 = arith.constant 0 : i32
    return %arg1, %arg0, %c0_i32 : i32, i32, i32
  }
  func.func @transform_1(%arg0: i32, %arg1: i32) -> (i32, i32) {
    %c0_i32 = arith.constant 0 : i32
    %c0_i32_0 = arith.constant 0 : i32
    %c0_i32_1 = arith.constant 0 : i32
    return %c0_i32, %c0_i32_0 : i32, i32
  }
  func.func @transform_2(%arg0: i32, %arg1: i32) -> (i32, i32) {
    %c0_i32 = arith.constant 0 : i32
    %c0_i32_0 = arith.constant 0 : i32
    %c0_i32_1 = arith.constant 0 : i32
    return %c0_i32, %c0_i32_0 : i32, i32
  }
  func.func @transform_3(%arg0: i32, %arg1: i32) -> (i32, i32, i32) {
    %c0_i32 = arith.constant 0 : i32
    %c0_i32_0 = arith.constant 0 : i32
    return %arg1, %arg0, %c0_i32 : i32, i32, i32
  }
}

</mosaic_0001>

<bundles_post_ra>
// kernel: tpu_custom_call.1
= control target key start
LH: loop header
LB: loop body
LE: loop exit
PB: predicated region body
PF: predicated region fallthrough
CT: control target
= control target key end

     0   :  { %8 = vsyncpa [#allocation6], 0  ;;  %s3030_s0 = inlined_call_operand.hbm [shape: f32[8,8,8], index: 0, kind: input, shape index: {}]   ;;  %s3031_s1 = inlined_call_operand.hbm [shape: f32[8,512], index: 1, kind: input, shape index: {}]   ;;  %s3032_s2 = inlined_call_operand.hbm [shape: f32[128,512], index: 2, kind: input, shape index: {}]   ;;  %s3033_s3 = inlined_call_operand.hbm [shape: f32[8,8,128], index: 3, kind: output, shape index: {}]  }
   0x1   :  { %9 = vsyncpa [#allocation9], 0 }
   0x2   :  { %10 = vsyncpa [#allocation7], 0  ;;  %s2550_s12 = smov [#allocation8]   ;;  %s2551_s14 = smov [#allocation5]  }
   0x3   :  { %s29_s13 = sshll.u32 %s2550_s12, 4  ;;  %s16_s15 = sshll.u32 %s2551_s14, 4  ;;  %s30_s13 = int_to_ptr.vmem [resolvable:$true] %s29_s13  ;;  %s2579_s15 = int_to_ptr.vmem [resolvable:$true] %s16_s15 }
   0x4   :  { %s2456_s18 = scalar_lea.hbm %s3031_s1, 512 }
   0x5   :  { %p2457_p0 = scmp.ne.s32.totalorder %s3031_s1, %s2456_s18  ;;  %p2460_p1 = scmp.lt.u32.totalorder %s2456_s18, %s3031_s1 }
   0x7   :  { %p2462_p2 = pnand %p2460_p1, %p2457_p0 }
   0x9   :  { %2465 = shalt.err (!%p2462_p2)
}
   0xa   :  { %s2466_s23 = scalar_lea.vmem %s30_s13, 512  ;;  %p2471_p4 = scmp.lt.s32.totalorder %s30_s13, %s30_s13 }
   0xb   :  { %p2467_p3 = scmp.ne.s32.totalorder %s30_s13, %s2466_s23  ;;  %p2472_p5 = scmp.lt.s32.totalorder %s2466_s23, %s2466_s23 }
   0xd   :  { %p2473_p6 = por %p2472_p5, %p2471_p4 }
   0xf   :  { %p2474_p7 = pnand %p2473_p6, %p2467_p3 }
  0x11   :  { %2477 = shalt.err (!%p2474_p7)
}
  0x12   :  { %32 = dma.hbm_to_vmem [thread:$0]  %s3031_s1, 512, %s30_s13, [#allocation9]  }
  0x13   :  { %s2478_s28 = scalar_lea.hbm %s3030_s0, 1024 }
  0x14   :  { %p2479_p8 = scmp.ne.s32.totalorder %s3030_s0, %s2478_s28  ;;  %p2482_p9 = scmp.lt.u32.totalorder %s2478_s28, %s3030_s0 }
  0x16   :  { %p2484_p10 = pnand %p2482_p9, %p2479_p8 }
  0x18   :  { %2487 = shalt.err (!%p2484_p10)
}
  0x19   :  { %s2488_s6 = scalar_lea.vmem %s2579_s15, 1024  ;;  %p2493_p12 = scmp.lt.s32.totalorder %s2579_s15, %s2579_s15 }
  0x1a   :  { %p2489_p11 = scmp.ne.s32.totalorder %s2579_s15, %s2488_s6  ;;  %p2494_p13 = scmp.lt.s32.totalorder %s2488_s6, %s2488_s6 }
  0x1c   :  { %p2495_p0 = por %p2494_p13, %p2493_p12 }
  0x1e   :  { %p2496_p1 = pnand %p2495_p0, %p2489_p11 }
  0x20   :  { %2499 = shalt.err (!%p2496_p1)
}
  0x21   :  { %s2552_s1 = smov 128   ;;  %s2553_s7 = smov 8  }
  0x22   :  { %22 = dma.hbm_to_vmem [thread:$0]  %s3030_s0, 1024, %s2579_s15, [#allocation6], %s2552_s1, %s2552_s1, %s2553_s7  }
  0x23   :  { %s2554_s10 = smov [#allocation10]   ;;  %s2500_s14 = scalar_lea.hbm %s3032_s2, 8192 }
  0x24   :  { %s38_s11 = sshll.u32 %s2554_s10, 4  ;;  %p2501_p2 = scmp.ne.s32.totalorder %s3032_s2, %s2500_s14  ;;  %s39_s11 = int_to_ptr.vmem [resolvable:$true] %s38_s11 }
  0x25   :  { %p2504_p3 = scmp.lt.u32.totalorder %s2500_s14, %s3032_s2 }
  0x27   :  { %p2506_p4 = pnand %p2504_p3, %p2501_p2 }
  0x29   :  { %2509 = shalt.err (!%p2506_p4)
}
  0x2a   :  { %s2510_s20 = scalar_lea.vmem %s39_s11, 8192  ;;  %p2515_p6 = scmp.lt.s32.totalorder %s39_s11, %s39_s11 }
  0x2b   :  { %p2511_p5 = scmp.ne.s32.totalorder %s39_s11, %s2510_s20  ;;  %p2516_p7 = scmp.lt.s32.totalorder %s2510_s20, %s2510_s20 }
  0x2d   :  { %p2517_p8 = por %p2516_p7, %p2515_p6 }
  0x2f   :  { %p2518_p9 = pnand %p2517_p8, %p2511_p5 }
  0x31   :  { %2521 = shalt.err (!%p2518_p9)
}
  0x32   :  { %s2555_s0 = smov 512   ;;  %s2556_s15 = smov 32  }
  0x33   :  { %44 = dma.hbm_to_vmem [thread:$0]  %s3032_s2, 8192, %s39_s11, [#allocation9], %s2555_s0, %s2555_s0, %s2556_s15  }
  0x34   :  { %2544 = dma.done.wait [#allocation6], 1024  }
  0x35   :  { %2545 = vsyncadd [#allocation6], 4294966272 }
  0x36   :  { %2546 = dma.done.wait [#allocation9], 8704  }
  0x37   :  { %2547 = vsyncadd [#allocation9], 4294958592  ;;  %v2557_v0 = vmov 0.0   ;;  %v69_v1 = vld [vmem:[#allocation8 + $0x8] sm:$0xff]  ;;  %v71_v2 = vld [vmem:[#allocation8 + $0x18] sm:$0xff]  ;;  %vm72_vm0 = vcmask 64512  }
  0x38   :  { %161 = vmatprep.mubr.f32.mxu0 %v2557_v0  ;;  %274 = vmatprep.mubr.f32.mxu1 %v2557_v0  ;;  %v68_v3 = vld [vmem:[#allocation8] sm:$0xff]  ;;  %v70_v4 = vld [vmem:[#allocation8 + $0x10] sm:$0xff]  ;;  %v356_v6 = vld [vmem:[#allocation10 + $0x8] sm:$0xff]  ;;  %s2558_s2 = smov [#allocation11]  }
  0x39   :  { %97 = vmatprep.subr.mxu0 %v69_v1  ;;  %210 = vmatprep.subr.mxu1 %v71_v2  ;;  %v60_v5 = vld [vmem:[#allocation5] sm:$0xff]  ;;  %v360_v7 = vld [vmem:[#allocation10 + $0x28] sm:$0xff]  ;;  %v358_v8 = vld [vmem:[#allocation10 + $0x18] sm:$0xff]  ;;  %s1794_s23 = sshll.u32 %s2558_s2, 4  ;;  %s1795_s23 = int_to_ptr.vmem [resolvable:$true] %s1794_s23 }
  0x3a   :  { %98 = vmatpush1.msra.mxu0 %v68_v3  ;;  %211 = vmatpush1.msra.mxu1 %v70_v4  ;;  %v362_v9 = vld [vmem:[#allocation10 + $0x38] sm:$0xff]  ;;  %v2629_v10 = vpack.c.bf16 %v360_v7, %v356_v6  ;;  %v355_v12 = vld [vmem:[#allocation10] sm:$0xff]  ;;  %v357_v14 = vld [vmem:[#allocation10 + $0x10] sm:$0xff]  ;;  %s2522_s24 = scalar_lea.vmem %s1795_s23, 1024  ;;  %p2527_p11 = scmp.lt.s32.totalorder %s1795_s23, %s1795_s23 }
  0x3b   :  { %1807 = vmatmul.mubr.msk.f32.vlgmr.msra.gmra.mrb[0].mxu0 %vm72_vm0, %v60_v5  ;;  %1815 = vmatmul.mubr.msk.f32.vlgmr.msra.gmra.mrb[0].mxu1 %vm72_vm0, %v60_v5  ;;  %v2631_v11 = vpack.c.bf16 %v362_v9, %v358_v8  ;;  %v359_v13 = vld [vmem:[#allocation10 + $0x20] sm:$0xff]  ;;  %v361_v16 = vld [vmem:[#allocation10 + $0x30] sm:$0xff]  ;;  %v61_v17 = vld [vmem:[#allocation5 + $0x8] sm:$0xff]  ;;  %p2523_p10 = scmp.ne.s32.totalorder %s1795_s23, %s2522_s24  ;;  %p2528_p12 = scmp.lt.s32.totalorder %s2522_s24, %s2522_s24 }
  0x3c   :  { %v2633_v15 = vpack.c.bf16 %v359_v13, %v355_v12  ;;  %167 = vmatprep.mubr.f32.mxu0 %v2557_v0  ;;  %280 = vmatprep.mubr.f32.mxu1 %v2557_v0  ;;  %v364_v18 = vld [vmem:[#allocation10 + $0x48] sm:$0xff]  ;;  %v2639_v19 = vpack.c.bf16 %v361_v16, %v357_v14  ;;  %v366_v21 = vld [vmem:[#allocation10 + $0x58] sm:$0xff]  ;;  %v363_v25 = vld [vmem:[#allocation10 + $0x40] sm:$0xff] }
  0x3d   :  { %1824 = vmatprep.subr.bf16.mxu0 %v2629_v10  ;;  %1856 = vmatprep.subr.bf16.mxu1 %v2631_v11  ;;  %v368_v20 = vld [vmem:[#allocation10 + $0x68] sm:$0xff]  ;;  %v370_v22 = vld [vmem:[#allocation10 + $0x78] sm:$0xff]  ;;  %v367_v26 = vld [vmem:[#allocation10 + $0x60] sm:$0xff]  ;;  %p2529_p13 = por %p2528_p12, %p2527_p11 }
  0x3e   :  { %1826 = vmatpush1.bf16.msra.mxu0 %v2633_v15  ;;  %v2642_v23 = vpack.c.bf16 %v368_v20, %v364_v18  ;;  %v2644_v24 = vpack.c.bf16 %v370_v22, %v366_v21  ;;  %v365_v27 = vld [vmem:[#allocation10 + $0x50] sm:$0xff]  ;;  %1858 = vmatpush1.bf16.msra.mxu1 %v2639_v19  ;;  %v2648_v28 = vpack.c.bf16 %v367_v26, %v363_v25  ;;  %v372_v31 = vld [vmem:[#allocation10 + $0x88] sm:$0xff]  ;;  %v374_v34 = vld [vmem:[#allocation10 + $0x98] sm:$0xff] }
  0x3f   :  { %1808 = vmatmul.mubr.msk.f32.gmra.mrb[2].mxu0 %vm72_vm0, %v61_v17  ;;  %v369_v29 = vld [vmem:[#allocation10 + $0x70] sm:$0xff]  ;;  %1816 = vmatmul.mubr.msk.f32.gmra.mrb[2].mxu1 %vm72_vm0, %v61_v17  ;;  %v376_v33 = vld [vmem:[#allocation10 + $0xa8] sm:$0xff]  ;;  %v378_v35 = vld [vmem:[#allocation10 + $0xb8] sm:$0xff]  ;;  %p2530_p0 = pnand %p2529_p13, %p2523_p10 }
  0x40   :  { %v62_v30 = vld [vmem:[#allocation5 + $0x10] sm:$0xff]  ;;  %1828 = vmatprep.subr.bf16.mxu0 %v2642_v23  ;;  %v2652_v32 = vpack.c.bf16 %v369_v29, %v365_v27  ;;  %1860 = vmatprep.subr.bf16.mxu1 %v2644_v24  ;;  %v2656_v36 = vpack.c.bf16 %v376_v33, %v372_v31  ;;  %v2658_v37 = vpack.c.bf16 %v378_v35, %v374_v34  ;;  %v371_v38 = vld [vmem:[#allocation10 + $0x80] sm:$0xff]  ;;  %v63_v43 = vld [vmem:[#allocation5 + $0x18] sm:$0xff] }
  0x41   :  { %173 = vmatprep.mubr.f32.mxu0 %v2557_v0  ;;  %v375_v39 = vld [vmem:[#allocation10 + $0xa0] sm:$0xff]  ;;  %v373_v40 = vld [vmem:[#allocation10 + $0x90] sm:$0xff]  ;;  %286 = vmatprep.mubr.f32.mxu1 %v2557_v0  ;;  %v380_v44 = vld [vmem:[#allocation10 + $0xc8] sm:$0xff] }
  0x42   :  { %1830 = vmatpush1.bf16.msra.mxu0 %v2648_v28  ;;  %v2662_v41 = vpack.c.bf16 %v375_v39, %v371_v38  ;;  %v377_v42 = vld [vmem:[#allocation10 + $0xb0] sm:$0xff]  ;;  %1862 = vmatpush1.bf16.msra.mxu1 %v2652_v32  ;;  %v384_v46 = vld [vmem:[#allocation10 + $0xe8] sm:$0xff]  ;;  %v382_v47 = vld [vmem:[#allocation10 + $0xd8] sm:$0xff] }
  0x43   :  { %1809 = vmatmul.mubr.msk.f32.gmra.mrb[4].mxu0 %vm72_vm0, %v62_v30  ;;  %v2666_v45 = vpack.c.bf16 %v377_v42, %v373_v40  ;;  %v386_v48 = vld [vmem:[#allocation10 + $0xf8] sm:$0xff]  ;;  %1817 = vmatmul.mubr.msk.f32.gmra.mrb[4].mxu1 %vm72_vm0, %v62_v30  ;;  %v2670_v49 = vpack.c.bf16 %v384_v46, %v380_v44  ;;  %v379_v50 = vld [vmem:[#allocation10 + $0xc0] sm:$0xff]  ;;  %v381_v52 = vld [vmem:[#allocation10 + $0xd0] sm:$0xff] }
  0x44   :  { %1832 = vmatprep.subr.bf16.mxu0 %v2656_v36  ;;  %v383_v51 = vld [vmem:[#allocation10 + $0xe0] sm:$0xff]  ;;  %1864 = vmatprep.subr.bf16.mxu1 %v2658_v37  ;;  %v2674_v53 = vpack.c.bf16 %v386_v48, %v382_v47  ;;  %v385_v54 = vld [vmem:[#allocation10 + $0xf0] sm:$0xff]  ;;  %v388_v55 = vld [vmem:[#allocation10 + $0x108] sm:$0xff] }
  0x45   :  { %179 = vmatprep.mubr.f32.mxu0 %v2557_v0  ;;  %292 = vmatprep.mubr.f32.mxu1 %v2557_v0  ;;  %v2678_v56 = vpack.c.bf16 %v383_v51, %v379_v50  ;;  %v392_v57 = vld [vmem:[#allocation10 + $0x128] sm:$0xff]  ;;  %v390_v58 = vld [vmem:[#allocation10 + $0x118] sm:$0xff]  ;;  %v2682_v60 = vpack.c.bf16 %v385_v54, %v381_v52  ;;  %v387_v61 = vld [vmem:[#allocation10 + $0x100] sm:$0xff] }
  0x46   :  { %1834 = vmatpush1.bf16.msra.mxu0 %v2662_v41  ;;  %v394_v59 = vld [vmem:[#allocation10 + $0x138] sm:$0xff]  ;;  %1866 = vmatpush1.bf16.msra.mxu1 %v2666_v45  ;;  %v391_v62 = vld [vmem:[#allocation10 + $0x120] sm:$0xff]  ;;  %v2686_v1 = vpack.c.bf16 %v392_v57, %v388_v55  ;;  %v389_v2 = vld [vmem:[#allocation10 + $0x110] sm:$0xff] }
  0x47   :  { %1810 = vmatmul.mubr.msk.f32.gmra.mrb[6].mxu0 %vm72_vm0, %v63_v43  ;;  %1818 = vmatmul.mubr.msk.f32.gmra.mrb[6].mxu1 %vm72_vm0, %v63_v43  ;;  %v64_v63 = vld [vmem:[#allocation5 + $0x20] sm:$0xff]  ;;  %v393_v3 = vld [vmem:[#allocation10 + $0x130] sm:$0xff]  ;;  %v2690_v4 = vpack.c.bf16 %v394_v59, %v390_v58  ;;  %v396_v5 = vld [vmem:[#allocation10 + $0x148] sm:$0xff]  ;;  %v2694_v7 = vpack.c.bf16 %v391_v62, %v387_v61 }
  0x48   :  { %1836 = vmatprep.subr.bf16.mxu0 %v2670_v49  ;;  %1868 = vmatprep.subr.bf16.mxu1 %v2674_v53  ;;  %v400_v6 = vld [vmem:[#allocation10 + $0x168] sm:$0xff]  ;;  %v398_v8 = vld [vmem:[#allocation10 + $0x158] sm:$0xff]  ;;  %v2698_v12 = vpack.c.bf16 %v393_v3, %v389_v2  ;;  %v395_v13 = vld [vmem:[#allocation10 + $0x140] sm:$0xff] }
  0x49   :  { %185 = vmatprep.mubr.f32.mxu0 %v2557_v0  ;;  %298 = vmatprep.mubr.f32.mxu1 %v2557_v0  ;;  %v402_v9 = vld [vmem:[#allocation10 + $0x178] sm:$0xff]  ;;  %v399_v14 = vld [vmem:[#allocation10 + $0x160] sm:$0xff]  ;;  %v65_v16 = vld [vmem:[#allocation5 + $0x28] sm:$0xff]  ;;  %v2702_v17 = vpack.c.bf16 %v400_v6, %v396_v5 }
  0x4a   :  { %1838 = vmatpush1.bf16.msra.mxu0 %v2678_v56  ;;  %1870 = vmatpush1.bf16.msra.mxu1 %v2682_v60  ;;  %v397_v18 = vld [vmem:[#allocation10 + $0x150] sm:$0xff]  ;;  %v2706_v21 = vpack.c.bf16 %v402_v9, %v398_v8  ;;  %v404_v22 = vld [vmem:[#allocation10 + $0x188] sm:$0xff]  ;;  %v2710_v26 = vpack.c.bf16 %v399_v14, %v395_v13  ;;  %v406_v27 = vld [vmem:[#allocation10 + $0x198] sm:$0xff] }
  0x4b   :  { %1811 = vmatmul.mubr.msk.f32.gmra.mrb[8].mxu0 %vm72_vm0, %v64_v63  ;;  %1819 = vmatmul.mubr.msk.f32.gmra.mrb[8].mxu1 %vm72_vm0, %v64_v63  ;;  %v401_v20 = vld [vmem:[#allocation10 + $0x170] sm:$0xff]  ;;  %v408_v25 = vld [vmem:[#allocation10 + $0x1a8] sm:$0xff]  ;;  %v410_v29 = vld [vmem:[#allocation10 + $0x1b8] sm:$0xff] }
  0x4c   :  { %1840 = vmatprep.subr.bf16.mxu0 %v2686_v1  ;;  %1872 = vmatprep.subr.bf16.mxu1 %v2690_v4  ;;  %v2714_v30 = vpack.c.bf16 %v401_v20, %v397_v18  ;;  %v403_v31 = vld [vmem:[#allocation10 + $0x180] sm:$0xff]  ;;  %v66_v34 = vld [vmem:[#allocation5 + $0x30] sm:$0xff]  ;;  %v2718_v35 = vpack.c.bf16 %v408_v25, %v404_v22  ;;  %v2722_v40 = vpack.c.bf16 %v410_v29, %v406_v27  ;;  %v412_v42 = vld [vmem:[#allocation10 + $0x1c8] sm:$0xff] }
  0x4d   :  { %191 = vmatprep.mubr.f32.mxu0 %v2557_v0  ;;  %304 = vmatprep.mubr.f32.mxu1 %v2557_v0  ;;  %v407_v33 = vld [vmem:[#allocation10 + $0x1a0] sm:$0xff]  ;;  %v405_v38 = vld [vmem:[#allocation10 + $0x190] sm:$0xff]  ;;  %v416_v43 = vld [vmem:[#allocation10 + $0x1e8] sm:$0xff] }
  0x4e   :  { %1842 = vmatpush1.bf16.msra.mxu0 %v2694_v7  ;;  %1874 = vmatpush1.bf16.msra.mxu1 %v2698_v12  ;;  %v409_v39 = vld [vmem:[#allocation10 + $0x1b0] sm:$0xff]  ;;  %v2726_v44 = vpack.c.bf16 %v407_v33, %v403_v31  ;;  %v414_v46 = vld [vmem:[#allocation10 + $0x1d8] sm:$0xff]  ;;  %v411_v50 = vld [vmem:[#allocation10 + $0x1c0] sm:$0xff]  ;;  %v2734_v54 = vpack.c.bf16 %v416_v43, %v412_v42 }
  0x4f   :  { %1812 = vmatmul.mubr.msk.f32.gmra.mrb[10].mxu0 %vm72_vm0, %v65_v16  ;;  %1820 = vmatmul.mubr.msk.f32.gmra.mrb[10].mxu1 %vm72_vm0, %v65_v16  ;;  %v418_v47 = vld [vmem:[#allocation10 + $0x1f8] sm:$0xff]  ;;  %v2730_v48 = vpack.c.bf16 %v409_v39, %v405_v38  ;;  %v415_v51 = vld [vmem:[#allocation10 + $0x1e0] sm:$0xff]  ;;  %v413_v55 = vld [vmem:[#allocation10 + $0x1d0] sm:$0xff] }
  0x50   :  { %1844 = vmatprep.subr.bf16.mxu0 %v2702_v17  ;;  %1876 = vmatprep.subr.bf16.mxu1 %v2706_v21  ;;  %v67_v52 = vld [vmem:[#allocation5 + $0x38] sm:$0xff]  ;;  %v417_v57 = vld [vmem:[#allocation10 + $0x1f0] sm:$0xff]  ;;  %v2738_v58 = vpack.c.bf16 %v418_v47, %v414_v46  ;;  %v2742_v59 = vpack.c.bf16 %v415_v51, %v411_v50 }
  0x51   :  { %197 = vmatprep.mubr.f32.mxu0 %v2557_v0  ;;  %310 = vmatprep.mubr.f32.mxu1 %v2557_v0  ;;  %v2746_v61 = vpack.c.bf16 %v417_v57, %v413_v55 }
  0x52   :  { %1846 = vmatpush1.bf16.msra.mxu0 %v2710_v26  ;;  %1878 = vmatpush1.bf16.msra.mxu1 %v2714_v30 }
  0x53   :  { %1813 = vmatmul.mubr.msk.f32.gmra.mrb[12].mxu0 %vm72_vm0, %v66_v34  ;;  %1821 = vmatmul.mubr.msk.f32.gmra.mrb[12].mxu1 %vm72_vm0, %v66_v34 }
  0x54   :  { %1848 = vmatprep.subr.bf16.mxu0 %v2718_v35  ;;  %1880 = vmatprep.subr.bf16.mxu1 %v2722_v40 }
  0x55   :  { %203 = vmatprep.mubr.f32.mxu0 %v2557_v0  ;;  %316 = vmatprep.mubr.f32.mxu1 %v2557_v0 }
  0x56   :  { %1850 = vmatpush1.bf16.msra.mxu0 %v2726_v44  ;;  %1882 = vmatpush1.bf16.msra.mxu1 %v2730_v48 }
  0x57   :  { %1814 = vmatmul.mubr.msk.f32.gmra.mrb[14].mxu0 %vm72_vm0, %v67_v52  ;;  %1822 = vmatmul.mubr.msk.f32.gmra.mrb[14].mxu1 %vm72_vm0, %v67_v52 }
  0x58   :  { %1852 = vmatprep.subr.bf16.mxu0 %v2734_v54  ;;  %1884 = vmatprep.subr.bf16.mxu1 %v2738_v58 }
  0x59   :  { %489 = vmatprep.mubr.f32.mxu0 %v2557_v0  ;;  %560 = vmatprep.mubr.f32.mxu1 %v2557_v0 }
  0x5a   :  { %1854 = vmatpush1.bf16.msra.mxu0 %v2742_v59  ;;  %1886 = vmatpush1.bf16.msra.mxu1 %v2746_v61 }
  0x5b   :  { %1888 = vmatprep.subr.bf16.mxu0 %v2629_v10  ;;  %1920 = vmatprep.subr.bf16.mxu1 %v2631_v11 }
  0x5d   :  { %490 = vmatmul.mubr.f32.vlgmr.msra.gmra.mrb[0].mxu0 %v2557_v0  ;;  %561 = vmatmul.mubr.f32.vlgmr.msra.gmra.mrb[0].mxu1 %v2557_v0 }
  0x5e   :  { %1890 = vmatpush1.bf16.msra.mxu0 %v2633_v15  ;;  %1922 = vmatpush1.bf16.msra.mxu1 %v2639_v19 }
  0x5f   :  { %1892 = vmatprep.subr.bf16.mxu0 %v2642_v23  ;;  %1924 = vmatprep.subr.bf16.mxu1 %v2644_v24 }
  0x60   :  { %659 = vmatprep.mubr.f32.mxu0 %v2557_v0  ;;  %730 = vmatprep.mubr.f32.mxu1 %v2557_v0 }
  0x62   :  { %1894 = vmatpush1.bf16.msra.mxu0 %v2648_v28  ;;  %1926 = vmatpush1.bf16.msra.mxu1 %v2652_v32 }
  0x63   :  { %1896 = vmatprep.subr.bf16.mxu0 %v2656_v36  ;;  %1928 = vmatprep.subr.bf16.mxu1 %v2658_v37 }
  0x66   :  { %1898 = vmatpush1.bf16.msra.mxu0 %v2662_v41  ;;  %1930 = vmatpush1.bf16.msra.mxu1 %v2666_v45 }
  0x67   :  { %1900 = vmatprep.subr.bf16.mxu0 %v2670_v49  ;;  %1932 = vmatprep.subr.bf16.mxu1 %v2674_v53 }
  0x6a   :  { %1902 = vmatpush1.bf16.msra.mxu0 %v2678_v56  ;;  %1934 = vmatpush1.bf16.msra.mxu1 %v2682_v60 }
  0x6b   :  { %1904 = vmatprep.subr.bf16.mxu0 %v2686_v1  ;;  %1936 = vmatprep.subr.bf16.mxu1 %v2690_v4 }
  0x6e   :  { %1906 = vmatpush1.bf16.msra.mxu0 %v2694_v7  ;;  %1938 = vmatpush1.bf16.msra.mxu1 %v2698_v12 }
  0x6f   :  { %1908 = vmatprep.subr.bf16.mxu0 %v2702_v17  ;;  %1940 = vmatprep.subr.bf16.mxu1 %v2706_v21 }
  0x72   :  { %1910 = vmatpush1.bf16.msra.mxu0 %v2710_v26  ;;  %1942 = vmatpush1.bf16.msra.mxu1 %v2714_v30 }
  0x73   :  { %1912 = vmatprep.subr.bf16.mxu0 %v2718_v35  ;;  %1944 = vmatprep.subr.bf16.mxu1 %v2722_v40 }
  0x76   :  { %1914 = vmatpush1.bf16.msra.mxu0 %v2726_v44  ;;  %1946 = vmatpush1.bf16.msra.mxu1 %v2730_v48 }
  0x77   :  { %1916 = vmatprep.subr.bf16.mxu0 %v2734_v54  ;;  %1948 = vmatprep.subr.bf16.mxu1 %v2738_v58 }
  0x7a   :  { %1918 = vmatpush1.bf16.msra.mxu0 %v2742_v59  ;;  %1950 = vmatpush1.bf16.msra.mxu1 %v2746_v61 }
  0x7b   :  { %1952 = vmatprep.subr.bf16.mxu0 %v2629_v10  ;;  %1984 = vmatprep.subr.bf16.mxu1 %v2631_v11 }
 0x130   :  { %v491_v62 = vpop.f32.mrb[0].mxu0  ;;  %v562_v2 = vpop.f32.mrb[0].mxu1 }
 0x131   :  { %v571_v63 = vmul.f32 0.5, %v491_v62  ;;  %v493_v3 = vpop.f32.mrb[1].mxu0  ;;  %v564_v6 = vpop.f32.mrb[1].mxu1 }
 0x132   :  { %v575_v5 = vmul.f32 0.5, %v493_v3  ;;  %v580_v8 = vmul.f32 0.5, %v564_v6 }
 0x133   :  { %2376 = vtanh.f32 %v571_v63 }
 0x134   :  { %2378 = vtanh.f32 %v575_v5 }
 0x135   :  { %2380 = vtanh.f32 %v562_v2 }
 0x136   :  { %2382 = vtanh.f32 %v580_v8 }
 0x13d   :  { %v2377_v9 = vpop.eup %2376 }
 0x13e   :  { %v2379_v13 = vpop.eup %2378  ;;  %v573_v14 = vmul.f32 0.5, %v2377_v9 }
 0x13f   :  { %v577_v16 = vmul.f32 0.5, %v2379_v13  ;;  %v2381_v20 = vpop.eup %2380 }
 0x140   :  { %v574_v18 = vadd.f32 0.5, %v573_v14  ;;  %v2383_v31 = vpop.eup %2382 }
 0x141   :  { %v578_v22 = vadd.f32 0.5, %v577_v16  ;;  %v582_v33 = vmul.f32 0.5, %v2383_v31 }
 0x142   :  { %v585_v25 = vmul.f32 %v2381_v20, %v574_v18 }
 0x143   :  { %v584_v27 = vmul.f32 0.0, %v578_v22  ;;  %v583_v34 = vadd.f32 0.5, %v582_v33 }
 0x145   :  { %v2793_v29 = vadd.f32 %v585_v25, %v584_v27 }
 0x147   :  { %2384 = vtanh.f32 %v2793_v29 }
 0x151   :  { %v2385_v38 = vpop.eup %2384 }
 0x152   :  { %v588_v39 = vmul.f32 %v2385_v38, %v583_v34 }
 0x154   :  { %589 = vst [vmem:[#allocation11] sm:$0xff] %v588_v39  ;;  %660 = vmatmul.mubr.f32.vlgmr.msra.gmra.mrb[2].mxu0 %v588_v39  ;;  %731 = vmatmul.mubr.f32.vlgmr.msra.gmra.mrb[2].mxu1 %v588_v39 }
 0x155   :  { %1954 = vmatpush1.bf16.msra.mxu0 %v2633_v15  ;;  %1986 = vmatpush1.bf16.msra.mxu1 %v2639_v19 }
 0x156   :  { %1956 = vmatprep.subr.bf16.mxu0 %v2642_v23  ;;  %1988 = vmatprep.subr.bf16.mxu1 %v2644_v24 }
 0x157   :  { %830 = vmatprep.mubr.f32.mxu0 %v2557_v0  ;;  %901 = vmatprep.mubr.f32.mxu1 %v2557_v0 }
 0x159   :  { %1958 = vmatpush1.bf16.msra.mxu0 %v2648_v28  ;;  %1990 = vmatpush1.bf16.msra.mxu1 %v2652_v32 }
 0x15a   :  { %1960 = vmatprep.subr.bf16.mxu0 %v2656_v36  ;;  %1992 = vmatprep.subr.bf16.mxu1 %v2658_v37 }
 0x15d   :  { %1962 = vmatpush1.bf16.msra.mxu0 %v2662_v41  ;;  %1994 = vmatpush1.bf16.msra.mxu1 %v2666_v45 }
 0x15e   :  { %1964 = vmatprep.subr.bf16.mxu0 %v2670_v49  ;;  %1996 = vmatprep.subr.bf16.mxu1 %v2674_v53 }
 0x161   :  { %1966 = vmatpush1.bf16.msra.mxu0 %v2678_v56  ;;  %1998 = vmatpush1.bf16.msra.mxu1 %v2682_v60 }
 0x162   :  { %1968 = vmatprep.subr.bf16.mxu0 %v2686_v1  ;;  %2000 = vmatprep.subr.bf16.mxu1 %v2690_v4 }
 0x165   :  { %1970 = vmatpush1.bf16.msra.mxu0 %v2694_v7  ;;  %2002 = vmatpush1.bf16.msra.mxu1 %v2698_v12 }
 0x166   :  { %1972 = vmatprep.subr.bf16.mxu0 %v2702_v17  ;;  %2004 = vmatprep.subr.bf16.mxu1 %v2706_v21 }
 0x169   :  { %1974 = vmatpush1.bf16.msra.mxu0 %v2710_v26  ;;  %2006 = vmatpush1.bf16.msra.mxu1 %v2714_v30 }
 0x16a   :  { %1976 = vmatprep.subr.bf16.mxu0 %v2718_v35  ;;  %2008 = vmatprep.subr.bf16.mxu1 %v2722_v40 }
 0x16d   :  { %1978 = vmatpush1.bf16.msra.mxu0 %v2726_v44  ;;  %2010 = vmatpush1.bf16.msra.mxu1 %v2730_v48 }
 0x16e   :  { %1980 = vmatprep.subr.bf16.mxu0 %v2734_v54  ;;  %2012 = vmatprep.subr.bf16.mxu1 %v2738_v58 }
 0x171   :  { %1982 = vmatpush1.bf16.msra.mxu0 %v2742_v59  ;;  %2014 = vmatpush1.bf16.msra.mxu1 %v2746_v61 }
 0x172   :  { %2016 = vmatprep.subr.bf16.mxu0 %v2629_v10  ;;  %2048 = vmatprep.subr.bf16.mxu1 %v2631_v11 }
 0x227   :  { %v661_v42 = vpop.f32.mrb[2].mxu0  ;;  %v732_v43 = vpop.f32.mrb[2].mxu1 }
 0x228   :  { %v741_v46 = vmul.f32 0.5, %v661_v42  ;;  %v663_v47 = vpop.f32.mrb[3].mxu0  ;;  %v734_v50 = vpop.f32.mrb[3].mxu1 }
 0x229   :  { %v745_v51 = vmul.f32 0.5, %v663_v47  ;;  %v750_v52 = vmul.f32 0.5, %v734_v50 }
 0x22a   :  { %2386 = vtanh.f32 %v741_v46 }
 0x22b   :  { %2388 = vtanh.f32 %v745_v51 }
 0x22c   :  { %2390 = vtanh.f32 %v732_v43 }
 0x22d   :  { %2392 = vtanh.f32 %v750_v52 }
 0x234   :  { %v2387_v55 = vpop.eup %2386 }
 0x235   :  { %v2389_v57 = vpop.eup %2388  ;;  %v743_v62 = vmul.f32 0.5, %v2387_v55 }
 0x236   :  { %v747_v63 = vmul.f32 0.5, %v2389_v57  ;;  %v2391_v3 = vpop.eup %2390 }
 0x237   :  { %v744_v2 = vadd.f32 0.5, %v743_v62  ;;  %v2393_v13 = vpop.eup %2392 }
 0x238   :  { %v748_v5 = vadd.f32 0.5, %v747_v63  ;;  %v752_v14 = vmul.f32 0.5, %v2393_v13 }
 0x239   :  { %v755_v6 = vmul.f32 %v2391_v3, %v744_v2 }
 0x23a   :  { %v754_v8 = vmul.f32 %v748_v5, %v2793_v29  ;;  %v753_v16 = vadd.f32 0.5, %v752_v14 }
 0x23c   :  { %v2831_v9 = vadd.f32 %v755_v6, %v754_v8 }
 0x23e   :  { %2394 = vtanh.f32 %v2831_v9 }
 0x248   :  { %v2395_v18 = vpop.eup %2394 }
 0x249   :  { %v758_v20 = vmul.f32 %v2395_v18, %v753_v16 }
 0x24b   :  { %760 = vst [vmem:[#allocation11 + $0x8] sm:$0xff] %v758_v20  ;;  %831 = vmatmul.mubr.f32.vlgmr.msra.gmra.mrb[4].mxu0 %v758_v20  ;;  %902 = vmatmul.mubr.f32.vlgmr.msra.gmra.mrb[4].mxu1 %v758_v20 }
 0x24c   :  { %2018 = vmatpush1.bf16.msra.mxu0 %v2633_v15  ;;  %2050 = vmatpush1.bf16.msra.mxu1 %v2639_v19 }
 0x24d   :  { %2020 = vmatprep.subr.bf16.mxu0 %v2642_v23  ;;  %2052 = vmatprep.subr.bf16.mxu1 %v2644_v24 }
 0x24e   :  { %1001 = vmatprep.mubr.f32.mxu0 %v2557_v0  ;;  %1072 = vmatprep.mubr.f32.mxu1 %v2557_v0 }
 0x250   :  { %2022 = vmatpush1.bf16.msra.mxu0 %v2648_v28  ;;  %2054 = vmatpush1.bf16.msra.mxu1 %v2652_v32 }
 0x251   :  { %2024 = vmatprep.subr.bf16.mxu0 %v2656_v36  ;;  %2056 = vmatprep.subr.bf16.mxu1 %v2658_v37 }
 0x254   :  { %2026 = vmatpush1.bf16.msra.mxu0 %v2662_v41  ;;  %2058 = vmatpush1.bf16.msra.mxu1 %v2666_v45 }
 0x255   :  { %2028 = vmatprep.subr.bf16.mxu0 %v2670_v49  ;;  %2060 = vmatprep.subr.bf16.mxu1 %v2674_v53 }
 0x258   :  { %2030 = vmatpush1.bf16.msra.mxu0 %v2678_v56  ;;  %2062 = vmatpush1.bf16.msra.mxu1 %v2682_v60 }
 0x259   :  { %2032 = vmatprep.subr.bf16.mxu0 %v2686_v1  ;;  %2064 = vmatprep.subr.bf16.mxu1 %v2690_v4 }
 0x25c   :  { %2034 = vmatpush1.bf16.msra.mxu0 %v2694_v7  ;;  %2066 = vmatpush1.bf16.msra.mxu1 %v2698_v12 }
 0x25d   :  { %2036 = vmatprep.subr.bf16.mxu0 %v2702_v17  ;;  %2068 = vmatprep.subr.bf16.mxu1 %v2706_v21 }
 0x260   :  { %2038 = vmatpush1.bf16.msra.mxu0 %v2710_v26  ;;  %2070 = vmatpush1.bf16.msra.mxu1 %v2714_v30 }
 0x261   :  { %2040 = vmatprep.subr.bf16.mxu0 %v2718_v35  ;;  %2072 = vmatprep.subr.bf16.mxu1 %v2722_v40 }
 0x264   :  { %2042 = vmatpush1.bf16.msra.mxu0 %v2726_v44  ;;  %2074 = vmatpush1.bf16.msra.mxu1 %v2730_v48 }
 0x265   :  { %2044 = vmatprep.subr.bf16.mxu0 %v2734_v54  ;;  %2076 = vmatprep.subr.bf16.mxu1 %v2738_v58 }
 0x268   :  { %2046 = vmatpush1.bf16.msra.mxu0 %v2742_v59  ;;  %2078 = vmatpush1.bf16.msra.mxu1 %v2746_v61 }
 0x269   :  { %2080 = vmatprep.subr.bf16.mxu0 %v2629_v10  ;;  %2112 = vmatprep.subr.bf16.mxu1 %v2631_v11 }
 0x31e   :  { %v832_v22 = vpop.f32.mrb[4].mxu0  ;;  %v903_v25 = vpop.f32.mrb[4].mxu1 }
 0x31f   :  { %v912_v27 = vmul.f32 0.5, %v832_v22  ;;  %v834_v29 = vpop.f32.mrb[5].mxu0  ;;  %v905_v31 = vpop.f32.mrb[5].mxu1 }
 0x320   :  { %v916_v33 = vmul.f32 0.5, %v834_v29  ;;  %v921_v34 = vmul.f32 0.5, %v905_v31 }
 0x321   :  { %2396 = vtanh.f32 %v912_v27 }
 0x322   :  { %2398 = vtanh.f32 %v916_v33 }
 0x323   :  { %2400 = vtanh.f32 %v903_v25 }
 0x324   :  { %2402 = vtanh.f32 %v921_v34 }
 0x32b   :  { %v2397_v38 = vpop.eup %2396 }
 0x32c   :  { %v2399_v39 = vpop.eup %2398  ;;  %v914_v42 = vmul.f32 0.5, %v2397_v38 }
 0x32d   :  { %v918_v43 = vmul.f32 0.5, %v2399_v39  ;;  %v2401_v47 = vpop.eup %2400 }
 0x32e   :  { %v915_v46 = vadd.f32 0.5, %v914_v42  ;;  %v2403_v57 = vpop.eup %2402 }
 0x32f   :  { %v919_v50 = vadd.f32 0.5, %v918_v43  ;;  %v923_v62 = vmul.f32 0.5, %v2403_v57 }
 0x330   :  { %v926_v51 = vmul.f32 %v2401_v47, %v915_v46 }
 0x331   :  { %v925_v52 = vmul.f32 %v919_v50, %v2831_v9  ;;  %v924_v63 = vadd.f32 0.5, %v923_v62 }
 0x333   :  { %v2869_v55 = vadd.f32 %v926_v51, %v925_v52 }
 0x335   :  { %2404 = vtanh.f32 %v2869_v55 }
 0x33f   :  { %v2405_v2 = vpop.eup %2404 }
 0x340   :  { %v929_v3 = vmul.f32 %v2405_v2, %v924_v63 }
 0x342   :  { %931 = vst [vmem:[#allocation11 + $0x10] sm:$0xff] %v929_v3  ;;  %1002 = vmatmul.mubr.f32.vlgmr.msra.gmra.mrb[6].mxu0 %v929_v3  ;;  %1073 = vmatmul.mubr.f32.vlgmr.msra.gmra.mrb[6].mxu1 %v929_v3 }
 0x343   :  { %2082 = vmatpush1.bf16.msra.mxu0 %v2633_v15  ;;  %2114 = vmatpush1.bf16.msra.mxu1 %v2639_v19 }
 0x344   :  { %2084 = vmatprep.subr.bf16.mxu0 %v2642_v23  ;;  %2116 = vmatprep.subr.bf16.mxu1 %v2644_v24 }
 0x345   :  { %1172 = vmatprep.mubr.f32.mxu0 %v2557_v0  ;;  %1243 = vmatprep.mubr.f32.mxu1 %v2557_v0 }
 0x347   :  { %2086 = vmatpush1.bf16.msra.mxu0 %v2648_v28  ;;  %2118 = vmatpush1.bf16.msra.mxu1 %v2652_v32 }
 0x348   :  { %2088 = vmatprep.subr.bf16.mxu0 %v2656_v36  ;;  %2120 = vmatprep.subr.bf16.mxu1 %v2658_v37 }
 0x34b   :  { %2090 = vmatpush1.bf16.msra.mxu0 %v2662_v41  ;;  %2122 = vmatpush1.bf16.msra.mxu1 %v2666_v45 }
 0x34c   :  { %2092 = vmatprep.subr.bf16.mxu0 %v2670_v49  ;;  %2124 = vmatprep.subr.bf16.mxu1 %v2674_v53 }
 0x34f   :  { %2094 = vmatpush1.bf16.msra.mxu0 %v2678_v56  ;;  %2126 = vmatpush1.bf16.msra.mxu1 %v2682_v60 }
 0x350   :  { %2096 = vmatprep.subr.bf16.mxu0 %v2686_v1  ;;  %2128 = vmatprep.subr.bf16.mxu1 %v2690_v4 }
 0x353   :  { %2098 = vmatpush1.bf16.msra.mxu0 %v2694_v7  ;;  %2130 = vmatpush1.bf16.msra.mxu1 %v2698_v12 }
 0x354   :  { %2100 = vmatprep.subr.bf16.mxu0 %v2702_v17  ;;  %2132 = vmatprep.subr.bf16.mxu1 %v2706_v21 }
 0x357   :  { %2102 = vmatpush1.bf16.msra.mxu0 %v2710_v26  ;;  %2134 = vmatpush1.bf16.msra.mxu1 %v2714_v30 }
 0x358   :  { %2104 = vmatprep.subr.bf16.mxu0 %v2718_v35  ;;  %2136 = vmatprep.subr.bf16.mxu1 %v2722_v40 }
 0x35b   :  { %2106 = vmatpush1.bf16.msra.mxu0 %v2726_v44  ;;  %2138 = vmatpush1.bf16.msra.mxu1 %v2730_v48 }
 0x35c   :  { %2108 = vmatprep.subr.bf16.mxu0 %v2734_v54  ;;  %2140 = vmatprep.subr.bf16.mxu1 %v2738_v58 }
 0x35f   :  { %2110 = vmatpush1.bf16.msra.mxu0 %v2742_v59  ;;  %2142 = vmatpush1.bf16.msra.mxu1 %v2746_v61 }
 0x360   :  { %2144 = vmatprep.subr.bf16.mxu0 %v2629_v10  ;;  %2176 = vmatprep.subr.bf16.mxu1 %v2631_v11 }
 0x415   :  { %v1003_v5 = vpop.f32.mrb[6].mxu0  ;;  %v1074_v6 = vpop.f32.mrb[6].mxu1 }
 0x416   :  { %v1083_v8 = vmul.f32 0.5, %v1003_v5  ;;  %v1005_v9 = vpop.f32.mrb[7].mxu0  ;;  %v1076_v13 = vpop.f32.mrb[7].mxu1 }
 0x417   :  { %v1087_v14 = vmul.f32 0.5, %v1005_v9  ;;  %v1092_v16 = vmul.f32 0.5, %v1076_v13 }
 0x418   :  { %2406 = vtanh.f32 %v1083_v8 }
 0x419   :  { %2408 = vtanh.f32 %v1087_v14 }
 0x41a   :  { %2410 = vtanh.f32 %v1074_v6 }
 0x41b   :  { %2412 = vtanh.f32 %v1092_v16 }
 0x422   :  { %v2407_v18 = vpop.eup %2406 }
 0x423   :  { %v2409_v20 = vpop.eup %2408  ;;  %v1085_v22 = vmul.f32 0.5, %v2407_v18 }
 0x424   :  { %v1089_v25 = vmul.f32 0.5, %v2409_v20  ;;  %v2411_v29 = vpop.eup %2410 }
 0x425   :  { %v1086_v27 = vadd.f32 0.5, %v1085_v22  ;;  %v2413_v39 = vpop.eup %2412 }
 0x426   :  { %v1090_v31 = vadd.f32 0.5, %v1089_v25  ;;  %v1094_v42 = vmul.f32 0.5, %v2413_v39 }
 0x427   :  { %v1097_v33 = vmul.f32 %v2411_v29, %v1086_v27 }
 0x428   :  { %v1096_v34 = vmul.f32 %v1090_v31, %v2869_v55  ;;  %v1095_v43 = vadd.f32 0.5, %v1094_v42 }
 0x42a   :  { %v2907_v38 = vadd.f32 %v1097_v33, %v1096_v34 }
 0x42c   :  { %2414 = vtanh.f32 %v2907_v38 }
 0x436   :  { %v2415_v46 = vpop.eup %2414 }
 0x437   :  { %v1100_v47 = vmul.f32 %v2415_v46, %v1095_v43 }
 0x439   :  { %1102 = vst [vmem:[#allocation11 + $0x18] sm:$0xff] %v1100_v47  ;;  %1173 = vmatmul.mubr.f32.vlgmr.msra.gmra.mrb[8].mxu0 %v1100_v47  ;;  %1244 = vmatmul.mubr.f32.vlgmr.msra.gmra.mrb[8].mxu1 %v1100_v47 }
 0x43a   :  { %2146 = vmatpush1.bf16.msra.mxu0 %v2633_v15  ;;  %2178 = vmatpush1.bf16.msra.mxu1 %v2639_v19 }
 0x43b   :  { %2148 = vmatprep.subr.bf16.mxu0 %v2642_v23  ;;  %2180 = vmatprep.subr.bf16.mxu1 %v2644_v24 }
 0x43c   :  { %1343 = vmatprep.mubr.f32.mxu0 %v2557_v0  ;;  %1414 = vmatprep.mubr.f32.mxu1 %v2557_v0 }
 0x43e   :  { %2150 = vmatpush1.bf16.msra.mxu0 %v2648_v28  ;;  %2182 = vmatpush1.bf16.msra.mxu1 %v2652_v32 }
 0x43f   :  { %2152 = vmatprep.subr.bf16.mxu0 %v2656_v36  ;;  %2184 = vmatprep.subr.bf16.mxu1 %v2658_v37 }
 0x442   :  { %2154 = vmatpush1.bf16.msra.mxu0 %v2662_v41  ;;  %2186 = vmatpush1.bf16.msra.mxu1 %v2666_v45 }
 0x443   :  { %2156 = vmatprep.subr.bf16.mxu0 %v2670_v49  ;;  %2188 = vmatprep.subr.bf16.mxu1 %v2674_v53 }
 0x446   :  { %2158 = vmatpush1.bf16.msra.mxu0 %v2678_v56  ;;  %2190 = vmatpush1.bf16.msra.mxu1 %v2682_v60 }
 0x447   :  { %2160 = vmatprep.subr.bf16.mxu0 %v2686_v1  ;;  %2192 = vmatprep.subr.bf16.mxu1 %v2690_v4 }
 0x44a   :  { %2162 = vmatpush1.bf16.msra.mxu0 %v2694_v7  ;;  %2194 = vmatpush1.bf16.msra.mxu1 %v2698_v12 }
 0x44b   :  { %2164 = vmatprep.subr.bf16.mxu0 %v2702_v17  ;;  %2196 = vmatprep.subr.bf16.mxu1 %v2706_v21 }
 0x44e   :  { %2166 = vmatpush1.bf16.msra.mxu0 %v2710_v26  ;;  %2198 = vmatpush1.bf16.msra.mxu1 %v2714_v30 }
 0x44f   :  { %2168 = vmatprep.subr.bf16.mxu0 %v2718_v35  ;;  %2200 = vmatprep.subr.bf16.mxu1 %v2722_v40 }
 0x452   :  { %2170 = vmatpush1.bf16.msra.mxu0 %v2726_v44  ;;  %2202 = vmatpush1.bf16.msra.mxu1 %v2730_v48 }
 0x453   :  { %2172 = vmatprep.subr.bf16.mxu0 %v2734_v54  ;;  %2204 = vmatprep.subr.bf16.mxu1 %v2738_v58 }
 0x456   :  { %2174 = vmatpush1.bf16.msra.mxu0 %v2742_v59  ;;  %2206 = vmatpush1.bf16.msra.mxu1 %v2746_v61 }
 0x457   :  { %2208 = vmatprep.subr.bf16.mxu0 %v2629_v10  ;;  %2240 = vmatprep.subr.bf16.mxu1 %v2631_v11 }
 0x50c   :  { %v1174_v50 = vpop.f32.mrb[8].mxu0  ;;  %v1245_v51 = vpop.f32.mrb[8].mxu1 }
 0x50d   :  { %v1254_v52 = vmul.f32 0.5, %v1174_v50  ;;  %v1176_v55 = vpop.f32.mrb[9].mxu0  ;;  %v1247_v57 = vpop.f32.mrb[9].mxu1 }
 0x50e   :  { %v1258_v62 = vmul.f32 0.5, %v1176_v55  ;;  %v1263_v63 = vmul.f32 0.5, %v1247_v57 }
 0x50f   :  { %2416 = vtanh.f32 %v1254_v52 }
 0x510   :  { %2418 = vtanh.f32 %v1258_v62 }
 0x511   :  { %2420 = vtanh.f32 %v1245_v51 }
 0x512   :  { %2422 = vtanh.f32 %v1263_v63 }
 0x519   :  { %v2417_v2 = vpop.eup %2416 }
 0x51a   :  { %v2419_v3 = vpop.eup %2418  ;;  %v1256_v5 = vmul.f32 0.5, %v2417_v2 }
 0x51b   :  { %v1260_v6 = vmul.f32 0.5, %v2419_v3  ;;  %v2421_v9 = vpop.eup %2420 }
 0x51c   :  { %v1257_v8 = vadd.f32 0.5, %v1256_v5  ;;  %v2423_v20 = vpop.eup %2422 }
 0x51d   :  { %v1261_v13 = vadd.f32 0.5, %v1260_v6  ;;  %v1265_v22 = vmul.f32 0.5, %v2423_v20 }
 0x51e   :  { %v1268_v14 = vmul.f32 %v2421_v9, %v1257_v8 }
 0x51f   :  { %v1267_v16 = vmul.f32 %v1261_v13, %v2907_v38  ;;  %v1266_v25 = vadd.f32 0.5, %v1265_v22 }
 0x521   :  { %v2945_v18 = vadd.f32 %v1268_v14, %v1267_v16 }
 0x523   :  { %2424 = vtanh.f32 %v2945_v18 }
 0x52d   :  { %v2425_v27 = vpop.eup %2424 }
 0x52e   :  { %v1271_v29 = vmul.f32 %v2425_v27, %v1266_v25 }
 0x530   :  { %1273 = vst [vmem:[#allocation11 + $0x20] sm:$0xff] %v1271_v29  ;;  %1344 = vmatmul.mubr.f32.vlgmr.msra.gmra.mrb[10].mxu0 %v1271_v29  ;;  %1415 = vmatmul.mubr.f32.vlgmr.msra.gmra.mrb[10].mxu1 %v1271_v29 }
 0x531   :  { %2210 = vmatpush1.bf16.msra.mxu0 %v2633_v15  ;;  %2242 = vmatpush1.bf16.msra.mxu1 %v2639_v19 }
 0x532   :  { %2212 = vmatprep.subr.bf16.mxu0 %v2642_v23  ;;  %2244 = vmatprep.subr.bf16.mxu1 %v2644_v24 }
 0x533   :  { %1514 = vmatprep.mubr.f32.mxu0 %v2557_v0  ;;  %1585 = vmatprep.mubr.f32.mxu1 %v2557_v0 }
 0x535   :  { %2214 = vmatpush1.bf16.msra.mxu0 %v2648_v28  ;;  %2246 = vmatpush1.bf16.msra.mxu1 %v2652_v32 }
 0x536   :  { %2216 = vmatprep.subr.bf16.mxu0 %v2656_v36  ;;  %2248 = vmatprep.subr.bf16.mxu1 %v2658_v37 }
 0x539   :  { %2218 = vmatpush1.bf16.msra.mxu0 %v2662_v41  ;;  %2250 = vmatpush1.bf16.msra.mxu1 %v2666_v45 }
 0x53a   :  { %2220 = vmatprep.subr.bf16.mxu0 %v2670_v49  ;;  %2252 = vmatprep.subr.bf16.mxu1 %v2674_v53 }
 0x53d   :  { %2222 = vmatpush1.bf16.msra.mxu0 %v2678_v56  ;;  %2254 = vmatpush1.bf16.msra.mxu1 %v2682_v60 }
 0x53e   :  { %2224 = vmatprep.subr.bf16.mxu0 %v2686_v1  ;;  %2256 = vmatprep.subr.bf16.mxu1 %v2690_v4 }
 0x541   :  { %2226 = vmatpush1.bf16.msra.mxu0 %v2694_v7  ;;  %2258 = vmatpush1.bf16.msra.mxu1 %v2698_v12 }
 0x542   :  { %2228 = vmatprep.subr.bf16.mxu0 %v2702_v17  ;;  %2260 = vmatprep.subr.bf16.mxu1 %v2706_v21 }
 0x545   :  { %2230 = vmatpush1.bf16.msra.mxu0 %v2710_v26  ;;  %2262 = vmatpush1.bf16.msra.mxu1 %v2714_v30 }
 0x546   :  { %2232 = vmatprep.subr.bf16.mxu0 %v2718_v35  ;;  %2264 = vmatprep.subr.bf16.mxu1 %v2722_v40 }
 0x549   :  { %2234 = vmatpush1.bf16.msra.mxu0 %v2726_v44  ;;  %2266 = vmatpush1.bf16.msra.mxu1 %v2730_v48 }
 0x54a   :  { %2236 = vmatprep.subr.bf16.mxu0 %v2734_v54  ;;  %2268 = vmatprep.subr.bf16.mxu1 %v2738_v58 }
 0x54d   :  { %2238 = vmatpush1.bf16.msra.mxu0 %v2742_v59  ;;  %2270 = vmatpush1.bf16.msra.mxu1 %v2746_v61 }
 0x54e   :  { %2272 = vmatprep.subr.bf16.mxu0 %v2629_v10  ;;  %2304 = vmatprep.subr.bf16.mxu1 %v2631_v11 }
 0x603   :  { %v1345_v31 = vpop.f32.mrb[10].mxu0  ;;  %v1416_v33 = vpop.f32.mrb[10].mxu1 }
 0x604   :  { %v1425_v34 = vmul.f32 0.5, %v1345_v31  ;;  %v1347_v38 = vpop.f32.mrb[11].mxu0  ;;  %v1418_v39 = vpop.f32.mrb[11].mxu1 }
 0x605   :  { %v1429_v42 = vmul.f32 0.5, %v1347_v38  ;;  %v1434_v43 = vmul.f32 0.5, %v1418_v39 }
 0x606   :  { %2426 = vtanh.f32 %v1425_v34 }
 0x607   :  { %2428 = vtanh.f32 %v1429_v42 }
 0x608   :  { %2430 = vtanh.f32 %v1416_v33 }
 0x609   :  { %2432 = vtanh.f32 %v1434_v43 }
 0x610   :  { %v2427_v46 = vpop.eup %2426 }
 0x611   :  { %v2429_v47 = vpop.eup %2428  ;;  %v1427_v50 = vmul.f32 0.5, %v2427_v46 }
 0x612   :  { %v1431_v51 = vmul.f32 0.5, %v2429_v47  ;;  %v2431_v55 = vpop.eup %2430 }
 0x613   :  { %v1428_v52 = vadd.f32 0.5, %v1427_v50  ;;  %v2433_v63 = vpop.eup %2432 }
 0x614   :  { %v1432_v10 = vadd.f32 0.5, %v1431_v51  ;;  %v1436_v2 = vmul.f32 0.5, %v2433_v63 }
 0x615   :  { %v1439_v57 = vmul.f32 %v2431_v55, %v1428_v52 }
 0x616   :  { %v1438_v11 = vmul.f32 %v1432_v10, %v2945_v18  ;;  %v1437_v3 = vadd.f32 0.5, %v1436_v2 }
 0x618   :  { %v1440_v62 = vadd.f32 %v1439_v57, %v1438_v11 }
 0x61a   :  { %2434 = vtanh.f32 %v1440_v62 }
 0x624   :  { %v2435_v5 = vpop.eup %2434 }
 0x625   :  { %v1442_v6 = vmul.f32 %v2435_v5, %v1437_v3 }
 0x627   :  { %1444 = vst [vmem:[#allocation11 + $0x28] sm:$0xff] %v1442_v6  ;;  %1515 = vmatmul.mubr.f32.vlgmr.msra.gmra.mrb[12].mxu0 %v1442_v6  ;;  %1586 = vmatmul.mubr.f32.vlgmr.msra.gmra.mrb[12].mxu1 %v1442_v6 }
 0x628   :  { %2274 = vmatpush1.bf16.msra.mxu0 %v2633_v15  ;;  %2306 = vmatpush1.bf16.msra.mxu1 %v2639_v19 }
 0x629   :  { %2276 = vmatprep.subr.bf16.mxu0 %v2642_v23  ;;  %2308 = vmatprep.subr.bf16.mxu1 %v2644_v24 }
 0x62a   :  { %1685 = vmatprep.mubr.f32.mxu0 %v2557_v0  ;;  %1756 = vmatprep.mubr.f32.mxu1 %v2557_v0 }
 0x62c   :  { %2278 = vmatpush1.bf16.msra.mxu0 %v2648_v28  ;;  %2310 = vmatpush1.bf16.msra.mxu1 %v2652_v32 }
 0x62d   :  { %2280 = vmatprep.subr.bf16.mxu0 %v2656_v36  ;;  %2312 = vmatprep.subr.bf16.mxu1 %v2658_v37 }
 0x630   :  { %2282 = vmatpush1.bf16.msra.mxu0 %v2662_v41  ;;  %2314 = vmatpush1.bf16.msra.mxu1 %v2666_v45 }
 0x631   :  { %2284 = vmatprep.subr.bf16.mxu0 %v2670_v49  ;;  %2316 = vmatprep.subr.bf16.mxu1 %v2674_v53 }
 0x634   :  { %2286 = vmatpush1.bf16.msra.mxu0 %v2678_v56  ;;  %2318 = vmatpush1.bf16.msra.mxu1 %v2682_v60 }
 0x635   :  { %2288 = vmatprep.subr.bf16.mxu0 %v2686_v1  ;;  %2320 = vmatprep.subr.bf16.mxu1 %v2690_v4 }
 0x638   :  { %2290 = vmatpush1.bf16.msra.mxu0 %v2694_v7  ;;  %2322 = vmatpush1.bf16.msra.mxu1 %v2698_v12 }
 0x639   :  { %2292 = vmatprep.subr.bf16.mxu0 %v2702_v17  ;;  %2324 = vmatprep.subr.bf16.mxu1 %v2706_v21 }
 0x63c   :  { %2294 = vmatpush1.bf16.msra.mxu0 %v2710_v26  ;;  %2326 = vmatpush1.bf16.msra.mxu1 %v2714_v30 }
 0x63d   :  { %2296 = vmatprep.subr.bf16.mxu0 %v2718_v35  ;;  %2328 = vmatprep.subr.bf16.mxu1 %v2722_v40 }
 0x640   :  { %2298 = vmatpush1.bf16.msra.mxu0 %v2726_v44  ;;  %2330 = vmatpush1.bf16.msra.mxu1 %v2730_v48 }
 0x641   :  { %2300 = vmatprep.subr.bf16.mxu0 %v2734_v54  ;;  %2332 = vmatprep.subr.bf16.mxu1 %v2738_v58 }
 0x644   :  { %2302 = vmatpush1.bf16.msra.mxu0 %v2742_v59  ;;  %2334 = vmatpush1.bf16.msra.mxu1 %v2746_v61 }
 0x6fa   :  { %v1516_v0 = vpop.f32.mrb[12].mxu0  ;;  %v1587_v15 = vpop.f32.mrb[12].mxu1 }
 0x6fb   :  { %v1596_v19 = vmul.f32 0.5, %v1516_v0  ;;  %v1518_v23 = vpop.f32.mrb[13].mxu0  ;;  %v1589_v24 = vpop.f32.mrb[13].mxu1 }
 0x6fc   :  { %v1600_v28 = vmul.f32 0.5, %v1518_v23  ;;  %v1605_v32 = vmul.f32 0.5, %v1589_v24 }
 0x6fd   :  { %2436 = vtanh.f32 %v1596_v19 }
 0x6fe   :  { %2438 = vtanh.f32 %v1600_v28 }
 0x6ff   :  { %2440 = vtanh.f32 %v1587_v15 }
 0x700   :  { %2442 = vtanh.f32 %v1605_v32 }
 0x707   :  { %v2437_v36 = vpop.eup %2436 }
 0x708   :  { %v2439_v37 = vpop.eup %2438  ;;  %v1598_v41 = vmul.f32 0.5, %v2437_v36 }
 0x709   :  { %v1602_v45 = vmul.f32 0.5, %v2439_v37  ;;  %v2441_v53 = vpop.eup %2440 }
 0x70a   :  { %v1599_v49 = vadd.f32 0.5, %v1598_v41  ;;  %v2443_v7 = vpop.eup %2442 }
 0x70b   :  { %v1603_v56 = vadd.f32 0.5, %v1602_v45  ;;  %v1607_v12 = vmul.f32 0.5, %v2443_v7 }
 0x70c   :  { %v1610_v60 = vmul.f32 %v2441_v53, %v1599_v49 }
 0x70d   :  { %v1609_v1 = vmul.f32 %v1603_v56, %v1440_v62  ;;  %v1608_v17 = vadd.f32 0.5, %v1607_v12 }
 0x70f   :  { %v1611_v4 = vadd.f32 %v1610_v60, %v1609_v1 }
 0x711   :  { %2444 = vtanh.f32 %v1611_v4 }
 0x71b   :  { %v2445_v21 = vpop.eup %2444 }
 0x71c   :  { %v1613_v26 = vmul.f32 %v2445_v21, %v1608_v17 }
 0x71e   :  { %1615 = vst [vmem:[#allocation11 + $0x30] sm:$0xff] %v1613_v26  ;;  %1686 = vmatmul.mubr.f32.vlgmr.msra.gmra.mrb[14].mxu0 %v1613_v26  ;;  %1757 = vmatmul.mubr.f32.vlgmr.msra.gmra.mrb[14].mxu1 %v1613_v26 }
 0x7f1   :  { %v1687_v30 = vpop.f32.mrb[14].mxu0  ;;  %v1758_v35 = vpop.f32.mrb[14].mxu1 }
 0x7f2   :  { %v1767_v40 = vmul.f32 0.5, %v1687_v30  ;;  %v1689_v44 = vpop.f32.mrb[15].mxu0  ;;  %v1760_v48 = vpop.f32.mrb[15].mxu1 }
 0x7f3   :  { %v1771_v54 = vmul.f32 0.5, %v1689_v44  ;;  %v1776_v58 = vmul.f32 0.5, %v1760_v48 }
 0x7f4   :  { %2446 = vtanh.f32 %v1767_v40 }
 0x7f5   :  { %2448 = vtanh.f32 %v1771_v54 }
 0x7f6   :  { %2450 = vtanh.f32 %v1758_v35 }
 0x7f7   :  { %2452 = vtanh.f32 %v1776_v58 }
 0x7fe   :  { %v2447_v59 = vpop.eup %2446 }
 0x7ff   :  { %v2449_v61 = vpop.eup %2448  ;;  %v1769_v8 = vmul.f32 0.5, %v2447_v59 }
 0x800   :  { %v1773_v9 = vmul.f32 0.5, %v2449_v61  ;;  %v2451_v14 = vpop.eup %2450 }
 0x801   :  { %v1770_v13 = vadd.f32 0.5, %v1769_v8  ;;  %v2453_v25 = vpop.eup %2452 }
 0x802   :  { %v1774_v16 = vadd.f32 0.5, %v1773_v9  ;;  %v1778_v27 = vmul.f32 0.5, %v2453_v25 }
 0x803   :  { %v1781_v18 = vmul.f32 %v2451_v14, %v1770_v13 }
 0x804   :  { %v1780_v20 = vmul.f32 %v1774_v16, %v1611_v4  ;;  %v1779_v29 = vadd.f32 0.5, %v1778_v27 }
 0x806   :  { %v1782_v22 = vadd.f32 %v1781_v18, %v1780_v20 }
 0x808   :  { %2454 = vtanh.f32 %v1782_v22 }
 0x812   :  { %v2455_v31 = vpop.eup %2454 }
 0x813   :  { %v1784_v33 = vmul.f32 %v2455_v31, %v1779_v29 }
 0x815   :  { %1786 = vst [vmem:[#allocation11 + $0x38] sm:$0xff] %v1784_v33 }
 0x816   :  { %2533 = shalt.err (!%p2530_p0)
}
 0x817   :  { %s2534_s27 = scalar_lea.hbm %s3033_s3, 1024 }
 0x818   :  { %p2535_p1 = scmp.ne.s32.totalorder %s3033_s3, %s2534_s27  ;;  %p2538_p2 = scmp.lt.u32.totalorder %s2534_s27, %s3033_s3 }
 0x81a   :  { %p2540_p3 = pnand %p2538_p2, %p2535_p1 }
 0x81c   :  { %2543 = shalt.err (!%p2540_p3)
}
 0x81d   :  { %1800 = dma.vmem_to_hbm [thread:$0]  %s1795_s23, 1024, %s3033_s3, [#allocation7], %s2552_s1, %s2552_s1, %s2553_s7  }
 0x81e   :  { %2548 = dma.done.wait [#allocation7], 1024  }
 0x81f   :  { %2549 = vsyncadd [#allocation7], 4294966272 }
 0x820   :  { %1804 = vsyncpa [#allocation6], 1 }
 0x821   :  { %1805 = vsyncpa [#allocation9], 1 }
 0x822   :  { %1806 = vsyncpa [#allocation7], 1 }

// kernel: tpu_custom_call.1
= control target key start
LH: loop header
LB: loop body
LE: loop exit
PB: predicated region body
PF: predicated region fallthrough
CT: control target
= control target key end

     0   :  { %8 = vsyncpa [#allocation6], 0  ;;  %s3030_s0 = inlined_call_operand.hbm [shape: f32[8,8,8], index: 0, kind: input, shape index: {}]   ;;  %s3031_s1 = inlined_call_operand.hbm [shape: f32[8,512], index: 1, kind: input, shape index: {}]   ;;  %s3032_s2 = inlined_call_operand.hbm [shape: f32[128,512], index: 2, kind: input, shape index: {}]   ;;  %s3033_s3 = inlined_call_operand.hbm [shape: f32[8,8,128], index: 3, kind: output, shape index: {}]  }
   0x1   :  { %9 = vsyncpa [#allocation9], 0 }
   0x2   :  { %10 = vsyncpa [#allocation7], 0  ;;  %s2550_s12 = smov [#allocation8]   ;;  %s2551_s14 = smov [#allocation5]  }
   0x3   :  { %s29_s13 = sshll.u32 %s2550_s12, 4  ;;  %s16_s15 = sshll.u32 %s2551_s14, 4  ;;  %s30_s13 = int_to_ptr.vmem [resolvable:$true] %s29_s13  ;;  %s2579_s15 = int_to_ptr.vmem [resolvable:$true] %s16_s15 }
   0x4   :  { %s2456_s18 = scalar_lea.hbm %s3031_s1, 512 }
   0x5   :  { %p2457_p0 = scmp.ne.s32.totalorder %s3031_s1, %s2456_s18  ;;  %p2460_p1 = scmp.lt.u32.totalorder %s2456_s18, %s3031_s1 }
   0x7   :  { %p2462_p2 = pnand %p2460_p1, %p2457_p0 }
   0x9   :  { %2465 = shalt.err (!%p2462_p2)
}
   0xa   :  { %s2466_s23 = scalar_lea.vmem %s30_s13, 512  ;;  %p2471_p4 = scmp.lt.s32.totalorder %s30_s13, %s30_s13 }
   0xb   :  { %p2467_p3 = scmp.ne.s32.totalorder %s30_s13, %s2466_s23  ;;  %p2472_p5 = scmp.lt.s32.totalorder %s2466_s23, %s2466_s23 }
   0xd   :  { %p2473_p6 = por %p2472_p5, %p2471_p4 }
   0xf   :  { %p2474_p7 = pnand %p2473_p6, %p2467_p3 }
  0x11   :  { %2477 = shalt.err (!%p2474_p7)
}
  0x12   :  { %32 = dma.hbm_to_vmem [thread:$0]  %s3031_s1, 512, %s30_s13, [#allocation9]  }
  0x13   :  { %s2478_s28 = scalar_lea.hbm %s3030_s0, 1024 }
  0x14   :  { %p2479_p8 = scmp.ne.s32.totalorder %s3030_s0, %s2478_s28  ;;  %p2482_p9 = scmp.lt.u32.totalorder %s2478_s28, %s3030_s0 }
  0x16   :  { %p2484_p10 = pnand %p2482_p9, %p2479_p8 }
  0x18   :  { %2487 = shalt.err (!%p2484_p10)
}
  0x19   :  { %s2488_s6 = scalar_lea.vmem %s2579_s15, 1024  ;;  %p2493_p12 = scmp.lt.s32.totalorder %s2579_s15, %s2579_s15 }
  0x1a   :  { %p2489_p11 = scmp.ne.s32.totalorder %s2579_s15, %s2488_s6  ;;  %p2494_p13 = scmp.lt.s32.totalorder %s2488_s6, %s2488_s6 }
  0x1c   :  { %p2495_p0 = por %p2494_p13, %p2493_p12 }
  0x1e   :  { %p2496_p1 = pnand %p2495_p0, %p2489_p11 }
  0x20   :  { %2499 = shalt.err (!%p2496_p1)
}
  0x21   :  { %s2552_s1 = smov 128   ;;  %s2553_s7 = smov 8  }
  0x22   :  { %22 = dma.hbm_to_vmem [thread:$0]  %s3030_s0, 1024, %s2579_s15, [#allocation6], %s2552_s1, %s2552_s1, %s2553_s7  }
  0x23   :  { %s2554_s10 = smov [#allocation10]   ;;  %s2500_s14 = scalar_lea.hbm %s3032_s2, 8192 }
  0x24   :  { %s38_s11 = sshll.u32 %s2554_s10, 4  ;;  %p2501_p2 = scmp.ne.s32.totalorder %s3032_s2, %s2500_s14  ;;  %s39_s11 = int_to_ptr.vmem [resolvable:$true] %s38_s11 }
  0x25   :  { %p2504_p3 = scmp.lt.u32.totalorder %s2500_s14, %s3032_s2 }
  0x27   :  { %p2506_p4 = pnand %p2504_p3, %p2501_p2 }
  0x29   :  { %2509 = shalt.err (!%p2506_p4)
}
  0x2a   :  { %s2510_s20 = scalar_lea.vmem %s39_s11, 8192  ;;  %p2515_p6 = scmp.lt.s32.totalorder %s39_s11, %s39_s11 }
  0x2b   :  { %p2511_p5 = scmp.ne.s32.totalorder %s39_s11, %s2510_s20  ;;  %p2516_p7 = scmp.lt.s32.totalorder %s2510_s20, %s2510_s20 }
  0x2d   :  { %p2517_p8 = por %p2516_p7, %p2515_p6 }
  0x2f   :  { %p2518_p9 = pnand %p2517_p8, %p2511_p5 }
  0x31   :  { %2521 = shalt.err (!%p2518_p9)
}
  0x32   :  { %s2555_s0 = smov 512   ;;  %s2556_s15 = smov 32  }
  0x33   :  { %44 = dma.hbm_to_vmem [thread:$0]  %s3032_s2, 8192, %s39_s11, [#allocation9], %s2555_s0, %s2555_s0, %s2556_s15  }
  0x34   :  { %2544 = dma.done.wait [#allocation6], 1024  }
  0x35   :  { %2545 = vsyncadd [#allocation6], 4294966272 }
  0x36   :  { %2546 = dma.done.wait [#allocation9], 8704  }
  0x37   :  { %2547 = vsyncadd [#allocation9], 4294958592  ;;  %v2557_v0 = vmov 0.0   ;;  %v69_v1 = vld [vmem:[#allocation8 + $0x8] sm:$0xff]  ;;  %v71_v2 = vld [vmem:[#allocation8 + $0x18] sm:$0xff]  ;;  %vm72_vm0 = vcmask 64512  }
  0x38   :  { %161 = vmatprep.mubr.f32.mxu0 %v2557_v0  ;;  %274 = vmatprep.mubr.f32.mxu1 %v2557_v0  ;;  %v68_v3 = vld [vmem:[#allocation8] sm:$0xff]  ;;  %v70_v4 = vld [vmem:[#allocation8 + $0x10] sm:$0xff]  ;;  %v356_v6 = vld [vmem:[#allocation10 + $0x8] sm:$0xff]  ;;  %s2558_s2 = smov [#allocation11]  }
  0x39   :  { %97 = vmatprep.subr.mxu0 %v69_v1  ;;  %210 = vmatprep.subr.mxu1 %v71_v2  ;;  %v60_v5 = vld [vmem:[#allocation5] sm:$0xff]  ;;  %v360_v7 = vld [vmem:[#allocation10 + $0x28] sm:$0xff]  ;;  %v358_v8 = vld [vmem:[#allocation10 + $0x18] sm:$0xff]  ;;  %s1794_s23 = sshll.u32 %s2558_s2, 4  ;;  %s1795_s23 = int_to_ptr.vmem [resolvable:$true] %s1794_s23 }
  0x3a   :  { %98 = vmatpush1.msra.mxu0 %v68_v3  ;;  %211 = vmatpush1.msra.mxu1 %v70_v4  ;;  %v362_v9 = vld [vmem:[#allocation10 + $0x38] sm:$0xff]  ;;  %v2629_v10 = vpack.c.bf16 %v360_v7, %v356_v6  ;;  %v355_v12 = vld [vmem:[#allocation10] sm:$0xff]  ;;  %v357_v14 = vld [vmem:[#allocation10 + $0x10] sm:$0xff]  ;;  %s2522_s24 = scalar_lea.vmem %s1795_s23, 1024  ;;  %p2527_p11 = scmp.lt.s32.totalorder %s1795_s23, %s1795_s23 }
  0x3b   :  { %1807 = vmatmul.mubr.msk.f32.vlgmr.msra.gmra.mrb[0].mxu0 %vm72_vm0, %v60_v5  ;;  %1815 = vmatmul.mubr.msk.f32.vlgmr.msra.gmra.mrb[0].mxu1 %vm72_vm0, %v60_v5  ;;  %v2631_v11 = vpack.c.bf16 %v362_v9, %v358_v8  ;;  %v359_v13 = vld [vmem:[#allocation10 + $0x20] sm:$0xff]  ;;  %v361_v16 = vld [vmem:[#allocation10 + $0x30] sm:$0xff]  ;;  %v61_v17 = vld [vmem:[#allocation5 + $0x8] sm:$0xff]  ;;  %p2523_p10 = scmp.ne.s32.totalorder %s1795_s23, %s2522_s24  ;;  %p2528_p12 = scmp.lt.s32.totalorder %s2522_s24, %s2522_s24 }
  0x3c   :  { %v2633_v15 = vpack.c.bf16 %v359_v13, %v355_v12  ;;  %167 = vmatprep.mubr.f32.mxu0 %v2557_v0  ;;  %280 = vmatprep.mubr.f32.mxu1 %v2557_v0  ;;  %v364_v18 = vld [vmem:[#allocation10 + $0x48] sm:$0xff]  ;;  %v2639_v19 = vpack.c.bf16 %v361_v16, %v357_v14  ;;  %v366_v21 = vld [vmem:[#allocation10 + $0x58] sm:$0xff]  ;;  %v363_v25 = vld [vmem:[#allocation10 + $0x40] sm:$0xff] }
  0x3d   :  { %1824 = vmatprep.subr.bf16.mxu0 %v2629_v10  ;;  %1856 = vmatprep.subr.bf16.mxu1 %v2631_v11  ;;  %v368_v20 = vld [vmem:[#allocation10 + $0x68] sm:$0xff]  ;;  %v370_v22 = vld [vmem:[#allocation10 + $0x78] sm:$0xff]  ;;  %v367_v26 = vld [vmem:[#allocation10 + $0x60] sm:$0xff]  ;;  %p2529_p13 = por %p2528_p12, %p2527_p11 }
  0x3e   :  { %1826 = vmatpush1.bf16.msra.mxu0 %v2633_v15  ;;  %v2642_v23 = vpack.c.bf16 %v368_v20, %v364_v18  ;;  %v2644_v24 = vpack.c.bf16 %v370_v22, %v366_v21  ;;  %v365_v27 = vld [vmem:[#allocation10 + $0x50] sm:$0xff]  ;;  %1858 = vmatpush1.bf16.msra.mxu1 %v2639_v19  ;;  %v2648_v28 = vpack.c.bf16 %v367_v26, %v363_v25  ;;  %v372_v31 = vld [vmem:[#allocation10 + $0x88] sm:$0xff]  ;;  %v374_v34 = vld [vmem:[#allocation10 + $0x98] sm:$0xff] }
  0x3f   :  { %1808 = vmatmul.mubr.msk.f32.gmra.mrb[2].mxu0 %vm72_vm0, %v61_v17  ;;  %v369_v29 = vld [vmem:[#allocation10 + $0x70] sm:$0xff]  ;;  %1816 = vmatmul.mubr.msk.f32.gmra.mrb[2].mxu1 %vm72_vm0, %v61_v17  ;;  %v376_v33 = vld [vmem:[#allocation10 + $0xa8] sm:$0xff]  ;;  %v378_v35 = vld [vmem:[#allocation10 + $0xb8] sm:$0xff]  ;;  %p2530_p0 = pnand %p2529_p13, %p2523_p10 }
  0x40   :  { %v62_v30 = vld [vmem:[#allocation5 + $0x10] sm:$0xff]  ;;  %1828 = vmatprep.subr.bf16.mxu0 %v2642_v23  ;;  %v2652_v32 = vpack.c.bf16 %v369_v29, %v365_v27  ;;  %1860 = vmatprep.subr.bf16.mxu1 %v2644_v24  ;;  %v2656_v36 = vpack.c.bf16 %v376_v33, %v372_v31  ;;  %v2658_v37 = vpack.c.bf16 %v378_v35, %v374_v34  ;;  %v371_v38 = vld [vmem:[#allocation10 + $0x80] sm:$0xff]  ;;  %v63_v43 = vld [vmem:[#allocation5 + $0x18] sm:$0xff] }
  0x41   :  { %173 = vmatprep.mubr.f32.mxu0 %v2557_v0  ;;  %v375_v39 = vld [vmem:[#allocation10 + $0xa0] sm:$0xff]  ;;  %v373_v40 = vld [vmem:[#allocation10 + $0x90] sm:$0xff]  ;;  %286 = vmatprep.mubr.f32.mxu1 %v2557_v0  ;;  %v380_v44 = vld [vmem:[#allocation10 + $0xc8] sm:$0xff] }
  0x42   :  { %1830 = vmatpush1.bf16.msra.mxu0 %v2648_v28  ;;  %v2662_v41 = vpack.c.bf16 %v375_v39, %v371_v38  ;;  %v377_v42 = vld [vmem:[#allocation10 + $0xb0] sm:$0xff]  ;;  %1862 = vmatpush1.bf16.msra.mxu1 %v2652_v32  ;;  %v384_v46 = vld [vmem:[#allocation10 + $0xe8] sm:$0xff]  ;;  %v382_v47 = vld [vmem:[#allocation10 + $0xd8] sm:$0xff] }
  0x43   :  { %1809 = vmatmul.mubr.msk.f32.gmra.mrb[4].mxu0 %vm72_vm0, %v62_v30  ;;  %v2666_v45 = vpack.c.bf16 %v377_v42, %v373_v40  ;;  %v386_v48 = vld [vmem:[#allocation10 + $0xf8] sm:$0xff]  ;;  %1817 = vmatmul.mubr.msk.f32.gmra.mrb[4].mxu1 %vm72_vm0, %v62_v30  ;;  %v2670_v49 = vpack.c.bf16 %v384_v46, %v380_v44  ;;  %v379_v50 = vld [vmem:[#allocation10 + $0xc0] sm:$0xff]  ;;  %v381_v52 = vld [vmem:[#allocation10 + $0xd0] sm:$0xff] }
  0x44   :  { %1832 = vmatprep.subr.bf16.mxu0 %v2656_v36  ;;  %v383_v51 = vld [vmem:[#allocation10 + $0xe0] sm:$0xff]  ;;  %1864 = vmatprep.subr.bf16.mxu1 %v2658_v37  ;;  %v2674_v53 = vpack.c.bf16 %v386_v48, %v382_v47  ;;  %v385_v54 = vld [vmem:[#allocation10 + $0xf0] sm:$0xff]  ;;  %v388_v55 = vld [vmem:[#allocation10 + $0x108] sm:$0xff] }
  0x45   :  { %179 = vmatprep.mubr.f32.mxu0 %v2557_v0  ;;  %292 = vmatprep.mubr.f32.mxu1 %v2557_v0  ;;  %v2678_v56 = vpack.c.bf16 %v383_v51, %v379_v50  ;;  %v392_v57 = vld [vmem:[#allocation10 + $0x128] sm:$0xff]  ;;  %v390_v58 = vld [vmem:[#allocation10 + $0x118] sm:$0xff]  ;;  %v2682_v60 = vpack.c.bf16 %v385_v54, %v381_v52  ;;  %v387_v61 = vld [vmem:[#allocation10 + $0x100] sm:$0xff] }
  0x46   :  { %1834 = vmatpush1.bf16.msra.mxu0 %v2662_v41  ;;  %v394_v59 = vld [vmem:[#allocation10 + $0x138] sm:$0xff]  ;;  %1866 = vmatpush1.bf16.msra.mxu1 %v2666_v45  ;;  %v391_v62 = vld [vmem:[#allocation10 + $0x120] sm:$0xff]  ;;  %v2686_v1 = vpack.c.bf16 %v392_v57, %v388_v55  ;;  %v389_v2 = vld [vmem:[#allocation10 + $0x110] sm:$0xff] }
  0x47   :  { %1810 = vmatmul.mubr.msk.f32.gmra.mrb[6].mxu0 %vm72_vm0, %v63_v43  ;;  %1818 = vmatmul.mubr.msk.f32.gmra.mrb[6].mxu1 %vm72_vm0, %v63_v43  ;;  %v64_v63 = vld [vmem:[#allocation5 + $0x20] sm:$0xff]  ;;  %v393_v3 = vld [vmem:[#allocation10 + $0x130] sm:$0xff]  ;;  %v2690_v4 = vpack.c.bf16 %v394_v59, %v390_v58  ;;  %v396_v5 = vld [vmem:[#allocation10 + $0x148] sm:$0xff]  ;;  %v2694_v7 = vpack.c.bf16 %v391_v62, %v387_v61 }
  0x48   :  { %1836 = vmatprep.subr.bf16.mxu0 %v2670_v49  ;;  %1868 = vmatprep.subr.bf16.mxu1 %v2674_v53  ;;  %v400_v6 = vld [vmem:[#allocation10 + $0x168] sm:$0xff]  ;;  %v398_v8 = vld [vmem:[#allocation10 + $0x158] sm:$0xff]  ;;  %v2698_v12 = vpack.c.bf16 %v393_v3, %v389_v2  ;;  %v395_v13 = vld [vmem:[#allocation10 + $0x140] sm:$0xff] }
  0x49   :  { %185 = vmatprep.mubr.f32.mxu0 %v2557_v0  ;;  %298 = vmatprep.mubr.f32.mxu1 %v2557_v0  ;;  %v402_v9 = vld [vmem:[#allocation10 + $0x178] sm:$0xff]  ;;  %v399_v14 = vld [vmem:[#allocation10 + $0x160] sm:$0xff]  ;;  %v65_v16 = vld [vmem:[#allocation5 + $0x28] sm:$0xff]  ;;  %v2702_v17 = vpack.c.bf16 %v400_v6, %v396_v5 }
  0x4a   :  { %1838 = vmatpush1.bf16.msra.mxu0 %v2678_v56  ;;  %1870 = vmatpush1.bf16.msra.mxu1 %v2682_v60  ;;  %v397_v18 = vld [vmem:[#allocation10 + $0x150] sm:$0xff]  ;;  %v2706_v21 = vpack.c.bf16 %v402_v9, %v398_v8  ;;  %v404_v22 = vld [vmem:[#allocation10 + $0x188] sm:$0xff]  ;;  %v2710_v26 = vpack.c.bf16 %v399_v14, %v395_v13  ;;  %v406_v27 = vld [vmem:[#allocation10 + $0x198] sm:$0xff] }
  0x4b   :  { %1811 = vmatmul.mubr.msk.f32.gmra.mrb[8].mxu0 %vm72_vm0, %v64_v63  ;;  %1819 = vmatmul.mubr.msk.f32.gmra.mrb[8].mxu1 %vm72_vm0, %v64_v63  ;;  %v401_v20 = vld [vmem:[#allocation10 + $0x170] sm:$0xff]  ;;  %v408_v25 = vld [vmem:[#allocation10 + $0x1a8] sm:$0xff]  ;;  %v410_v29 = vld [vmem:[#allocation10 + $0x1b8] sm:$0xff] }
  0x4c   :  { %1840 = vmatprep.subr.bf16.mxu0 %v2686_v1  ;;  %1872 = vmatprep.subr.bf16.mxu1 %v2690_v4  ;;  %v2714_v30 = vpack.c.bf16 %v401_v20, %v397_v18  ;;  %v403_v31 = vld [vmem:[#allocation10 + $0x180] sm:$0xff]  ;;  %v66_v34 = vld [vmem:[#allocation5 + $0x30] sm:$0xff]  ;;  %v2718_v35 = vpack.c.bf16 %v408_v25, %v404_v22  ;;  %v2722_v40 = vpack.c.bf16 %v410_v29, %v406_v27  ;;  %v412_v42 = vld [vmem:[#allocation10 + $0x1c8] sm:$0xff] }
  0x4d   :  { %191 = vmatprep.mubr.f32.mxu0 %v2557_v0  ;;  %304 = vmatprep.mubr.f32.mxu1 %v2557_v0  ;;  %v407_v33 = vld [vmem:[#allocation10 + $0x1a0] sm:$0xff]  ;;  %v405_v38 = vld [vmem:[#allocation10 + $0x190] sm:$0xff]  ;;  %v416_v43 = vld [vmem:[#allocation10 + $0x1e8] sm:$0xff] }
  0x4e   :  { %1842 = vmatpush1.bf16.msra.mxu0 %v2694_v7  ;;  %1874 = vmatpush1.bf16.msra.mxu1 %v2698_v12  ;;  %v409_v39 = vld [vmem:[#allocation10 + $0x1b0] sm:$0xff]  ;;  %v2726_v44 = vpack.c.bf16 %v407_v33, %v403_v31  ;;  %v414_v46 = vld [vmem:[#allocation10 + $0x1d8] sm:$0xff]  ;;  %v411_v50 = vld [vmem:[#allocation10 + $0x1c0] sm:$0xff]  ;;  %v2734_v54 = vpack.c.bf16 %v416_v43, %v412_v42 }
  0x4f   :  { %1812 = vmatmul.mubr.msk.f32.gmra.mrb[10].mxu0 %vm72_vm0, %v65_v16  ;;  %1820 = vmatmul.mubr.msk.f32.gmra.mrb[10].mxu1 %vm72_vm0, %v65_v16  ;;  %v418_v47 = vld [vmem:[#allocation10 + $0x1f8] sm:$0xff]  ;;  %v2730_v48 = vpack.c.bf16 %v409_v39, %v405_v38  ;;  %v415_v51 = vld [vmem:[#allocation10 + $0x1e0] sm:$0xff]  ;;  %v413_v55 = vld [vmem:[#allocation10 + $0x1d0] sm:$0xff] }
  0x50   :  { %1844 = vmatprep.subr.bf16.mxu0 %v2702_v17  ;;  %1876 = vmatprep.subr.bf16.mxu1 %v2706_v21  ;;  %v67_v52 = vld [vmem:[#allocation5 + $0x38] sm:$0xff]  ;;  %v417_v57 = vld [vmem:[#allocation10 + $0x1f0] sm:$0xff]  ;;  %v2738_v58 = vpack.c.bf16 %v418_v47, %v414_v46  ;;  %v2742_v59 = vpack.c.bf16 %v415_v51, %v411_v50 }
  0x51   :  { %197 = vmatprep.mubr.f32.mxu0 %v2557_v0  ;;  %310 = vmatprep.mubr.f32.mxu1 %v2557_v0  ;;  %v2746_v61 = vpack.c.bf16 %v417_v57, %v413_v55 }
  0x52   :  { %1846 = vmatpush1.bf16.msra.mxu0 %v2710_v26  ;;  %1878 = vmatpush1.bf16.msra.mxu1 %v2714_v30 }
  0x53   :  { %1813 = vmatmul.mubr.msk.f32.gmra.mrb[12].mxu0 %vm72_vm0, %v66_v34  ;;  %1821 = vmatmul.mubr.msk.f32.gmra.mrb[12].mxu1 %vm72_vm0, %v66_v34 }
  0x54   :  { %1848 = vmatprep.subr.bf16.mxu0 %v2718_v35  ;;  %1880 = vmatprep.subr.bf16.mxu1 %v2722_v40 }
  0x55   :  { %203 = vmatprep.mubr.f32.mxu0 %v2557_v0  ;;  %316 = vmatprep.mubr.f32.mxu1 %v2557_v0 }
  0x56   :  { %1850 = vmatpush1.bf16.msra.mxu0 %v2726_v44  ;;  %1882 = vmatpush1.bf16.msra.mxu1 %v2730_v48 }
  0x57   :  { %1814 = vmatmul.mubr.msk.f32.gmra.mrb[14].mxu0 %vm72_vm0, %v67_v52  ;;  %1822 = vmatmul.mubr.msk.f32.gmra.mrb[14].mxu1 %vm72_vm0, %v67_v52 }
  0x58   :  { %1852 = vmatprep.subr.bf16.mxu0 %v2734_v54  ;;  %1884 = vmatprep.subr.bf16.mxu1 %v2738_v58 }
  0x59   :  { %489 = vmatprep.mubr.f32.mxu0 %v2557_v0  ;;  %560 = vmatprep.mubr.f32.mxu1 %v2557_v0 }
  0x5a   :  { %1854 = vmatpush1.bf16.msra.mxu0 %v2742_v59  ;;  %1886 = vmatpush1.bf16.msra.mxu1 %v2746_v61 }
  0x5b   :  { %1888 = vmatprep.subr.bf16.mxu0 %v2629_v10  ;;  %1920 = vmatprep.subr.bf16.mxu1 %v2631_v11 }
  0x5d   :  { %490 = vmatmul.mubr.f32.vlgmr.msra.gmra.mrb[0].mxu0 %v2557_v0  ;;  %561 = vmatmul.mubr.f32.vlgmr.msra.gmra.mrb[0].mxu1 %v2557_v0 }
  0x5e   :  { %1890 = vmatpush1.bf16.msra.mxu0 %v2633_v15  ;;  %1922 = vmatpush1.bf16.msra.mxu1 %v2639_v19 }
  0x5f   :  { %1892 = vmatprep.subr.bf16.mxu0 %v2642_v23  ;;  %1924 = vmatprep.subr.bf16.mxu1 %v2644_v24 }
  0x60   :  { %659 = vmatprep.mubr.f32.mxu0 %v2557_v0  ;;  %730 = vmatprep.mubr.f32.mxu1 %v2557_v0 }
  0x62   :  { %1894 = vmatpush1.bf16.msra.mxu0 %v2648_v28  ;;  %1926 = vmatpush1.bf16.msra.mxu1 %v2652_v32 }
  0x63   :  { %1896 = vmatprep.subr.bf16.mxu0 %v2656_v36  ;;  %1928 = vmatprep.subr.bf16.mxu1 %v2658_v37 }
  0x66   :  { %1898 = vmatpush1.bf16.msra.mxu0 %v2662_v41  ;;  %1930 = vmatpush1.bf16.msra.mxu1 %v2666_v45 }
  0x67   :  { %1900 = vmatprep.subr.bf16.mxu0 %v2670_v49  ;;  %1932 = vmatprep.subr.bf16.mxu1 %v2674_v53 }
  0x6a   :  { %1902 = vmatpush1.bf16.msra.mxu0 %v2678_v56  ;;  %1934 = vmatpush1.bf16.msra.mxu1 %v2682_v60 }
  0x6b   :  { %1904 = vmatprep.subr.bf16.mxu0 %v2686_v1  ;;  %1936 = vmatprep.subr.bf16.mxu1 %v2690_v4 }
  0x6e   :  { %1906 = vmatpush1.bf16.msra.mxu0 %v2694_v7  ;;  %1938 = vmatpush1.bf16.msra.mxu1 %v2698_v12 }
  0x6f   :  { %1908 = vmatprep.subr.bf16.mxu0 %v2702_v17  ;;  %1940 = vmatprep.subr.bf16.mxu1 %v2706_v21 }
  0x72   :  { %1910 = vmatpush1.bf16.msra.mxu0 %v2710_v26  ;;  %1942 = vmatpush1.bf16.msra.mxu1 %v2714_v30 }
  0x73   :  { %1912 = vmatprep.subr.bf16.mxu0 %v2718_v35  ;;  %1944 = vmatprep.subr.bf16.mxu1 %v2722_v40 }
  0x76   :  { %1914 = vmatpush1.bf16.msra.mxu0 %v2726_v44  ;;  %1946 = vmatpush1.bf16.msra.mxu1 %v2730_v48 }
  0x77   :  { %1916 = vmatprep.subr.bf16.mxu0 %v2734_v54  ;;  %1948 = vmatprep.subr.bf16.mxu1 %v2738_v58 }
  0x7a   :  { %1918 = vmatpush1.bf16.msra.mxu0 %v2742_v59  ;;  %1950 = vmatpush1.bf16.msra.mxu1 %v2746_v61 }
  0x7b   :  { %1952 = vmatprep.subr.bf16.mxu0 %v2629_v10  ;;  %1984 = vmatprep.subr.bf16.mxu1 %v2631_v11 }
 0x130   :  { %v491_v62 = vpop.f32.mrb[0].mxu0  ;;  %v562_v2 = vpop.f32.mrb[0].mxu1 }
 0x131   :  { %v571_v63 = vmul.f32 0.5, %v491_v62  ;;  %v493_v3 = vpop.f32.mrb[1].mxu0  ;;  %v564_v6 = vpop.f32.mrb[1].mxu1 }
 0x132   :  { %v575_v5 = vmul.f32 0.5, %v493_v3  ;;  %v580_v8 = vmul.f32 0.5, %v564_v6 }
 0x133   :  { %2376 = vtanh.f32 %v571_v63 }
 0x134   :  { %2378 = vtanh.f32 %v575_v5 }
 0x135   :  { %2380 = vtanh.f32 %v562_v2 }
 0x136   :  { %2382 = vtanh.f32 %v580_v8 }
 0x13d   :  { %v2377_v9 = vpop.eup %2376 }
 0x13e   :  { %v2379_v13 = vpop.eup %2378  ;;  %v573_v14 = vmul.f32 0.5, %v2377_v9 }
 0x13f   :  { %v577_v16 = vmul.f32 0.5, %v2379_v13  ;;  %v2381_v20 = vpop.eup %2380 }
 0x140   :  { %v574_v18 = vadd.f32 0.5, %v573_v14  ;;  %v2383_v31 = vpop.eup %2382 }
 0x141   :  { %v578_v22 = vadd.f32 0.5, %v577_v16  ;;  %v582_v33 = vmul.f32 0.5, %v2383_v31 }
 0x142   :  { %v585_v25 = vmul.f32 %v2381_v20, %v574_v18 }
 0x143   :  { %v584_v27 = vmul.f32 0.0, %v578_v22  ;;  %v583_v34 = vadd.f32 0.5, %v582_v33 }
 0x145   :  { %v2793_v29 = vadd.f32 %v585_v25, %v584_v27 }
 0x147   :  { %2384 = vtanh.f32 %v2793_v29 }
 0x151   :  { %v2385_v38 = vpop.eup %2384 }
 0x152   :  { %v588_v39 = vmul.f32 %v2385_v38, %v583_v34 }
 0x154   :  { %589 = vst [vmem:[#allocation11] sm:$0xff] %v588_v39  ;;  %660 = vmatmul.mubr.f32.vlgmr.msra.gmra.mrb[2].mxu0 %v588_v39  ;;  %731 = vmatmul.mubr.f32.vlgmr.msra.gmra.mrb[2].mxu1 %v588_v39 }
 0x155   :  { %1954 = vmatpush1.bf16.msra.mxu0 %v2633_v15  ;;  %1986 = vmatpush1.bf16.msra.mxu1 %v2639_v19 }
 0x156   :  { %1956 = vmatprep.subr.bf16.mxu0 %v2642_v23  ;;  %1988 = vmatprep.subr.bf16.mxu1 %v2644_v24 }
 0x157   :  { %830 = vmatprep.mubr.f32.mxu0 %v2557_v0  ;;  %901 = vmatprep.mubr.f32.mxu1 %v2557_v0 }
 0x159   :  { %1958 = vmatpush1.bf16.msra.mxu0 %v2648_v28  ;;  %1990 = vmatpush1.bf16.msra.mxu1 %v2652_v32 }
 0x15a   :  { %1960 = vmatprep.subr.bf16.mxu0 %v2656_v36  ;;  %1992 = vmatprep.subr.bf16.mxu1 %v2658_v37 }
 0x15d   :  { %1962 = vmatpush1.bf16.msra.mxu0 %v2662_v41  ;;  %1994 = vmatpush1.bf16.msra.mxu1 %v2666_v45 }
 0x15e   :  { %1964 = vmatprep.subr.bf16.mxu0 %v2670_v49  ;;  %1996 = vmatprep.subr.bf16.mxu1 %v2674_v53 }
 0x161   :  { %1966 = vmatpush1.bf16.msra.mxu0 %v2678_v56  ;;  %1998 = vmatpush1.bf16.msra.mxu1 %v2682_v60 }
 0x162   :  { %1968 = vmatprep.subr.bf16.mxu0 %v2686_v1  ;;  %2000 = vmatprep.subr.bf16.mxu1 %v2690_v4 }
 0x165   :  { %1970 = vmatpush1.bf16.msra.mxu0 %v2694_v7  ;;  %2002 = vmatpush1.bf16.msra.mxu1 %v2698_v12 }
 0x166   :  { %1972 = vmatprep.subr.bf16.mxu0 %v2702_v17  ;;  %2004 = vmatprep.subr.bf16.mxu1 %v2706_v21 }
 0x169   :  { %1974 = vmatpush1.bf16.msra.mxu0 %v2710_v26  ;;  %2006 = vmatpush1.bf16.msra.mxu1 %v2714_v30 }
 0x16a   :  { %1976 = vmatprep.subr.bf16.mxu0 %v2718_v35  ;;  %2008 = vmatprep.subr.bf16.mxu1 %v2722_v40 }
 0x16d   :  { %1978 = vmatpush1.bf16.msra.mxu0 %v2726_v44  ;;  %2010 = vmatpush1.bf16.msra.mxu1 %v2730_v48 }
 0x16e   :  { %1980 = vmatprep.subr.bf16.mxu0 %v2734_v54  ;;  %2012 = vmatprep.subr.bf16.mxu1 %v2738_v58 }
 0x171   :  { %1982 = vmatpush1.bf16.msra.mxu0 %v2742_v59  ;;  %2014 = vmatpush1.bf16.msra.mxu1 %v2746_v61 }
 0x172   :  { %2016 = vmatprep.subr.bf16.mxu0 %v2629_v10  ;;  %2048 = vmatprep.subr.bf16.mxu1 %v2631_v11 }
 0x227   :  { %v661_v42 = vpop.f32.mrb[2].mxu0  ;;  %v732_v43 = vpop.f32.mrb[2].mxu1 }
 0x228   :  { %v741_v46 = vmul.f32 0.5, %v661_v42  ;;  %v663_v47 = vpop.f32.mrb[3].mxu0  ;;  %v734_v50 = vpop.f32.mrb[3].mxu1 }
 0x229   :  { %v745_v51 = vmul.f32 0.5, %v663_v47  ;;  %v750_v52 = vmul.f32 0.5, %v734_v50 }
 0x22a   :  { %2386 = vtanh.f32 %v741_v46 }
 0x22b   :  { %2388 = vtanh.f32 %v745_v51 }
 0x22c   :  { %2390 = vtanh.f32 %v732_v43 }
 0x22d   :  { %2392 = vtanh.f32 %v750_v52 }
 0x234   :  { %v2387_v55 = vpop.eup %2386 }
 0x235   :  { %v2389_v57 = vpop.eup %2388  ;;  %v743_v62 = vmul.f32 0.5, %v2387_v55 }
 0x236   :  { %v747_v63 = vmul.f32 0.5, %v2389_v57  ;;  %v2391_v3 = vpop.eup %2390 }
 0x237   :  { %v744_v2 = vadd.f32 0.5, %v743_v62  ;;  %v2393_v13 = vpop.eup %2392 }
 0x238   :  { %v748_v5 = vadd.f32 0.5, %v747_v63  ;;  %v752_v14 = vmul.f32 0.5, %v2393_v13 }
 0x239   :  { %v755_v6 = vmul.f32 %v2391_v3, %v744_v2 }
 0x23a   :  { %v754_v8 = vmul.f32 %v748_v5, %v2793_v29  ;;  %v753_v16 = vadd.f32 0.5, %v752_v14 }
 0x23c   :  { %v2831_v9 = vadd.f32 %v755_v6, %v754_v8 }
 0x23e   :  { %2394 = vtanh.f32 %v2831_v9 }
 0x248   :  { %v2395_v18 = vpop.eup %2394 }
 0x249   :  { %v758_v20 = vmul.f32 %v2395_v18, %v753_v16 }
 0x24b   :  { %760 = vst [vmem:[#allocation11 + $0x8] sm:$0xff] %v758_v20  ;;  %831 = vmatmul.mubr.f32.vlgmr.msra.gmra.mrb[4].mxu0 %v758_v20  ;;  %902 = vmatmul.mubr.f32.vlgmr.msra.gmra.mrb[4].mxu1 %v758_v20 }
 0x24c   :  { %2018 = vmatpush1.bf16.msra.mxu0 %v2633_v15  ;;  %2050 = vmatpush1.bf16.msra.mxu1 %v2639_v19 }
 0x24d   :  { %2020 = vmatprep.subr.bf16.mxu0 %v2642_v23  ;;  %2052 = vmatprep.subr.bf16.mxu1 %v2644_v24 }
 0x24e   :  { %1001 = vmatprep.mubr.f32.mxu0 %v2557_v0  ;;  %1072 = vmatprep.mubr.f32.mxu1 %v2557_v0 }
 0x250   :  { %2022 = vmatpush1.bf16.msra.mxu0 %v2648_v28  ;;  %2054 = vmatpush1.bf16.msra.mxu1 %v2652_v32 }
 0x251   :  { %2024 = vmatprep.subr.bf16.mxu0 %v2656_v36  ;;  %2056 = vmatprep.subr.bf16.mxu1 %v2658_v37 }
 0x254   :  { %2026 = vmatpush1.bf16.msra.mxu0 %v2662_v41  ;;  %2058 = vmatpush1.bf16.msra.mxu1 %v2666_v45 }
 0x255   :  { %2028 = vmatprep.subr.bf16.mxu0 %v2670_v49  ;;  %2060 = vmatprep.subr.bf16.mxu1 %v2674_v53 }
 0x258   :  { %2030 = vmatpush1.bf16.msra.mxu0 %v2678_v56  ;;  %2062 = vmatpush1.bf16.msra.mxu1 %v2682_v60 }
 0x259   :  { %2032 = vmatprep.subr.bf16.mxu0 %v2686_v1  ;;  %2064 = vmatprep.subr.bf16.mxu1 %v2690_v4 }
 0x25c   :  { %2034 = vmatpush1.bf16.msra.mxu0 %v2694_v7  ;;  %2066 = vmatpush1.bf16.msra.mxu1 %v2698_v12 }
 0x25d   :  { %2036 = vmatprep.subr.bf16.mxu0 %v2702_v17  ;;  %2068 = vmatprep.subr.bf16.mxu1 %v2706_v21 }
 0x260   :  { %2038 = vmatpush1.bf16.msra.mxu0 %v2710_v26  ;;  %2070 = vmatpush1.bf16.msra.mxu1 %v2714_v30 }
 0x261   :  { %2040 = vmatprep.subr.bf16.mxu0 %v2718_v35  ;;  %2072 = vmatprep.subr.bf16.mxu1 %v2722_v40 }
 0x264   :  { %2042 = vmatpush1.bf16.msra.mxu0 %v2726_v44  ;;  %2074 = vmatpush1.bf16.msra.mxu1 %v2730_v48 }
 0x265   :  { %2044 = vmatprep.subr.bf16.mxu0 %v2734_v54  ;;  %2076 = vmatprep.subr.bf16.mxu1 %v2738_v58 }
 0x268   :  { %2046 = vmatpush1.bf16.msra.mxu0 %v2742_v59  ;;  %2078 = vmatpush1.bf16.msra.mxu1 %v2746_v61 }
 0x269   :  { %2080 = vmatprep.subr.bf16.mxu0 %v2629_v10  ;;  %2112 = vmatprep.subr.bf16.mxu1 %v2631_v11 }
 0x31e   :  { %v832_v22 = vpop.f32.mrb[4].mxu0  ;;  %v903_v25 = vpop.f32.mrb[4].mxu1 }
 0x31f   :  { %v912_v27 = vmul.f32 0.5, %v832_v22  ;;  %v834_v29 = vpop.f32.mrb[5].mxu0  ;;  %v905_v31 = vpop.f32.mrb[5].mxu1 }
 0x320   :  { %v916_v33 = vmul.f32 0.5, %v834_v29  ;;  %v921_v34 = vmul.f32 0.5, %v905_v31 }
 0x321   :  { %2396 = vtanh.f32 %v912_v27 }
 0x322   :  { %2398 = vtanh.f32 %v916_v33 }
 0x323   :  { %2400 = vtanh.f32 %v903_v25 }
 0x324   :  { %2402 = vtanh.f32 %v921_v34 }
 0x32b   :  { %v2397_v38 = vpop.eup %2396 }
 0x32c   :  { %v2399_v39 = vpop.eup %2398  ;;  %v914_v42 = vmul.f32 0.5, %v2397_v38 }
 0x32d   :  { %v918_v43 = vmul.f32 0.5, %v2399_v39  ;;  %v2401_v47 = vpop.eup %2400 }
 0x32e   :  { %v915_v46 = vadd.f32 0.5, %v914_v42  ;;  %v2403_v57 = vpop.eup %2402 }
 0x32f   :  { %v919_v50 = vadd.f32 0.5, %v918_v43  ;;  %v923_v62 = vmul.f32 0.5, %v2403_v57 }
 0x330   :  { %v926_v51 = vmul.f32 %v2401_v47, %v915_v46 }
 0x331   :  { %v925_v52 = vmul.f32 %v919_v50, %v2831_v9  ;;  %v924_v63 = vadd.f32 0.5, %v923_v62 }
 0x333   :  { %v2869_v55 = vadd.f32 %v926_v51, %v925_v52 }
 0x335   :  { %2404 = vtanh.f32 %v2869_v55 }
 0x33f   :  { %v2405_v2 = vpop.eup %2404 }
 0x340   :  { %v929_v3 = vmul.f32 %v2405_v2, %v924_v63 }
 0x342   :  { %931 = vst [vmem:[#allocation11 + $0x10] sm:$0xff] %v929_v3  ;;  %1002 = vmatmul.mubr.f32.vlgmr.msra.gmra.mrb[6].mxu0 %v929_v3  ;;  %1073 = vmatmul.mubr.f32.vlgmr.msra.gmra.mrb[6].mxu1 %v929_v3 }
 0x343   :  { %2082 = vmatpush1.bf16.msra.mxu0 %v2633_v15  ;;  %2114 = vmatpush1.bf16.msra.mxu1 %v2639_v19 }
 0x344   :  { %2084 = vmatprep.subr.bf16.mxu0 %v2642_v23  ;;  %2116 = vmatprep.subr.bf16.mxu1 %v2644_v24 }
 0x345   :  { %1172 = vmatprep.mubr.f32.mxu0 %v2557_v0  ;;  %1243 = vmatprep.mubr.f32.mxu1 %v2557_v0 }
 0x347   :  { %2086 = vmatpush1.bf16.msra.mxu0 %v2648_v28  ;;  %2118 = vmatpush1.bf16.msra.mxu1 %v2652_v32 }
 0x348   :  { %2088 = vmatprep.subr.bf16.mxu0 %v2656_v36  ;;  %2120 = vmatprep.subr.bf16.mxu1 %v2658_v37 }
 0x34b   :  { %2090 = vmatpush1.bf16.msra.mxu0 %v2662_v41  ;;  %2122 = vmatpush1.bf16.msra.mxu1 %v2666_v45 }
 0x34c   :  { %2092 = vmatprep.subr.bf16.mxu0 %v2670_v49  ;;  %2124 = vmatprep.subr.bf16.mxu1 %v2674_v53 }
 0x34f   :  { %2094 = vmatpush1.bf16.msra.mxu0 %v2678_v56  ;;  %2126 = vmatpush1.bf16.msra.mxu1 %v2682_v60 }
 0x350   :  { %2096 = vmatprep.subr.bf16.mxu0 %v2686_v1  ;;  %2128 = vmatprep.subr.bf16.mxu1 %v2690_v4 }
 0x353   :  { %2098 = vmatpush1.bf16.msra.mxu0 %v2694_v7  ;;  %2130 = vmatpush1.bf16.msra.mxu1 %v2698_v12 }
 0x354   :  { %2100 = vmatprep.subr.bf16.mxu0 %v2702_v17  ;;  %2132 = vmatprep.subr.bf16.mxu1 %v2706_v21 }
 0x357   :  { %2102 = vmatpush1.bf16.msra.mxu0 %v2710_v26  ;;  %2134 = vmatpush1.bf16.msra.mxu1 %v2714_v30 }
 0x358   :  { %2104 = vmatprep.subr.bf16.mxu0 %v2718_v35  ;;  %2136 = vmatprep.subr.bf16.mxu1 %v2722_v40 }
 0x35b   :  { %2106 = vmatpush1.bf16.msra.mxu0 %v2726_v44  ;;  %2138 = vmatpush1.bf16.msra.mxu1 %v2730_v48 }
 0x35c   :  { %2108 = vmatprep.subr.bf16.mxu0 %v2734_v54  ;;  %2140 = vmatprep.subr.bf16.mxu1 %v2738_v58 }
 0x35f   :  { %2110 = vmatpush1.bf16.msra.mxu0 %v2742_v59  ;;  %2142 = vmatpush1.bf16.msra.mxu1 %v2746_v61 }
 0x360   :  { %2144 = vmatprep.subr.bf16.mxu0 %v2629_v10  ;;  %2176 = vmatprep.subr.bf16.mxu1 %v2631_v11 }
 0x415   :  { %v1003_v5 = vpop.f32.mrb[6].mxu0  ;;  %v1074_v6 = vpop.f32.mrb[6].mxu1 }
 0x416   :  { %v1083_v8 = vmul.f32 0.5, %v1003_v5  ;;  %v1005_v9 = vpop.f32.mrb[7].mxu0  ;;  %v1076_v13 = vpop.f32.mrb[7].mxu1 }
 0x417   :  { %v1087_v14 = vmul.f32 0.5, %v1005_v9  ;;  %v1092_v16 = vmul.f32 0.5, %v1076_v13 }
 0x418   :  { %2406 = vtanh.f32 %v1083_v8 }
 0x419   :  { %2408 = vtanh.f32 %v1087_v14 }
 0x41a   :  { %2410 = vtanh.f32 %v1074_v6 }
 0x41b   :  { %2412 = vtanh.f32 %v1092_v16 }
 0x422   :  { %v2407_v18 = vpop.eup %2406 }
 0x423   :  { %v2409_v20 = vpop.eup %2408  ;;  %v1085_v22 = vmul.f32 0.5, %v2407_v18 }
 0x424   :  { %v1089_v25 = vmul.f32 0.5, %v2409_v20  ;;  %v2411_v29 = vpop.eup %2410 }
 0x425   :  { %v1086_v27 = vadd.f32 0.5, %v1085_v22  ;;  %v2413_v39 = vpop.eup %2412 }
 0x426   :  { %v1090_v31 = vadd.f32 0.5, %v1089_v25  ;;  %v1094_v42 = vmul.f32 0.5, %v2413_v39 }
 0x427   :  { %v1097_v33 = vmul.f32 %v2411_v29, %v1086_v27 }
 0x428   :  { %v1096_v34 = vmul.f32 %v1090_v31, %v2869_v55  ;;  %v1095_v43 = vadd.f32 0.5, %v1094_v42 }
 0x42a   :  { %v2907_v38 = vadd.f32 %v1097_v33, %v1096_v34 }
 0x42c   :  { %2414 = vtanh.f32 %v2907_v38 }
 0x436   :  { %v2415_v46 = vpop.eup %2414 }
 0x437   :  { %v1100_v47 = vmul.f32 %v2415_v46, %v1095_v43 }
 0x439   :  { %1102 = vst [vmem:[#allocation11 + $0x18] sm:$0xff] %v1100_v47  ;;  %1173 = vmatmul.mubr.f32.vlgmr.msra.gmra.mrb[8].mxu0 %v1100_v47  ;;  %1244 = vmatmul.mubr.f32.vlgmr.msra.gmra.mrb[8].mxu1 %v1100_v47 }
 0x43a   :  { %2146 = vmatpush1.bf16.msra.mxu0 %v2633_v15  ;;  %2178 = vmatpush1.bf16.msra.mxu1 %v2639_v19 }
 0x43b   :  { %2148 = vmatprep.subr.bf16.mxu0 %v2642_v23  ;;  %2180 = vmatprep.subr.bf16.mxu1 %v2644_v24 }
 0x43c   :  { %1343 = vmatprep.mubr.f32.mxu0 %v2557_v0  ;;  %1414 = vmatprep.mubr.f32.mxu1 %v2557_v0 }
 0x43e   :  { %2150 = vmatpush1.bf16.msra.mxu0 %v2648_v28  ;;  %2182 = vmatpush1.bf16.msra.mxu1 %v2652_v32 }
 0x43f   :  { %2152 = vmatprep.subr.bf16.mxu0 %v2656_v36  ;;  %2184 = vmatprep.subr.bf16.mxu1 %v2658_v37 }
 0x442   :  { %2154 = vmatpush1.bf16.msra.mxu0 %v2662_v41  ;;  %2186 = vmatpush1.bf16.msra.mxu1 %v2666_v45 }
 0x443   :  { %2156 = vmatprep.subr.bf16.mxu0 %v2670_v49  ;;  %2188 = vmatprep.subr.bf16.mxu1 %v2674_v53 }
 0x446   :  { %2158 = vmatpush1.bf16.msra.mxu0 %v2678_v56  ;;  %2190 = vmatpush1.bf16.msra.mxu1 %v2682_v60 }
 0x447   :  { %2160 = vmatprep.subr.bf16.mxu0 %v2686_v1  ;;  %2192 = vmatprep.subr.bf16.mxu1 %v2690_v4 }
 0x44a   :  { %2162 = vmatpush1.bf16.msra.mxu0 %v2694_v7  ;;  %2194 = vmatpush1.bf16.msra.mxu1 %v2698_v12 }
 0x44b   :  { %2164 = vmatprep.subr.bf16.mxu0 %v2702_v17  ;;  %2196 = vmatprep.subr.bf16.mxu1 %v2706_v21 }
 0x44e   :  { %2166 = vmatpush1.bf16.msra.mxu0 %v2710_v26  ;;  %2198 = vmatpush1.bf16.msra.mxu1 %v2714_v30 }
 0x44f   :  { %2168 = vmatprep.subr.bf16.mxu0 %v2718_v35  ;;  %2200 = vmatprep.subr.bf16.mxu1 %v2722_v40 }
 0x452   :  { %2170 = vmatpush1.bf16.msra.mxu0 %v2726_v44  ;;  %2202 = vmatpush1.bf16.msra.mxu1 %v2730_v48 }
 0x453   :  { %2172 = vmatprep.subr.bf16.mxu0 %v2734_v54  ;;  %2204 = vmatprep.subr.bf16.mxu1 %v2738_v58 }
 0x456   :  { %2174 = vmatpush1.bf16.msra.mxu0 %v2742_v59  ;;  %2206 = vmatpush1.bf16.msra.mxu1 %v2746_v61 }
 0x457   :  { %2208 = vmatprep.subr.bf16.mxu0 %v2629_v10  ;;  %2240 = vmatprep.subr.bf16.mxu1 %v2631_v11 }
 0x50c   :  { %v1174_v50 = vpop.f32.mrb[8].mxu0  ;;  %v1245_v51 = vpop.f32.mrb[8].mxu1 }
 0x50d   :  { %v1254_v52 = vmul.f32 0.5, %v1174_v50  ;;  %v1176_v55 = vpop.f32.mrb[9].mxu0  ;;  %v1247_v57 = vpop.f32.mrb[9].mxu1 }
 0x50e   :  { %v1258_v62 = vmul.f32 0.5, %v1176_v55  ;;  %v1263_v63 = vmul.f32 0.5, %v1247_v57 }
 0x50f   :  { %2416 = vtanh.f32 %v1254_v52 }
 0x510   :  { %2418 = vtanh.f32 %v1258_v62 }
 0x511   :  { %2420 = vtanh.f32 %v1245_v51 }
 0x512   :  { %2422 = vtanh.f32 %v1263_v63 }
 0x519   :  { %v2417_v2 = vpop.eup %2416 }
 0x51a   :  { %v2419_v3 = vpop.eup %2418  ;;  %v1256_v5 = vmul.f32 0.5, %v2417_v2 }
 0x51b   :  { %v1260_v6 = vmul.f32 0.5, %v2419_v3  ;;  %v2421_v9 = vpop.eup %2420 }
 0x51c   :  { %v1257_v8 = vadd.f32 0.5, %v1256_v5  ;;  %v2423_v20 = vpop.eup %2422 }
 0x51d   :  { %v1261_v13 = vadd.f32 0.5, %v1260_v6  ;;  %v1265_v22 = vmul.f32 0.5, %v2423_v20 }
 0x51e   :  { %v1268_v14 = vmul.f32 %v2421_v9, %v1257_v8 }
 0x51f   :  { %v1267_v16 = vmul.f32 %v1261_v13, %v2907_v38  ;;  %v1266_v25 = vadd.f32 0.5, %v1265_v22 }
 0x521   :  { %v2945_v18 = vadd.f32 %v1268_v14, %v1267_v16 }
 0x523   :  { %2424 = vtanh.f32 %v2945_v18 }
 0x52d   :  { %v2425_v27 = vpop.eup %2424 }
 0x52e   :  { %v1271_v29 = vmul.f32 %v2425_v27, %v1266_v25 }
 0x530   :  { %1273 = vst [vmem:[#allocation11 + $0x20] sm:$0xff] %v1271_v29  ;;  %1344 = vmatmul.mubr.f32.vlgmr.msra.gmra.mrb[10].mxu0 %v1271_v29  ;;  %1415 = vmatmul.mubr.f32.vlgmr.msra.gmra.mrb[10].mxu1 %v1271_v29 }
 0x531   :  { %2210 = vmatpush1.bf16.msra.mxu0 %v2633_v15  ;;  %2242 = vmatpush1.bf16.msra.mxu1 %v2639_v19 }
 0x532   :  { %2212 = vmatprep.subr.bf16.mxu0 %v2642_v23  ;;  %2244 = vmatprep.subr.bf16.mxu1 %v2644_v24 }
 0x533   :  { %1514 = vmatprep.mubr.f32.mxu0 %v2557_v0  ;;  %1585 = vmatprep.mubr.f32.mxu1 %v2557_v0 }
 0x535   :  { %2214 = vmatpush1.bf16.msra.mxu0 %v2648_v28  ;;  %2246 = vmatpush1.bf16.msra.mxu1 %v2652_v32 }
 0x536   :  { %2216 = vmatprep.subr.bf16.mxu0 %v2656_v36  ;;  %2248 = vmatprep.subr.bf16.mxu1 %v2658_v37 }
 0x539   :  { %2218 = vmatpush1.bf16.msra.mxu0 %v2662_v41  ;;  %2250 = vmatpush1.bf16.msra.mxu1 %v2666_v45 }
 0x53a   :  { %2220 = vmatprep.subr.bf16.mxu0 %v2670_v49  ;;  %2252 = vmatprep.subr.bf16.mxu1 %v2674_v53 }
 0x53d   :  { %2222 = vmatpush1.bf16.msra.mxu0 %v2678_v56  ;;  %2254 = vmatpush1.bf16.msra.mxu1 %v2682_v60 }
 0x53e   :  { %2224 = vmatprep.subr.bf16.mxu0 %v2686_v1  ;;  %2256 = vmatprep.subr.bf16.mxu1 %v2690_v4 }
 0x541   :  { %2226 = vmatpush1.bf16.msra.mxu0 %v2694_v7  ;;  %2258 = vmatpush1.bf16.msra.mxu1 %v2698_v12 }
 0x542   :  { %2228 = vmatprep.subr.bf16.mxu0 %v2702_v17  ;;  %2260 = vmatprep.subr.bf16.mxu1 %v2706_v21 }
 0x545   :  { %2230 = vmatpush1.bf16.msra.mxu0 %v2710_v26  ;;  %2262 = vmatpush1.bf16.msra.mxu1 %v2714_v30 }
 0x546   :  { %2232 = vmatprep.subr.bf16.mxu0 %v2718_v35  ;;  %2264 = vmatprep.subr.bf16.mxu1 %v2722_v40 }
 0x549   :  { %2234 = vmatpush1.bf16.msra.mxu0 %v2726_v44  ;;  %2266 = vmatpush1.bf16.msra.mxu1 %v2730_v48 }
 0x54a   :  { %2236 = vmatprep.subr.bf16.mxu0 %v2734_v54  ;;  %2268 = vmatprep.subr.bf16.mxu1 %v2738_v58 }
 0x54d   :  { %2238 = vmatpush1.bf16.msra.mxu0 %v2742_v59  ;;  %2270 = vmatpush1.bf16.msra.mxu1 %v2746_v61 }
 0x54e   :  { %2272 = vmatprep.subr.bf16.mxu0 %v2629_v10  ;;  %2304 = vmatprep.subr.bf16.mxu1 %v2631_v11 }
 0x603   :  { %v1345_v31 = vpop.f32.mrb[10].mxu0  ;;  %v1416_v33 = vpop.f32.mrb[10].mxu1 }
 0x604   :  { %v1425_v34 = vmul.f32 0.5, %v1345_v31  ;;  %v1347_v38 = vpop.f32.mrb[11].mxu0  ;;  %v1418_v39 = vpop.f32.mrb[11].mxu1 }
 0x605   :  { %v1429_v42 = vmul.f32 0.5, %v1347_v38  ;;  %v1434_v43 = vmul.f32 0.5, %v1418_v39 }
 0x606   :  { %2426 = vtanh.f32 %v1425_v34 }
 0x607   :  { %2428 = vtanh.f32 %v1429_v42 }
 0x608   :  { %2430 = vtanh.f32 %v1416_v33 }
 0x609   :  { %2432 = vtanh.f32 %v1434_v43 }
 0x610   :  { %v2427_v46 = vpop.eup %2426 }
 0x611   :  { %v2429_v47 = vpop.eup %2428  ;;  %v1427_v50 = vmul.f32 0.5, %v2427_v46 }
 0x612   :  { %v1431_v51 = vmul.f32 0.5, %v2429_v47  ;;  %v2431_v55 = vpop.eup %2430 }
 0x613   :  { %v1428_v52 = vadd.f32 0.5, %v1427_v50  ;;  %v2433_v63 = vpop.eup %2432 }
 0x614   :  { %v1432_v10 = vadd.f32 0.5, %v1431_v51  ;;  %v1436_v2 = vmul.f32 0.5, %v2433_v63 }
 0x615   :  { %v1439_v57 = vmul.f32 %v2431_v55, %v1428_v52 }
 0x616   :  { %v1438_v11 = vmul.f32 %v1432_v10, %v2945_v18  ;;  %v1437_v3 = vadd.f32 0.5, %v1436_v2 }
 0x618   :  { %v1440_v62 = vadd.f32 %v1439_v57, %v1438_v11 }
 0x61a   :  { %2434 = vtanh.f32 %v1440_v62 }
 0x624   :  { %v2435_v5 = vpop.eup %2434 }
 0x625   :  { %v1442_v6 = vmul.f32 %v2435_v5, %v1437_v3 }
 0x627   :  { %1444 = vst [vmem:[#allocation11 + $0x28] sm:$0xff] %v1442_v6  ;;  %1515 = vmatmul.mubr.f32.vlgmr.msra.gmra.mrb[12].mxu0 %v1442_v6  ;;  %1586 = vmatmul.mubr.f32.vlgmr.msra.gmra.mrb[12].mxu1 %v1442_v6 }
 0x628   :  { %2274 = vmatpush1.bf16.msra.mxu0 %v2633_v15  ;;  %2306 = vmatpush1.bf16.msra.mxu1 %v2639_v19 }
 0x629   :  { %2276 = vmatprep.subr.bf16.mxu0 %v2642_v23  ;;  %2308 = vmatprep.subr.bf16.mxu1 %v2644_v24 }
 0x62a   :  { %1685 = vmatprep.mubr.f32.mxu0 %v2557_v0  ;;  %1756 = vmatprep.mubr.f32.mxu1 %v2557_v0 }
 0x62c   :  { %2278 = vmatpush1.bf16.msra.mxu0 %v2648_v28  ;;  %2310 = vmatpush1.bf16.msra.mxu1 %v2652_v32 }
 0x62d   :  { %2280 = vmatprep.subr.bf16.mxu0 %v2656_v36  ;;  %2312 = vmatprep.subr.bf16.mxu1 %v2658_v37 }
 0x630   :  { %2282 = vmatpush1.bf16.msra.mxu0 %v2662_v41  ;;  %2314 = vmatpush1.bf16.msra.mxu1 %v2666_v45 }
 0x631   :  { %2284 = vmatprep.subr.bf16.mxu0 %v2670_v49  ;;  %2316 = vmatprep.subr.bf16.mxu1 %v2674_v53 }
 0x634   :  { %2286 = vmatpush1.bf16.msra.mxu0 %v2678_v56  ;;  %2318 = vmatpush1.bf16.msra.mxu1 %v2682_v60 }
 0x635   :  { %2288 = vmatprep.subr.bf16.mxu0 %v2686_v1  ;;  %2320 = vmatprep.subr.bf16.mxu1 %v2690_v4 }
 0x638   :  { %2290 = vmatpush1.bf16.msra.mxu0 %v2694_v7  ;;  %2322 = vmatpush1.bf16.msra.mxu1 %v2698_v12 }
 0x639   :  { %2292 = vmatprep.subr.bf16.mxu0 %v2702_v17  ;;  %2324 = vmatprep.subr.bf16.mxu1 %v2706_v21 }
 0x63c   :  { %2294 = vmatpush1.bf16.msra.mxu0 %v2710_v26  ;;  %2326 = vmatpush1.bf16.msra.mxu1 %v2714_v30 }
 0x63d   :  { %2296 = vmatprep.subr.bf16.mxu0 %v2718_v35  ;;  %2328 = vmatprep.subr.bf16.mxu1 %v2722_v40 }
 0x640   :  { %2298 = vmatpush1.bf16.msra.mxu0 %v2726_v44  ;;  %2330 = vmatpush1.bf16.msra.mxu1 %v2730_v48 }
 0x641   :  { %2300 = vmatprep.subr.bf16.mxu0 %v2734_v54  ;;  %2332 = vmatprep.subr.bf16.mxu1 %v2738_v58 }
 0x644   :  { %2302 = vmatpush1.bf16.msra.mxu0 %v2742_v59  ;;  %2334 = vmatpush1.bf16.msra.mxu1 %v2746_v61 }
 0x6fa   :  { %v1516_v0 = vpop.f32.mrb[12].mxu0  ;;  %v1587_v15 = vpop.f32.mrb[12].mxu1 }
 0x6fb   :  { %v1596_v19 = vmul.f32 0.5, %v1516_v0  ;;  %v1518_v23 = vpop.f32.mrb[13].mxu0  ;;  %v1589_v24 = vpop.f32.mrb[13].mxu1 }
 0x6fc   :  { %v1600_v28 = vmul.f32 0.5, %v1518_v23  ;;  %v1605_v32 = vmul.f32 0.5, %v1589_v24 }
 0x6fd   :  { %2436 = vtanh.f32 %v1596_v19 }
 0x6fe   :  { %2438 = vtanh.f32 %v1600_v28 }
 0x6ff   :  { %2440 = vtanh.f32 %v1587_v15 }
 0x700   :  { %2442 = vtanh.f32 %v1605_v32 }
 0x707   :  { %v2437_v36 = vpop.eup %2436 }
 0x708   :  { %v2439_v37 = vpop.eup %2438  ;;  %v1598_v41 = vmul.f32 0.5, %v2437_v36 }
 0x709   :  { %v1602_v45 = vmul.f32 0.5, %v2439_v37  ;;  %v2441_v53 = vpop.eup %2440 }
 0x70a   :  { %v1599_v49 = vadd.f32 0.5, %v1598_v41  ;;  %v2443_v7 = vpop.eup %2442 }
 0x70b   :  { %v1603_v56 = vadd.f32 0.5, %v1602_v45  ;;  %v1607_v12 = vmul.f32 0.5, %v2443_v7 }
 0x70c   :  { %v1610_v60 = vmul.f32 %v2441_v53, %v1599_v49 }
 0x70d   :  { %v1609_v1 = vmul.f32 %v1603_v56, %v1440_v62  ;;  %v1608_v17 = vadd.f32 0.5, %v1607_v12 }
 0x70f   :  { %v1611_v4 = vadd.f32 %v1610_v60, %v1609_v1 }
 0x711   :  { %2444 = vtanh.f32 %v1611_v4 }
 0x71b   :  { %v2445_v21 = vpop.eup %2444 }
 0x71c   :  { %v1613_v26 = vmul.f32 %v2445_v21, %v1608_v17 }
 0x71e   :  { %1615 = vst [vmem:[#allocation11 + $0x30] sm:$0xff] %v1613_v26  ;;  %1686 = vmatmul.mubr.f32.vlgmr.msra.gmra.mrb[14].mxu0 %v1613_v26  ;;  %1757 = vmatmul.mubr.f32.vlgmr.msra.gmra.mrb[14].mxu1 %v1613_v26 }
 0x7f1   :  { %v1687_v30 = vpop.f32.mrb[14].mxu0  ;;  %v1758_v35 = vpop.f32.mrb[14].mxu1 }
 0x7f2   :  { %v1767_v40 = vmul.f32 0.5, %v1687_v30  ;;  %v1689_v44 = vpop.f32.mrb[15].mxu0  ;;  %v1760_v48 = vpop.f32.mrb[15].mxu1 }
 0x7f3   :  { %v1771_v54 = vmul.f32 0.5, %v1689_v44  ;;  %v1776_v58 = vmul.f32 0.5, %v1760_v48 }
 0x7f4   :  { %2446 = vtanh.f32 %v1767_v40 }
 0x7f5   :  { %2448 = vtanh.f32 %v1771_v54 }
 0x7f6   :  { %2450 = vtanh.f32 %v1758_v35 }
 0x7f7   :  { %2452 = vtanh.f32 %v1776_v58 }
 0x7fe   :  { %v2447_v59 = vpop.eup %2446 }
 0x7ff   :  { %v2449_v61 = vpop.eup %2448  ;;  %v1769_v8 = vmul.f32 0.5, %v2447_v59 }
 0x800   :  { %v1773_v9 = vmul.f32 0.5, %v2449_v61  ;;  %v2451_v14 = vpop.eup %2450 }
 0x801   :  { %v1770_v13 = vadd.f32 0.5, %v1769_v8  ;;  %v2453_v25 = vpop.eup %2452 }
 0x802   :  { %v1774_v16 = vadd.f32 0.5, %v1773_v9  ;;  %v1778_v27 = vmul.f32 0.5, %v2453_v25 }
 0x803   :  { %v1781_v18 = vmul.f32 %v2451_v14, %v1770_v13 }
 0x804   :  { %v1780_v20 = vmul.f32 %v1774_v16, %v1611_v4  ;;  %v1779_v29 = vadd.f32 0.5, %v1778_v27 }
 0x806   :  { %v1782_v22 = vadd.f32 %v1781_v18, %v1780_v20 }
 0x808   :  { %2454 = vtanh.f32 %v1782_v22 }
 0x812   :  { %v2455_v31 = vpop.eup %2454 }
 0x813   :  { %v1784_v33 = vmul.f32 %v2455_v31, %v1779_v29 }
 0x815   :  { %1786 = vst [vmem:[#allocation11 + $0x38] sm:$0xff] %v1784_v33 }
 0x816   :  { %2533 = shalt.err (!%p2530_p0)
}
 0x817   :  { %s2534_s27 = scalar_lea.hbm %s3033_s3, 1024 }
 0x818   :  { %p2535_p1 = scmp.ne.s32.totalorder %s3033_s3, %s2534_s27  ;;  %p2538_p2 = scmp.lt.u32.totalorder %s2534_s27, %s3033_s3 }
 0x81a   :  { %p2540_p3 = pnand %p2538_p2, %p2535_p1 }
 0x81c   :  { %2543 = shalt.err (!%p2540_p3)
}
 0x81d   :  { %1800 = dma.vmem_to_hbm [thread:$0]  %s1795_s23, 1024, %s3033_s3, [#allocation7], %s2552_s1, %s2552_s1, %s2553_s7  }
 0x81e   :  { %2548 = dma.done.wait [#allocation7], 1024  }
 0x81f   :  { %2549 = vsyncadd [#allocation7], 4294966272 }
 0x820   :  { %1804 = vsyncpa [#allocation6], 1 }
 0x821   :  { %1805 = vsyncpa [#allocation9], 1 }
 0x822   :  { %1806 = vsyncpa [#allocation7], 1 }

</bundles_post_ra>
